<compile_context>
chip_gen: v7x
topology: tpu7x:2x2x1
jax: 0.10.0
libtpu: 0.0.40
codegen_flags: <defaults>
</compile_context>

<pallas_src>
import functools

import jax
import jax.numpy as jnp
from jax.experimental import pallas as pl
from jax.experimental.pallas import tpu as pltpu


def _round_up(x, m):
    return ((x + m - 1) // m) * m


def _vmem_limit_bytes():
    # v5e/v6e: 128 MiB physical VMEM per core; v7x: 64 MiB -> leave more headroom.
    try:
        cap = pltpu.get_tpu_info().vmem_capacity_bytes
    except Exception:
        cap = 128 * 1024 * 1024
    return (64 if cap >= 128 * 1024 * 1024 else 48) * 1024 * 1024


_VMEM_LIMIT = _vmem_limit_bytes()
_DEFAULT_TILE_ROWS = 1024 if _VMEM_LIMIT >= 64 * 1024 * 1024 else 512


# ----------------------------------------------------------------------------
# Fused two-input dense kernel: out = x1 @ w1 + x2 @ w2 + b
# (bf16 x bf16 -> f32 on the MXU; rows and columns tiled)
# Used for the hoisted LSTM input projections (x = [prev_fwd | prev_bwd] or
# [word_emb | char_feat]) and the final label projection -- so the two halves
# are never physically concatenated.
# ----------------------------------------------------------------------------
def _dense2_kernel(x1_ref, x2_ref, w1_ref, w2_ref, b_ref, out_ref):
    acc = jnp.dot(x1_ref[...], w1_ref[...], preferred_element_type=jnp.float32)
    acc = acc + jnp.dot(x2_ref[...], w2_ref[...], preferred_element_type=jnp.float32)
    out_ref[...] = (acc + b_ref[...]).astype(out_ref.dtype)


def dense2(x1, x2, w1, w2, b, *, out_dtype=jnp.float32,
           tile_rows=None, tile_cols=512):
    n, k1 = x1.shape
    k2 = x2.shape[1]
    m = w1.shape[1]
    if tile_rows is None:
        tile_rows = _DEFAULT_TILE_ROWS

    x1 = x1.astype(jnp.bfloat16)
    x2 = x2.astype(jnp.bfloat16)
    w1 = w1.astype(jnp.bfloat16)
    w2 = w2.astype(jnp.bfloat16)
    b2 = b.reshape(1, m).astype(jnp.float32)

    tn = min(tile_rows, _round_up(n, 8))
    n_pad = _round_up(n, tn)
    tm = min(tile_cols, _round_up(m, 128))
    m_pad = _round_up(m, tm)
    if n_pad != n:
        x1 = jnp.pad(x1, ((0, n_pad - n), (0, 0)))
        x2 = jnp.pad(x2, ((0, n_pad - n), (0, 0)))
    if m_pad != m:  # lane-dense output (e.g. small label_size); sliced back below
        w1 = jnp.pad(w1, ((0, 0), (0, m_pad - m)))
        w2 = jnp.pad(w2, ((0, 0), (0, m_pad - m)))
        b2 = jnp.pad(b2, ((0, 0), (0, m_pad - m)))
    n_cols = m_pad // tm

    def wspec(rows):
        if n_cols == 1:  # constant block -> single buffer (VMEM headroom on v7x)
            return pl.BlockSpec((rows, tm), lambda i, j: (0, 0),
                                pipeline_mode=pl.Buffered(1))
        return pl.BlockSpec((rows, tm), lambda i, j: (0, j))

    out = pl.pallas_call(
        _dense2_kernel,
        out_shape=jax.ShapeDtypeStruct((n_pad, m_pad), out_dtype),
        grid=(n_pad // tn, n_cols),
        in_specs=[
            pl.BlockSpec((tn, k1), lambda i, j: (i, 0)),
            pl.BlockSpec((tn, k2), lambda i, j: (i, 0)),
            wspec(k1),
            wspec(k2),
            wspec(1),
        ],
        out_specs=pl.BlockSpec((tn, tm), lambda i, j: (i, j)),
        compiler_params=pltpu.CompilerParams(
            dimension_semantics=("parallel", "parallel"),
            vmem_limit_bytes=_VMEM_LIMIT),
    )(x1, x2, w1, w2, b2)
    if n_pad != n or m_pad != m:
        out = out[:n, :m]
    return out


# ----------------------------------------------------------------------------
# Character CNN: conv1d(kernel=3, pad=1) over chars, max-pool over chars, bias.
# Input presented as a lane-dense [N, (C+2)*Ec] slab; the 3 taps are fused into
# one [3*Ec, Hc] weight; bias added after the max (per-channel constant).
# ----------------------------------------------------------------------------
def _char_cnn_kernel(x_ref, w_ref, b_ref, out_ref, *, n_char, embed):
    x = x_ref[...]                       # [tn, (C+2)*Ec] bf16
    w = w_ref[...]                       # [3*Ec, Hc] bf16 (taps fused along K)
    best = None
    for p in range(n_char):              # small static C
        win = x[:, p * embed:(p + 3) * embed]           # [tn, 3*Ec]
        r = jnp.dot(win, w, preferred_element_type=jnp.float32)
        best = r if best is None else jnp.maximum(best, r)
    out_ref[...] = (best + b_ref[...]).astype(out_ref.dtype)


def char_cnn(char_flat, w, b, *, out_dtype=jnp.bfloat16, tile_rows=None):
    """char_flat: [N, C, Ec] -> [N, Hc]."""
    n, c, e = char_flat.shape
    hc = w.shape[2]
    if tile_rows is None:
        tile_rows = _DEFAULT_TILE_ROWS
    x = jnp.pad(char_flat.astype(jnp.bfloat16), ((0, 0), (1, 1), (0, 0)))
    x = x.reshape(n, (c + 2) * e)        # lane-dense 2-D layout, bf16 DMA
    w_flat = w.reshape(3 * e, hc).astype(jnp.bfloat16)
    b2 = b.reshape(1, hc).astype(jnp.float32)

    tn = min(tile_rows, _round_up(n, 8))
    n_pad = _round_up(n, tn)
    if n_pad != n:
        x = jnp.pad(x, ((0, n_pad - n), (0, 0)))

    out = pl.pallas_call(
        functools.partial(_char_cnn_kernel, n_char=c, embed=e),
        out_shape=jax.ShapeDtypeStruct((n_pad, hc), out_dtype),
        grid=(n_pad // tn,),
        in_specs=[
            pl.BlockSpec((tn, (c + 2) * e), lambda i: (i, 0)),
            pl.BlockSpec((3 * e, hc), lambda i: (0, 0), pipeline_mode=pl.Buffered(1)),
            pl.BlockSpec((1, hc), lambda i: (0, 0), pipeline_mode=pl.Buffered(1)),
        ],
        out_specs=pl.BlockSpec((tn, hc), lambda i: (i, 0)),
        compiler_params=pltpu.CompilerParams(
            dimension_semantics=("parallel",),
            vmem_limit_bytes=_VMEM_LIMIT),
    )(x, w_flat, b2)
    return out[:n] if n_pad != n else out


# ----------------------------------------------------------------------------
# Fused bidirectional LSTM recurrence, time-chunked.  Gate pre-activations
# (x @ W_ih + b) are hoisted out; only h_prev @ W_hh runs per step.  Padding
# positions (pos >= len[b]) neither update state nor emit output
# (pack_padded_sequence semantics).
# ----------------------------------------------------------------------------
def _bilstm_rec_kernel(lens_ref, gf_ref, gb_ref, whf_ref, whb_ref,
                       outf_ref, outb_ref,
                       hf_sc, cf_sc, hb_sc, cb_sc,
                       *, hidden, chunk, seq_len):
    c = pl.program_id(0)

    @pl.when(c == 0)
    def _():
        hf_sc[...] = jnp.zeros_like(hf_sc)
        cf_sc[...] = jnp.zeros_like(cf_sc)
        hb_sc[...] = jnp.zeros_like(hb_sc)
        cb_sc[...] = jnp.zeros_like(cb_sc)

    lens_vec = lens_ref[...]                 # [B, 1] int32 resident block
    base = c * chunk

    def cell(gates_pre, whh_ref, h_sc, c_sc, pos):
        h_prev = h_sc[...]
        c_prev = c_sc[...]
        gates = gates_pre.astype(jnp.float32) + jnp.dot(
            h_prev.astype(jnp.bfloat16), whh_ref[...],
            preferred_element_type=jnp.float32)
        # torch gate order i, f, g, o (4*H is a 128 multiple -> aligned slices).
        # TODO(synk): pick H itself a multiple of 128 in production configs.
        i = jax.nn.sigmoid(gates[:, 0 * hidden:1 * hidden])
        f = jax.nn.sigmoid(gates[:, 1 * hidden:2 * hidden])
        g = jnp.tanh(gates[:, 2 * hidden:3 * hidden])
        o = jax.nn.sigmoid(gates[:, 3 * hidden:4 * hidden])
        c_new = f * c_prev + i * g
        h_new = o * jnp.tanh(c_new)
        mask = pos < lens_vec                # [B, 1] pack_padded semantics
        h_sc[...] = jnp.where(mask, h_new, h_prev)
        c_sc[...] = jnp.where(mask, c_new, c_prev)
        return jnp.where(mask, h_new, jnp.zeros_like(h_new))

    def body(j, carry):
        # forward: sequence position base + j == row j of this chunk
        outf_ref[j] = cell(gf_ref[j], whf_ref, hf_sc, cf_sc,
                           base + j).astype(outf_ref.dtype)
        # backward: position seq_len-1-(base+j) == row chunk-1-j of the mirrored
        # chunk -> stored directly in natural time order.
        rj = chunk - 1 - j
        outb_ref[rj] = cell(gb_ref[rj], whb_ref, hb_sc, cb_sc,
                            seq_len - 1 - (base + j)).astype(outb_ref.dtype)
        return carry

    jax.lax.fori_loop(0, chunk, body, 0, unroll=True)


def bilstm_layer(x1, x2, lens2, layer_params, *, time_chunk=16):
    """One bidirectional LSTM layer.

    x1, x2: the two halves of the layer input, time-major flattened [S*B, *].
    Returns (h_fwd, h_bwd) as time-major flattened [S*B, H] bf16 arrays.
    """
    whh_f = layer_params['whh_f']
    whh_b = layer_params['whh_b']
    h = whh_f.shape[0]
    bsz = lens2.shape[0]
    n = x1.shape[0]
    s = n // bsz
    assert (4 * h) % 128 == 0, "need 4*lstm_hidden % 128 == 0 for aligned gate blocks"

    # Hoisted input projection for BOTH directions; bf16 output halves the
    # per-chunk gate DMA inside the recurrence.
    gates = dense2(x1, x2, layer_params['wih_a'], layer_params['wih_b'],
                   layer_params['b'], out_dtype=jnp.bfloat16)
    gates_tm = gates.reshape(s, bsz, 8 * h)

    ts = min(time_chunk, s)
    s_pad = _round_up(s, ts)
    if s_pad != s:
        gates_tm = jnp.pad(gates_tm, ((0, s_pad - s), (0, 0), (0, 0)))
    nc = s_pad // ts

    kern = functools.partial(_bilstm_rec_kernel, hidden=h, chunk=ts, seq_len=s_pad)
    out_f, out_b = pl.pallas_call(
        kern,
        out_shape=(jax.ShapeDtypeStruct((s_pad, bsz, h), jnp.bfloat16),
                   jax.ShapeDtypeStruct((s_pad, bsz, h), jnp.bfloat16)),
        grid=(nc,),
        in_specs=[
            # per-batch lengths: tiny constant block, single buffer
            pl.BlockSpec((bsz, 1), lambda c: (0, 0), pipeline_mode=pl.Buffered(1)),
            # fwd / bwd gate chunks: two column-block views of the SAME [S,B,8H]
            # array -- no wrapper-side slicing copies.
            pl.BlockSpec((ts, bsz, 4 * h), lambda c: (c, 0, 0)),
            pl.BlockSpec((ts, bsz, 4 * h), lambda c: (nc - 1 - c, 0, 1)),
            # recurrent weights: constant blocks, single buffer
            pl.BlockSpec((h, 4 * h), lambda c: (0, 0), pipeline_mode=pl.Buffered(1)),
            pl.BlockSpec((h, 4 * h), lambda c: (0, 0), pipeline_mode=pl.Buffered(1)),
        ],
        out_specs=(
            pl.BlockSpec((ts, bsz, h), lambda c: (c, 0, 0)),
            # backward half written at the mirrored chunk index -> already in
            # natural time order; no reverse / concat copy in the wrapper.
            pl.BlockSpec((ts, bsz, h), lambda c: (nc - 1 - c, 0, 0)),
        ),
        scratch_shapes=[
            pltpu.VMEM((bsz, h), jnp.float32),   # h fwd
            pltpu.VMEM((bsz, h), jnp.float32),   # c fwd
            pltpu.VMEM((bsz, h), jnp.float32),   # h bwd
            pltpu.VMEM((bsz, h), jnp.float32),   # c bwd
        ],
        compiler_params=pltpu.CompilerParams(
            dimension_semantics=("arbitrary",),   # sequential recurrence
            vmem_limit_bytes=_VMEM_LIMIT),
    )(lens2, gates_tm, gates_tm,
      whh_f.astype(jnp.bfloat16), whh_b.astype(jnp.bfloat16))
    # TODO(synk): on v7x, split the two directions across the dual TensorCores
    # (core-parallel leading grid axis) for ~2x on the recurrence portion.
    # TODO(synk): on v6e/v7x with H <= 128, fuse the two h@Whh matmuls into one
    # block-diagonal [B,2H]@[2H,8H] matmul to fill the 256-deep MXU.
    if s_pad != s:
        out_f, out_b = out_f[:s], out_b[:s]
    return out_f.reshape(n, h), out_b.reshape(n, h)


# ----------------------------------------------------------------------------
# Full forward pass (plain-JAX glue around the Pallas kernels).
# ----------------------------------------------------------------------------
def bilstm_seq_label_forward(params, word_idx, char_idx, word_lens):
    bsz, s = word_idx.shape
    n_tok = bsz * s

    # Transpose the (tiny) index arrays up front so everything downstream is
    # already time-major -> no float [B,S,*]<->[S,B,*] transposes between kernels.
    word_idx_tm = word_idx.T                            # [S, B]
    char_idx_tm = jnp.transpose(char_idx, (1, 0, 2))    # [S, B, C]

    # WordEmbed
    word_emb = params['word_table'][word_idx_tm]        # [S, B, Ew]

    # CharacterCNN
    char_emb = params['char_table'][char_idx_tm]        # [S, B, C, Ec]
    char_flat = char_emb.reshape(n_tok, char_emb.shape[2], char_emb.shape[3])
    char_feat = char_cnn(char_flat, params['char_w'], params['char_b'])  # [S*B, Hc]

    # TODO(synk): Dropout layers are stochastic in train mode; identity here (eval).
    # The fusion concat is never materialized: layer-0 weights are split so the
    # word and char halves are consumed directly.
    x1 = word_emb.reshape(n_tok, -1)
    x2 = char_feat

    lens2 = word_lens.astype(jnp.int32).reshape(bsz, 1)
    for lp in params['lstm_layers']:
        x1, x2 = bilstm_layer(x1, x2, lens2, lp)

    # ProjectLayer (split over fwd/bwd halves, lane-padded output); argmax in XLA.
    score_flat = dense2(x1, x2, params['proj_w_f'], params['proj_w_b'],
                        params['proj_b'], out_dtype=jnp.float32)
    token_score = score_flat.reshape(s, bsz, -1).transpose(1, 0, 2)   # [B, S, L]
    predict_label_ids = jnp.argmax(token_score, axis=-1)
    return token_score, predict_label_ids


# ----------------------------------------------------------------------------
# Deterministic parameter init (synthetic; shapes follow the module __init__).
# Matmul weights stored in bf16; biases / embedding tables in f32.  Weights that
# multiply a concatenated input are stored pre-split ('*_a' / '*_b', '_f'/'_b').
# ----------------------------------------------------------------------------
def init_params(key, cfg, word_vocab, char_vocab, label_size):
    def nrm(k, shape, scale=0.1, dtype=jnp.float32):
        return (scale * jax.random.normal(k, shape)).astype(dtype)

    keys = iter(jax.random.split(key, 64))
    ew, ec = cfg['word_embed_dim'], cfg['char_embed_dim']
    hc, h = cfg['char_hidden_dim'], cfg['lstm_hidden']

    params = {
        'word_table': nrm(next(keys), (word_vocab, ew)),
        'char_table': nrm(next(keys), (char_vocab, ec)),
        # conv1d taps: char_w[k] is the [Ec, Hc] matrix for kernel offset k
        'char_w': nrm(next(keys), (3, ec, hc), dtype=jnp.bfloat16),
        'char_b': nrm(next(keys), (hc,)),
        # projection weight split over the fwd / bwd context halves
        'proj_w_f': nrm(next(keys), (h, label_size), dtype=jnp.bfloat16),
        'proj_w_b': nrm(next(keys), (h, label_size), dtype=jnp.bfloat16),
        'proj_b': nrm(next(keys), (label_size,)),
        'lstm_layers': [],
    }
    # Layer input = [part_a | part_b]: layer 0 -> (word_emb, char_feat),
    # layers > 0 -> (h_fwd, h_bwd) of the previous layer.
    d_a, d_b = ew, hc
    for _ in range(cfg['lstm_layer_num']):
        params['lstm_layers'].append({
            # columns [:4H] = forward-direction gates, [4H:] = backward (i,f,g,o)
            'wih_a': nrm(next(keys), (d_a, 8 * h), dtype=jnp.bfloat16),
            'wih_b': nrm(next(keys), (d_b, 8 * h), dtype=jnp.bfloat16),
            # NOTE: equals torch's b_ih + b_hh (torch keeps two bias vectors).
            'b': nrm(next(keys), (8 * h,)),
            'whh_f': nrm(next(keys), (h, 4 * h), dtype=jnp.bfloat16),
            'whh_b': nrm(next(keys), (h, 4 * h), dtype=jnp.bfloat16),
        })
        d_a, d_b = h, h
    return params


if __name__ == "__main__":
    cfg = dict(word_embed_dim=16, char_embed_dim=8, char_hidden_dim=16,
               lstm_hidden=32, lstm_layer_num=2, drop_out=0.5)
    B, S, C = 2, 8, 6
    WORD_VOCAB, CHAR_VOCAB, LABEL_SIZE = 50, 30, 10

    root = jax.random.PRNGKey(0)
    k_param, k_word, k_char = jax.random.split(root, 3)

    params = init_params(k_param, cfg, WORD_VOCAB, CHAR_VOCAB, LABEL_SIZE)
    word_idx = jax.random.randint(k_word, (B, S), 0, WORD_VOCAB, dtype=jnp.int32)
    char_idx = jax.random.randint(k_char, (B, S, C), 0, CHAR_VOCAB, dtype=jnp.int32)
    word_lens = jnp.array([S, 5], dtype=jnp.int32)

    fwd = jax.jit(bilstm_seq_label_forward)
    token_score, predict_label_ids = fwd(params, word_idx, char_idx, word_lens)
    jax.block_until_ready((token_score, predict_label_ids))

    assert token_score.shape == (B, S, LABEL_SIZE)
    assert predict_label_ids.shape == (B, S)
    assert bool(jnp.isfinite(token_score).all())
    print("KERNEL_OK")
</pallas_src>

<mosaic_0001>
module attributes {stable_mosaic.version = 11 : i64} {
  func.func @_char_cnn_kernel(%arg0: i32, %arg1: memref<16x64xbf16, #tpu.memory_space<vmem>>, %arg2: memref<24x16xbf16, #tpu.memory_space<vmem>>, %arg3: memref<1x16xf32, #tpu.memory_space<vmem>>, %arg4: memref<16x16xbf16, #tpu.memory_space<vmem>>) attributes {dimension_semantics = [#tpu.dimension_semantics<parallel>], iteration_bounds = array<i64: 1>, scalar_prefetch = 0 : i64, scratch_operands = 0 : i64, tpu.core_type = #tpu.core_type<tc>, window_params = [{transform_indices = @transform_0, window_bounds = array<i64: 16, 64>}, {pipeline_mode = #tpu.pipeline_mode<synchronous>, transform_indices = @transform_1, window_bounds = array<i64: 24, 16>}, {pipeline_mode = #tpu.pipeline_mode<synchronous>, transform_indices = @transform_2, window_bounds = array<i64: 1, 16>}, {transform_indices = @transform_3, window_bounds = array<i64: 16, 16>}]} {
    %c0 = arith.constant 0 : index
    %c0_0 = arith.constant 0 : index
    %0 = vector.load %arg1[%c0, %c0_0] : memref<16x64xbf16, #tpu.memory_space<vmem>>, vector<16x64xbf16>
    %c0_1 = arith.constant 0 : index
    %c0_2 = arith.constant 0 : index
    %1 = vector.load %arg2[%c0_1, %c0_2] : memref<24x16xbf16, #tpu.memory_space<vmem>>, vector<24x16xbf16>
    %2 = vector.extract_strided_slice %0 {offsets = [0, 0], sizes = [16, 24], strides = [1, 1]} : vector<16x64xbf16> to vector<16x24xbf16>
    %cst = arith.constant dense<0.000000e+00> : vector<16x16xf32>
    %3 = tpu.matmul %2, %1, %cst {dimension_numbers = #tpu.dot_dimension_numbers<[1], [0], [0], [1], [0, 0, 1, 1], [], []>} : vector<16x24xbf16>, vector<24x16xbf16>, vector<16x16xf32> -> vector<16x16xf32>
    %4 = vector.extract_strided_slice %0 {offsets = [0, 8], sizes = [16, 24], strides = [1, 1]} : vector<16x64xbf16> to vector<16x24xbf16>
    %cst_3 = arith.constant dense<0.000000e+00> : vector<16x16xf32>
    %5 = tpu.matmul %4, %1, %cst_3 {dimension_numbers = #tpu.dot_dimension_numbers<[1], [0], [0], [1], [0, 0, 1, 1], [], []>} : vector<16x24xbf16>, vector<24x16xbf16>, vector<16x16xf32> -> vector<16x16xf32>
    %6 = arith.maximumf %3, %5 : vector<16x16xf32>
    %7 = vector.extract_strided_slice %0 {offsets = [0, 16], sizes = [16, 24], strides = [1, 1]} : vector<16x64xbf16> to vector<16x24xbf16>
    %cst_4 = arith.constant dense<0.000000e+00> : vector<16x16xf32>
    %8 = tpu.matmul %7, %1, %cst_4 {dimension_numbers = #tpu.dot_dimension_numbers<[1], [0], [0], [1], [0, 0, 1, 1], [], []>} : vector<16x24xbf16>, vector<24x16xbf16>, vector<16x16xf32> -> vector<16x16xf32>
    %9 = arith.maximumf %6, %8 : vector<16x16xf32>
    %10 = vector.extract_strided_slice %0 {offsets = [0, 24], sizes = [16, 24], strides = [1, 1]} : vector<16x64xbf16> to vector<16x24xbf16>
    %cst_5 = arith.constant dense<0.000000e+00> : vector<16x16xf32>
    %11 = tpu.matmul %10, %1, %cst_5 {dimension_numbers = #tpu.dot_dimension_numbers<[1], [0], [0], [1], [0, 0, 1, 1], [], []>} : vector<16x24xbf16>, vector<24x16xbf16>, vector<16x16xf32> -> vector<16x16xf32>
    %12 = arith.maximumf %9, %11 : vector<16x16xf32>
    %13 = vector.extract_strided_slice %0 {offsets = [0, 32], sizes = [16, 24], strides = [1, 1]} : vector<16x64xbf16> to vector<16x24xbf16>
    %cst_6 = arith.constant dense<0.000000e+00> : vector<16x16xf32>
    %14 = tpu.matmul %13, %1, %cst_6 {dimension_numbers = #tpu.dot_dimension_numbers<[1], [0], [0], [1], [0, 0, 1, 1], [], []>} : vector<16x24xbf16>, vector<24x16xbf16>, vector<16x16xf32> -> vector<16x16xf32>
    %15 = arith.maximumf %12, %14 : vector<16x16xf32>
    %16 = vector.extract_strided_slice %0 {offsets = [0, 40], sizes = [16, 24], strides = [1, 1]} : vector<16x64xbf16> to vector<16x24xbf16>
    %cst_7 = arith.constant dense<0.000000e+00> : vector<16x16xf32>
    %17 = tpu.matmul %16, %1, %cst_7 {dimension_numbers = #tpu.dot_dimension_numbers<[1], [0], [0], [1], [0, 0, 1, 1], [], []>} : vector<16x24xbf16>, vector<24x16xbf16>, vector<16x16xf32> -> vector<16x16xf32>
    %18 = arith.maximumf %15, %17 : vector<16x16xf32>
    %c0_8 = arith.constant 0 : index
    %c0_9 = arith.constant 0 : index
    %19 = vector.load %arg3[%c0_8, %c0_9] : memref<1x16xf32, #tpu.memory_space<vmem>>, vector<1x16xf32>
    %20 = vector.broadcast %19 : vector<1x16xf32> to vector<16x16xf32>
    %21 = arith.addf %18, %20 : vector<16x16xf32>
    %22 = arith.truncf %21 : vector<16x16xf32> to vector<16x16xbf16>
    %c0_10 = arith.constant 0 : index
    %c0_11 = arith.constant 0 : index
    %23 = vector.load %arg4[%c0_10, %c0_11] : memref<16x16xbf16, #tpu.memory_space<vmem>>, vector<16x16xbf16>
    tpu.vector_store %arg4[%c0_10, %c0_11], %22 {strides = array<i32>} : memref<16x16xbf16, #tpu.memory_space<vmem>>, vector<16x16xbf16>,
    return
  }
  func.func @transform_0(%arg0: i32) -> (i32, i32) {
    %c0_i32 = arith.constant 0 : i32
    %c0_i32_0 = arith.constant 0 : i32
    return %arg0, %c0_i32 : i32, i32
  }
  func.func @transform_1(%arg0: i32) -> (i32, i32) {
    %c0_i32 = arith.constant 0 : i32
    %c0_i32_0 = arith.constant 0 : i32
    %c0_i32_1 = arith.constant 0 : i32
    return %c0_i32, %c0_i32_0 : i32, i32
  }
  func.func @transform_2(%arg0: i32) -> (i32, i32) {
    %c0_i32 = arith.constant 0 : i32
    %c0_i32_0 = arith.constant 0 : i32
    %c0_i32_1 = arith.constant 0 : i32
    return %c0_i32, %c0_i32_0 : i32, i32
  }
  func.func @transform_3(%arg0: i32) -> (i32, i32) {
    %c0_i32 = arith.constant 0 : i32
    %c0_i32_0 = arith.constant 0 : i32
    return %arg0, %c0_i32 : i32, i32
  }
}

module attributes {stable_mosaic.version = 11 : i64} {
  func.func @_dense2_kernel(%arg0: i32, %arg1: i32, %arg2: memref<16x16xbf16, #tpu.memory_space<vmem>>, %arg3: memref<16x16xbf16, #tpu.memory_space<vmem>>, %arg4: memref<16x256xbf16, #tpu.memory_space<vmem>>, %arg5: memref<16x256xbf16, #tpu.memory_space<vmem>>, %arg6: memref<1x256xf32, #tpu.memory_space<vmem>>, %arg7: memref<16x256xbf16, #tpu.memory_space<vmem>>) attributes {dimension_semantics = [#tpu.dimension_semantics<parallel>, #tpu.dimension_semantics<parallel>], iteration_bounds = array<i64: 1, 1>, scalar_prefetch = 0 : i64, scratch_operands = 0 : i64, tpu.core_type = #tpu.core_type<tc>, window_params = [{transform_indices = @transform_0, window_bounds = array<i64: 16, 16>}, {transform_indices = @transform_1, window_bounds = array<i64: 16, 16>}, {pipeline_mode = #tpu.pipeline_mode<synchronous>, transform_indices = @transform_2, window_bounds = array<i64: 16, 256>}, {pipeline_mode = #tpu.pipeline_mode<synchronous>, transform_indices = @transform_3, window_bounds = array<i64: 16, 256>}, {pipeline_mode = #tpu.pipeline_mode<synchronous>, transform_indices = @transform_4, window_bounds = array<i64: 1, 256>}, {transform_indices = @transform_5, window_bounds = array<i64: 16, 256>}]} {
    %c0 = arith.constant 0 : index
    %c0_0 = arith.constant 0 : index
    %0 = vector.load %arg2[%c0, %c0_0] : memref<16x16xbf16, #tpu.memory_space<vmem>>, vector<16x16xbf16>
    %c0_1 = arith.constant 0 : index
    %c0_2 = arith.constant 0 : index
    %1 = vector.load %arg4[%c0_1, %c0_2] : memref<16x256xbf16, #tpu.memory_space<vmem>>, vector<16x256xbf16>
    %cst = arith.constant dense<0.000000e+00> : vector<16x256xf32>
    %2 = tpu.matmul %0, %1, %cst {dimension_numbers = #tpu.dot_dimension_numbers<[1], [0], [0], [1], [0, 0, 1, 1], [], []>} : vector<16x16xbf16>, vector<16x256xbf16>, vector<16x256xf32> -> vector<16x256xf32>
    %c0_3 = arith.constant 0 : index
    %c0_4 = arith.constant 0 : index
    %3 = vector.load %arg3[%c0_3, %c0_4] : memref<16x16xbf16, #tpu.memory_space<vmem>>, vector<16x16xbf16>
    %c0_5 = arith.constant 0 : index
    %c0_6 = arith.constant 0 : index
    %4 = vector.load %arg5[%c0_5, %c0_6] : memref<16x256xbf16, #tpu.memory_space<vmem>>, vector<16x256xbf16>
    %cst_7 = arith.constant dense<0.000000e+00> : vector<16x256xf32>
    %5 = tpu.matmul %3, %4, %cst_7 {dimension_numbers = #tpu.dot_dimension_numbers<[1], [0], [0], [1], [0, 0, 1, 1], [], []>} : vector<16x16xbf16>, vector<16x256xbf16>, vector<16x256xf32> -> vector<16x256xf32>
    %6 = arith.addf %2, %5 : vector<16x256xf32>
    %c0_8 = arith.constant 0 : index
    %c0_9 = arith.constant 0 : index
    %7 = vector.load %arg6[%c0_8, %c0_9] : memref<1x256xf32, #tpu.memory_space<vmem>>, vector<1x256xf32>
    %8 = vector.broadcast %7 : vector<1x256xf32> to vector<16x256xf32>
    %9 = arith.addf %6, %8 : vector<16x256xf32>
    %10 = arith.truncf %9 : vector<16x256xf32> to vector<16x256xbf16>
    %c0_10 = arith.constant 0 : index
    %c0_11 = arith.constant 0 : index
    %11 = vector.load %arg7[%c0_10, %c0_11] : memref<16x256xbf16, #tpu.memory_space<vmem>>, vector<16x256xbf16>
    tpu.vector_store %arg7[%c0_10, %c0_11], %10 {strides = array<i32>} : memref<16x256xbf16, #tpu.memory_space<vmem>>, vector<16x256xbf16>,
    return
  }
  func.func @transform_0(%arg0: i32, %arg1: i32) -> (i32, i32) {
    %c0_i32 = arith.constant 0 : i32
    %c0_i32_0 = arith.constant 0 : i32
    return %arg0, %c0_i32 : i32, i32
  }
  func.func @transform_1(%arg0: i32, %arg1: i32) -> (i32, i32) {
    %c0_i32 = arith.constant 0 : i32
    %c0_i32_0 = arith.constant 0 : i32
    return %arg0, %c0_i32 : i32, i32
  }
  func.func @transform_2(%arg0: i32, %arg1: i32) -> (i32, i32) {
    %c0_i32 = arith.constant 0 : i32
    %c0_i32_0 = arith.constant 0 : i32
    %c0_i32_1 = arith.constant 0 : i32
    return %c0_i32, %c0_i32_0 : i32, i32
  }
  func.func @transform_3(%arg0: i32, %arg1: i32) -> (i32, i32) {
    %c0_i32 = arith.constant 0 : i32
    %c0_i32_0 = arith.constant 0 : i32
    %c0_i32_1 = arith.constant 0 : i32
    return %c0_i32, %c0_i32_0 : i32, i32
  }
  func.func @transform_4(%arg0: i32, %arg1: i32) -> (i32, i32) {
    %c0_i32 = arith.constant 0 : i32
    %c0_i32_0 = arith.constant 0 : i32
    %c0_i32_1 = arith.constant 0 : i32
    return %c0_i32, %c0_i32_0 : i32, i32
  }
  func.func @transform_5(%arg0: i32, %arg1: i32) -> (i32, i32) {
    %c0_i32 = arith.constant 0 : i32
    return %arg0, %arg1 : i32, i32
  }
}

module attributes {stable_mosaic.version = 11 : i64} {
  func.func @_dense2_kernel(%arg0: i32, %arg1: i32, %arg2: memref<16x32xbf16, #tpu.memory_space<vmem>>, %arg3: memref<16x32xbf16, #tpu.memory_space<vmem>>, %arg4: memref<32x256xbf16, #tpu.memory_space<vmem>>, %arg5: memref<32x256xbf16, #tpu.memory_space<vmem>>, %arg6: memref<1x256xf32, #tpu.memory_space<vmem>>, %arg7: memref<16x256xbf16, #tpu.memory_space<vmem>>) attributes {dimension_semantics = [#tpu.dimension_semantics<parallel>, #tpu.dimension_semantics<parallel>], iteration_bounds = array<i64: 1, 1>, scalar_prefetch = 0 : i64, scratch_operands = 0 : i64, tpu.core_type = #tpu.core_type<tc>, window_params = [{transform_indices = @transform_0, window_bounds = array<i64: 16, 32>}, {transform_indices = @transform_1, window_bounds = array<i64: 16, 32>}, {pipeline_mode = #tpu.pipeline_mode<synchronous>, transform_indices = @transform_2, window_bounds = array<i64: 32, 256>}, {pipeline_mode = #tpu.pipeline_mode<synchronous>, transform_indices = @transform_3, window_bounds = array<i64: 32, 256>}, {pipeline_mode = #tpu.pipeline_mode<synchronous>, transform_indices = @transform_4, window_bounds = array<i64: 1, 256>}, {transform_indices = @transform_5, window_bounds = array<i64: 16, 256>}]} {
    %c0 = arith.constant 0 : index
    %c0_0 = arith.constant 0 : index
    %0 = vector.load %arg2[%c0, %c0_0] : memref<16x32xbf16, #tpu.memory_space<vmem>>, vector<16x32xbf16>
    %c0_1 = arith.constant 0 : index
    %c0_2 = arith.constant 0 : index
    %1 = vector.load %arg4[%c0_1, %c0_2] : memref<32x256xbf16, #tpu.memory_space<vmem>>, vector<32x256xbf16>
    %cst = arith.constant dense<0.000000e+00> : vector<16x256xf32>
    %2 = tpu.matmul %0, %1, %cst {dimension_numbers = #tpu.dot_dimension_numbers<[1], [0], [0], [1], [0, 0, 1, 1], [], []>} : vector<16x32xbf16>, vector<32x256xbf16>, vector<16x256xf32> -> vector<16x256xf32>
    %c0_3 = arith.constant 0 : index
    %c0_4 = arith.constant 0 : index
    %3 = vector.load %arg3[%c0_3, %c0_4] : memref<16x32xbf16, #tpu.memory_space<vmem>>, vector<16x32xbf16>
    %c0_5 = arith.constant 0 : index
    %c0_6 = arith.constant 0 : index
    %4 = vector.load %arg5[%c0_5, %c0_6] : memref<32x256xbf16, #tpu.memory_space<vmem>>, vector<32x256xbf16>
    %cst_7 = arith.constant dense<0.000000e+00> : vector<16x256xf32>
    %5 = tpu.matmul %3, %4, %cst_7 {dimension_numbers = #tpu.dot_dimension_numbers<[1], [0], [0], [1], [0, 0, 1, 1], [], []>} : vector<16x32xbf16>, vector<32x256xbf16>, vector<16x256xf32> -> vector<16x256xf32>
    %6 = arith.addf %2, %5 : vector<16x256xf32>
    %c0_8 = arith.constant 0 : index
    %c0_9 = arith.constant 0 : index
    %7 = vector.load %arg6[%c0_8, %c0_9] : memref<1x256xf32, #tpu.memory_space<vmem>>, vector<1x256xf32>
    %8 = vector.broadcast %7 : vector<1x256xf32> to vector<16x256xf32>
    %9 = arith.addf %6, %8 : vector<16x256xf32>
    %10 = arith.truncf %9 : vector<16x256xf32> to vector<16x256xbf16>
    %c0_10 = arith.constant 0 : index
    %c0_11 = arith.constant 0 : index
    %11 = vector.load %arg7[%c0_10, %c0_11] : memref<16x256xbf16, #tpu.memory_space<vmem>>, vector<16x256xbf16>
    tpu.vector_store %arg7[%c0_10, %c0_11], %10 {strides = array<i32>} : memref<16x256xbf16, #tpu.memory_space<vmem>>, vector<16x256xbf16>,
    return
  }
  func.func @transform_0(%arg0: i32, %arg1: i32) -> (i32, i32) {
    %c0_i32 = arith.constant 0 : i32
    %c0_i32_0 = arith.constant 0 : i32
    return %arg0, %c0_i32 : i32, i32
  }
  func.func @transform_1(%arg0: i32, %arg1: i32) -> (i32, i32) {
    %c0_i32 = arith.constant 0 : i32
    %c0_i32_0 = arith.constant 0 : i32
    return %arg0, %c0_i32 : i32, i32
  }
  func.func @transform_2(%arg0: i32, %arg1: i32) -> (i32, i32) {
    %c0_i32 = arith.constant 0 : i32
    %c0_i32_0 = arith.constant 0 : i32
    %c0_i32_1 = arith.constant 0 : i32
    return %c0_i32, %c0_i32_0 : i32, i32
  }
  func.func @transform_3(%arg0: i32, %arg1: i32) -> (i32, i32) {
    %c0_i32 = arith.constant 0 : i32
    %c0_i32_0 = arith.constant 0 : i32
    %c0_i32_1 = arith.constant 0 : i32
    return %c0_i32, %c0_i32_0 : i32, i32
  }
  func.func @transform_4(%arg0: i32, %arg1: i32) -> (i32, i32) {
    %c0_i32 = arith.constant 0 : i32
    %c0_i32_0 = arith.constant 0 : i32
    %c0_i32_1 = arith.constant 0 : i32
    return %c0_i32, %c0_i32_0 : i32, i32
  }
  func.func @transform_5(%arg0: i32, %arg1: i32) -> (i32, i32) {
    %c0_i32 = arith.constant 0 : i32
    return %arg0, %arg1 : i32, i32
  }
}

module attributes {stable_mosaic.version = 11 : i64} {
  func.func @_bilstm_rec_kernel(%arg0: i32, %arg1: memref<2x1xi32, #tpu.memory_space<vmem>>, %arg2: memref<8x2x128xbf16, #tpu.memory_space<vmem>>, %arg3: memref<8x2x128xbf16, #tpu.memory_space<vmem>>, %arg4: memref<32x128xbf16, #tpu.memory_space<vmem>>, %arg5: memref<32x128xbf16, #tpu.memory_space<vmem>>, %arg6: memref<8x2x32xbf16, #tpu.memory_space<vmem>>, %arg7: memref<8x2x32xbf16, #tpu.memory_space<vmem>>, %arg8: memref<2x32xf32, #tpu.memory_space<vmem>>, %arg9: memref<2x32xf32, #tpu.memory_space<vmem>>, %arg10: memref<2x32xf32, #tpu.memory_space<vmem>>, %arg11: memref<2x32xf32, #tpu.memory_space<vmem>>) attributes {dimension_semantics = [#tpu.dimension_semantics<arbitrary>], iteration_bounds = array<i64: 1>, scalar_prefetch = 0 : i64, scratch_operands = 4 : i64, tpu.core_type = #tpu.core_type<tc>, window_params = [{pipeline_mode = #tpu.pipeline_mode<synchronous>, transform_indices = @transform_0, window_bounds = array<i64: 2, 1>}, {transform_indices = @transform_1, window_bounds = array<i64: 8, 2, 128>}, {transform_indices = @transform_2, window_bounds = array<i64: 8, 2, 128>}, {pipeline_mode = #tpu.pipeline_mode<synchronous>, transform_indices = @transform_3, window_bounds = array<i64: 32, 128>}, {pipeline_mode = #tpu.pipeline_mode<synchronous>, transform_indices = @transform_4, window_bounds = array<i64: 32, 128>}, {transform_indices = @transform_5, window_bounds = array<i64: 8, 2, 32>}, {transform_indices = @transform_6, window_bounds = array<i64: 8, 2, 32>}]} {
    %c0_i32 = arith.constant 0 : i32
    %0 = arith.cmpi eq, %arg0, %c0_i32 : i32
    %1 = arith.extui %0 : i1 to i32
    %c0_i32_0 = arith.constant 0 : i32
    %2 = arith.cmpi ne, %1, %c0_i32_0 : i32
    scf.if %2 {
      %cst_323 = arith.constant 0.000000e+00 : f32
      %901 = vector.broadcast %cst_323 : f32 to vector<2x32xf32>
      %c0_324 = arith.constant 0 : index
      %c0_325 = arith.constant 0 : index
      %902 = vector.load %arg8[%c0_324, %c0_325] : memref<2x32xf32, #tpu.memory_space<vmem>>, vector<2x32xf32>
      tpu.vector_store %arg8[%c0_324, %c0_325], %901 {strides = array<i32>} : memref<2x32xf32, #tpu.memory_space<vmem>>, vector<2x32xf32>,
      %cst_326 = arith.constant 0.000000e+00 : f32
      %903 = vector.broadcast %cst_326 : f32 to vector<2x32xf32>
      %c0_327 = arith.constant 0 : index
      %c0_328 = arith.constant 0 : index
      %904 = vector.load %arg9[%c0_327, %c0_328] : memref<2x32xf32, #tpu.memory_space<vmem>>, vector<2x32xf32>
      tpu.vector_store %arg9[%c0_327, %c0_328], %903 {strides = array<i32>} : memref<2x32xf32, #tpu.memory_space<vmem>>, vector<2x32xf32>,
      %cst_329 = arith.constant 0.000000e+00 : f32
      %905 = vector.broadcast %cst_329 : f32 to vector<2x32xf32>
      %c0_330 = arith.constant 0 : index
      %c0_331 = arith.constant 0 : index
      %906 = vector.load %arg10[%c0_330, %c0_331] : memref<2x32xf32, #tpu.memory_space<vmem>>, vector<2x32xf32>
      tpu.vector_store %arg10[%c0_330, %c0_331], %905 {strides = array<i32>} : memref<2x32xf32, #tpu.memory_space<vmem>>, vector<2x32xf32>,
      %cst_332 = arith.constant 0.000000e+00 : f32
      %907 = vector.broadcast %cst_332 : f32 to vector<2x32xf32>
      %c0_333 = arith.constant 0 : index
      %c0_334 = arith.constant 0 : index
      %908 = vector.load %arg11[%c0_333, %c0_334] : memref<2x32xf32, #tpu.memory_space<vmem>>, vector<2x32xf32>
      tpu.vector_store %arg11[%c0_333, %c0_334], %907 {strides = array<i32>} : memref<2x32xf32, #tpu.memory_space<vmem>>, vector<2x32xf32>,
    } else {
    }
    %c0 = arith.constant 0 : index
    %c0_1 = arith.constant 0 : index
    %3 = vector.load %arg1[%c0, %c0_1] : memref<2x1xi32, #tpu.memory_space<vmem>>, vector<2x1xi32>
    %c8_i32 = arith.constant 8 : i32
    %4 = arith.muli %arg0, %c8_i32 : i32
    %c0_i32_2 = arith.constant 0 : i32
    %5 = arith.index_cast %c0_i32_2 : i32 to index
    %c0_3 = arith.constant 0 : index
    %c0_4 = arith.constant 0 : index
    %6 = vector.load %arg2[%5, %c0_3, %c0_4] : memref<8x2x128xbf16, #tpu.memory_space<vmem>>, vector<1x2x128xbf16>
    %7 = vector.shape_cast %6 : vector<1x2x128xbf16> to vector<2x128xbf16>
    %8 = arith.addi %4, %c0_i32_2 : i32
    %c0_5 = arith.constant 0 : index
    %c0_6 = arith.constant 0 : index
    %9 = vector.load %arg8[%c0_5, %c0_6] : memref<2x32xf32, #tpu.memory_space<vmem>>, vector<2x32xf32>
    %c0_7 = arith.constant 0 : index
    %c0_8 = arith.constant 0 : index
    %10 = vector.load %arg9[%c0_7, %c0_8] : memref<2x32xf32, #tpu.memory_space<vmem>>, vector<2x32xf32>
    %11 = arith.extf %7 : vector<2x128xbf16> to vector<2x128xf32>
    %12 = arith.truncf %9 : vector<2x32xf32> to vector<2x32xbf16>
    %c0_9 = arith.constant 0 : index
    %c0_10 = arith.constant 0 : index
    %13 = vector.load %arg4[%c0_9, %c0_10] : memref<32x128xbf16, #tpu.memory_space<vmem>>, vector<32x128xbf16>
    %cst = arith.constant dense<0.000000e+00> : vector<2x128xf32>
    %14 = tpu.matmul %12, %13, %cst {dimension_numbers = #tpu.dot_dimension_numbers<[1], [0], [0], [1], [0, 0, 1, 1], [], []>} : vector<2x32xbf16>, vector<32x128xbf16>, vector<2x128xf32> -> vector<2x128xf32>
    %15 = arith.addf %11, %14 : vector<2x128xf32>
    %16 = vector.extract_strided_slice %15 {offsets = [0, 0], sizes = [2, 32], strides = [1, 1]} : vector<2x128xf32> to vector<2x32xf32>
    %17 = arith.negf %16 : vector<2x32xf32>
    %18 = math.exp %17 : vector<2x32xf32>
    %cst_11 = arith.constant 1.000000e+00 : f32
    %19 = vector.broadcast %cst_11 : f32 to vector<2x32xf32>
    %20 = arith.addf %19, %18 : vector<2x32xf32>
    %21 = arith.divf %19, %20 : vector<2x32xf32>
    %22 = vector.extract_strided_slice %15 {offsets = [0, 32], sizes = [2, 32], strides = [1, 1]} : vector<2x128xf32> to vector<2x32xf32>
    %23 = arith.negf %22 : vector<2x32xf32>
    %24 = math.exp %23 : vector<2x32xf32>
    %cst_12 = arith.constant 1.000000e+00 : f32
    %25 = vector.broadcast %cst_12 : f32 to vector<2x32xf32>
    %26 = arith.addf %25, %24 : vector<2x32xf32>
    %27 = arith.divf %25, %26 : vector<2x32xf32>
    %28 = vector.extract_strided_slice %15 {offsets = [0, 64], sizes = [2, 32], strides = [1, 1]} : vector<2x128xf32> to vector<2x32xf32>
    %29 = math.tanh %28 : vector<2x32xf32>
    %30 = vector.extract_strided_slice %15 {offsets = [0, 96], sizes = [2, 32], strides = [1, 1]} : vector<2x128xf32> to vector<2x32xf32>
    %31 = arith.negf %30 : vector<2x32xf32>
    %32 = math.exp %31 : vector<2x32xf32>
    %cst_13 = arith.constant 1.000000e+00 : f32
    %33 = vector.broadcast %cst_13 : f32 to vector<2x32xf32>
    %34 = arith.addf %33, %32 : vector<2x32xf32>
    %35 = arith.divf %33, %34 : vector<2x32xf32>
    %36 = arith.mulf %27, %10 : vector<2x32xf32>
    %37 = arith.mulf %21, %29 : vector<2x32xf32>
    %38 = arith.addf %36, %37 : vector<2x32xf32>
    %39 = math.tanh %38 : vector<2x32xf32>
    %40 = arith.mulf %35, %39 : vector<2x32xf32>
    %41 = vector.broadcast %8 : i32 to vector<2x1xi32>
    %42 = arith.cmpi slt, %41, %3 : vector<2x1xi32>
    %43 = vector.shape_cast %42 : vector<2x1xi1> to vector<2x1xi1>
    %44 = vector.broadcast %43 : vector<2x1xi1> to vector<2x32xi1>
    %45 = arith.select %44, %40, %9 : vector<2x32xi1>, vector<2x32xf32>
    %c0_14 = arith.constant 0 : index
    %c0_15 = arith.constant 0 : index
    %46 = vector.load %arg8[%c0_14, %c0_15] : memref<2x32xf32, #tpu.memory_space<vmem>>, vector<2x32xf32>
    tpu.vector_store %arg8[%c0_14, %c0_15], %45 {strides = array<i32>} : memref<2x32xf32, #tpu.memory_space<vmem>>, vector<2x32xf32>,
    %47 = vector.shape_cast %42 : vector<2x1xi1> to vector<2x1xi1>
    %48 = vector.broadcast %47 : vector<2x1xi1> to vector<2x32xi1>
    %49 = arith.select %48, %38, %10 : vector<2x32xi1>, vector<2x32xf32>
    %c0_16 = arith.constant 0 : index
    %c0_17 = arith.constant 0 : index
    %50 = vector.load %arg9[%c0_16, %c0_17] : memref<2x32xf32, #tpu.memory_space<vmem>>, vector<2x32xf32>
    tpu.vector_store %arg9[%c0_16, %c0_17], %49 {strides = array<i32>} : memref<2x32xf32, #tpu.memory_space<vmem>>, vector<2x32xf32>,
    %cst_18 = arith.constant 0.000000e+00 : f32
    %51 = vector.broadcast %cst_18 : f32 to vector<2x32xf32>
    %52 = vector.shape_cast %42 : vector<2x1xi1> to vector<2x1xi1>
    %53 = vector.broadcast %52 : vector<2x1xi1> to vector<2x32xi1>
    %54 = arith.select %53, %40, %51 : vector<2x32xi1>, vector<2x32xf32>
    %55 = arith.truncf %54 : vector<2x32xf32> to vector<2x32xbf16>
    %56 = arith.index_cast %c0_i32_2 : i32 to index
    %c0_19 = arith.constant 0 : index
    %c0_20 = arith.constant 0 : index
    %57 = vector.load %arg6[%56, %c0_19, %c0_20] : memref<8x2x32xbf16, #tpu.memory_space<vmem>>, vector<1x2x32xbf16>
    %58 = vector.shape_cast %57 : vector<1x2x32xbf16> to vector<2x32xbf16>
    %59 = vector.shape_cast %55 : vector<2x32xbf16> to vector<1x2x32xbf16>
    tpu.vector_store %arg6[%56, %c0_19, %c0_20], %59 {strides = array<i32>} : memref<8x2x32xbf16, #tpu.memory_space<vmem>>, vector<1x2x32xbf16>,
    %c7_i32 = arith.constant 7 : i32
    %60 = arith.subi %c7_i32, %c0_i32_2 : i32
    %61 = arith.index_cast %60 : i32 to index
    %c0_21 = arith.constant 0 : index
    %c0_22 = arith.constant 0 : index
    %62 = vector.load %arg3[%61, %c0_21, %c0_22] : memref<8x2x128xbf16, #tpu.memory_space<vmem>>, vector<1x2x128xbf16>
    %63 = vector.shape_cast %62 : vector<1x2x128xbf16> to vector<2x128xbf16>
    %64 = arith.addi %4, %c0_i32_2 : i32
    %c7_i32_23 = arith.constant 7 : i32
    %65 = arith.subi %c7_i32_23, %64 : i32
    %c0_24 = arith.constant 0 : index
    %c0_25 = arith.constant 0 : index
    %66 = vector.load %arg10[%c0_24, %c0_25] : memref<2x32xf32, #tpu.memory_space<vmem>>, vector<2x32xf32>
    %c0_26 = arith.constant 0 : index
    %c0_27 = arith.constant 0 : index
    %67 = vector.load %arg11[%c0_26, %c0_27] : memref<2x32xf32, #tpu.memory_space<vmem>>, vector<2x32xf32>
    %68 = arith.extf %63 : vector<2x128xbf16> to vector<2x128xf32>
    %69 = arith.truncf %66 : vector<2x32xf32> to vector<2x32xbf16>
    %c0_28 = arith.constant 0 : index
    %c0_29 = arith.constant 0 : index
    %70 = vector.load %arg5[%c0_28, %c0_29] : memref<32x128xbf16, #tpu.memory_space<vmem>>, vector<32x128xbf16>
    %cst_30 = arith.constant dense<0.000000e+00> : vector<2x128xf32>
    %71 = tpu.matmul %69, %70, %cst_30 {dimension_numbers = #tpu.dot_dimension_numbers<[1], [0], [0], [1], [0, 0, 1, 1], [], []>} : vector<2x32xbf16>, vector<32x128xbf16>, vector<2x128xf32> -> vector<2x128xf32>
    %72 = arith.addf %68, %71 : vector<2x128xf32>
    %73 = vector.extract_strided_slice %72 {offsets = [0, 0], sizes = [2, 32], strides = [1, 1]} : vector<2x128xf32> to vector<2x32xf32>
    %74 = arith.negf %73 : vector<2x32xf32>
    %75 = math.exp %74 : vector<2x32xf32>
    %cst_31 = arith.constant 1.000000e+00 : f32
    %76 = vector.broadcast %cst_31 : f32 to vector<2x32xf32>
    %77 = arith.addf %76, %75 : vector<2x32xf32>
    %78 = arith.divf %76, %77 : vector<2x32xf32>
    %79 = vector.extract_strided_slice %72 {offsets = [0, 32], sizes = [2, 32], strides = [1, 1]} : vector<2x128xf32> to vector<2x32xf32>
    %80 = arith.negf %79 : vector<2x32xf32>
    %81 = math.exp %80 : vector<2x32xf32>
    %cst_32 = arith.constant 1.000000e+00 : f32
    %82 = vector.broadcast %cst_32 : f32 to vector<2x32xf32>
    %83 = arith.addf %82, %81 : vector<2x32xf32>
    %84 = arith.divf %82, %83 : vector<2x32xf32>
    %85 = vector.extract_strided_slice %72 {offsets = [0, 64], sizes = [2, 32], strides = [1, 1]} : vector<2x128xf32> to vector<2x32xf32>
    %86 = math.tanh %85 : vector<2x32xf32>
    %87 = vector.extract_strided_slice %72 {offsets = [0, 96], sizes = [2, 32], strides = [1, 1]} : vector<2x128xf32> to vector<2x32xf32>
    %88 = arith.negf %87 : vector<2x32xf32>
    %89 = math.exp %88 : vector<2x32xf32>
    %cst_33 = arith.constant 1.000000e+00 : f32
    %90 = vector.broadcast %cst_33 : f32 to vector<2x32xf32>
    %91 = arith.addf %90, %89 : vector<2x32xf32>
    %92 = arith.divf %90, %91 : vector<2x32xf32>
    %93 = arith.mulf %84, %67 : vector<2x32xf32>
    %94 = arith.mulf %78, %86 : vector<2x32xf32>
    %95 = arith.addf %93, %94 : vector<2x32xf32>
    %96 = math.tanh %95 : vector<2x32xf32>
    %97 = arith.mulf %92, %96 : vector<2x32xf32>
    %98 = vector.broadcast %65 : i32 to vector<2x1xi32>
    %99 = arith.cmpi slt, %98, %3 : vector<2x1xi32>
    %100 = vector.shape_cast %99 : vector<2x1xi1> to vector<2x1xi1>
    %101 = vector.broadcast %100 : vector<2x1xi1> to vector<2x32xi1>
    %102 = arith.select %101, %97, %66 : vector<2x32xi1>, vector<2x32xf32>
    %c0_34 = arith.constant 0 : index
    %c0_35 = arith.constant 0 : index
    %103 = vector.load %arg10[%c0_34, %c0_35] : memref<2x32xf32, #tpu.memory_space<vmem>>, vector<2x32xf32>
    tpu.vector_store %arg10[%c0_34, %c0_35], %102 {strides = array<i32>} : memref<2x32xf32, #tpu.memory_space<vmem>>, vector<2x32xf32>,
    %104 = vector.shape_cast %99 : vector<2x1xi1> to vector<2x1xi1>
    %105 = vector.broadcast %104 : vector<2x1xi1> to vector<2x32xi1>
    %106 = arith.select %105, %95, %67 : vector<2x32xi1>, vector<2x32xf32>
    %c0_36 = arith.constant 0 : index
    %c0_37 = arith.constant 0 : index
    %107 = vector.load %arg11[%c0_36, %c0_37] : memref<2x32xf32, #tpu.memory_space<vmem>>, vector<2x32xf32>
    tpu.vector_store %arg11[%c0_36, %c0_37], %106 {strides = array<i32>} : memref<2x32xf32, #tpu.memory_space<vmem>>, vector<2x32xf32>,
    %cst_38 = arith.constant 0.000000e+00 : f32
    %108 = vector.broadcast %cst_38 : f32 to vector<2x32xf32>
    %109 = vector.shape_cast %99 : vector<2x1xi1> to vector<2x1xi1>
    %110 = vector.broadcast %109 : vector<2x1xi1> to vector<2x32xi1>
    %111 = arith.select %110, %97, %108 : vector<2x32xi1>, vector<2x32xf32>
    %112 = arith.truncf %111 : vector<2x32xf32> to vector<2x32xbf16>
    %113 = arith.index_cast %60 : i32 to index
    %c0_39 = arith.constant 0 : index
    %c0_40 = arith.constant 0 : index
    %114 = vector.load %arg7[%113, %c0_39, %c0_40] : memref<8x2x32xbf16, #tpu.memory_space<vmem>>, vector<1x2x32xbf16>
    %115 = vector.shape_cast %114 : vector<1x2x32xbf16> to vector<2x32xbf16>
    %116 = vector.shape_cast %112 : vector<2x32xbf16> to vector<1x2x32xbf16>
    tpu.vector_store %arg7[%113, %c0_39, %c0_40], %116 {strides = array<i32>} : memref<8x2x32xbf16, #tpu.memory_space<vmem>>, vector<1x2x32xbf16>,
    %c1_i32 = arith.constant 1 : i32
    %117 = arith.index_cast %c1_i32 : i32 to index
    %c0_41 = arith.constant 0 : index
    %c0_42 = arith.constant 0 : index
    %118 = vector.load %arg2[%117, %c0_41, %c0_42] : memref<8x2x128xbf16, #tpu.memory_space<vmem>>, vector<1x2x128xbf16>
    %119 = vector.shape_cast %118 : vector<1x2x128xbf16> to vector<2x128xbf16>
    %120 = arith.addi %4, %c1_i32 : i32
    %c0_43 = arith.constant 0 : index
    %c0_44 = arith.constant 0 : index
    %121 = vector.load %arg8[%c0_43, %c0_44] : memref<2x32xf32, #tpu.memory_space<vmem>>, vector<2x32xf32>
    %c0_45 = arith.constant 0 : index
    %c0_46 = arith.constant 0 : index
    %122 = vector.load %arg9[%c0_45, %c0_46] : memref<2x32xf32, #tpu.memory_space<vmem>>, vector<2x32xf32>
    %123 = arith.extf %119 : vector<2x128xbf16> to vector<2x128xf32>
    %124 = arith.truncf %121 : vector<2x32xf32> to vector<2x32xbf16>
    %c0_47 = arith.constant 0 : index
    %c0_48 = arith.constant 0 : index
    %125 = vector.load %arg4[%c0_47, %c0_48] : memref<32x128xbf16, #tpu.memory_space<vmem>>, vector<32x128xbf16>
    %cst_49 = arith.constant dense<0.000000e+00> : vector<2x128xf32>
    %126 = tpu.matmul %124, %125, %cst_49 {dimension_numbers = #tpu.dot_dimension_numbers<[1], [0], [0], [1], [0, 0, 1, 1], [], []>} : vector<2x32xbf16>, vector<32x128xbf16>, vector<2x128xf32> -> vector<2x128xf32>
    %127 = arith.addf %123, %126 : vector<2x128xf32>
    %128 = vector.extract_strided_slice %127 {offsets = [0, 0], sizes = [2, 32], strides = [1, 1]} : vector<2x128xf32> to vector<2x32xf32>
    %129 = arith.negf %128 : vector<2x32xf32>
    %130 = math.exp %129 : vector<2x32xf32>
    %cst_50 = arith.constant 1.000000e+00 : f32
    %131 = vector.broadcast %cst_50 : f32 to vector<2x32xf32>
    %132 = arith.addf %131, %130 : vector<2x32xf32>
    %133 = arith.divf %131, %132 : vector<2x32xf32>
    %134 = vector.extract_strided_slice %127 {offsets = [0, 32], sizes = [2, 32], strides = [1, 1]} : vector<2x128xf32> to vector<2x32xf32>
    %135 = arith.negf %134 : vector<2x32xf32>
    %136 = math.exp %135 : vector<2x32xf32>
    %cst_51 = arith.constant 1.000000e+00 : f32
    %137 = vector.broadcast %cst_51 : f32 to vector<2x32xf32>
    %138 = arith.addf %137, %136 : vector<2x32xf32>
    %139 = arith.divf %137, %138 : vector<2x32xf32>
    %140 = vector.extract_strided_slice %127 {offsets = [0, 64], sizes = [2, 32], strides = [1, 1]} : vector<2x128xf32> to vector<2x32xf32>
    %141 = math.tanh %140 : vector<2x32xf32>
    %142 = vector.extract_strided_slice %127 {offsets = [0, 96], sizes = [2, 32], strides = [1, 1]} : vector<2x128xf32> to vector<2x32xf32>
    %143 = arith.negf %142 : vector<2x32xf32>
    %144 = math.exp %143 : vector<2x32xf32>
    %cst_52 = arith.constant 1.000000e+00 : f32
    %145 = vector.broadcast %cst_52 : f32 to vector<2x32xf32>
    %146 = arith.addf %145, %144 : vector<2x32xf32>
    %147 = arith.divf %145, %146 : vector<2x32xf32>
    %148 = arith.mulf %139, %122 : vector<2x32xf32>
    %149 = arith.mulf %133, %141 : vector<2x32xf32>
    %150 = arith.addf %148, %149 : vector<2x32xf32>
    %151 = math.tanh %150 : vector<2x32xf32>
    %152 = arith.mulf %147, %151 : vector<2x32xf32>
    %153 = vector.broadcast %120 : i32 to vector<2x1xi32>
    %154 = arith.cmpi slt, %153, %3 : vector<2x1xi32>
    %155 = vector.shape_cast %154 : vector<2x1xi1> to vector<2x1xi1>
    %156 = vector.broadcast %155 : vector<2x1xi1> to vector<2x32xi1>
    %157 = arith.select %156, %152, %121 : vector<2x32xi1>, vector<2x32xf32>
    %c0_53 = arith.constant 0 : index
    %c0_54 = arith.constant 0 : index
    %158 = vector.load %arg8[%c0_53, %c0_54] : memref<2x32xf32, #tpu.memory_space<vmem>>, vector<2x32xf32>
    tpu.vector_store %arg8[%c0_53, %c0_54], %157 {strides = array<i32>} : memref<2x32xf32, #tpu.memory_space<vmem>>, vector<2x32xf32>,
    %159 = vector.shape_cast %154 : vector<2x1xi1> to vector<2x1xi1>
    %160 = vector.broadcast %159 : vector<2x1xi1> to vector<2x32xi1>
    %161 = arith.select %160, %150, %122 : vector<2x32xi1>, vector<2x32xf32>
    %c0_55 = arith.constant 0 : index
    %c0_56 = arith.constant 0 : index
    %162 = vector.load %arg9[%c0_55, %c0_56] : memref<2x32xf32, #tpu.memory_space<vmem>>, vector<2x32xf32>
    tpu.vector_store %arg9[%c0_55, %c0_56], %161 {strides = array<i32>} : memref<2x32xf32, #tpu.memory_space<vmem>>, vector<2x32xf32>,
    %cst_57 = arith.constant 0.000000e+00 : f32
    %163 = vector.broadcast %cst_57 : f32 to vector<2x32xf32>
    %164 = vector.shape_cast %154 : vector<2x1xi1> to vector<2x1xi1>
    %165 = vector.broadcast %164 : vector<2x1xi1> to vector<2x32xi1>
    %166 = arith.select %165, %152, %163 : vector<2x32xi1>, vector<2x32xf32>
    %167 = arith.truncf %166 : vector<2x32xf32> to vector<2x32xbf16>
    %168 = arith.index_cast %c1_i32 : i32 to index
    %c0_58 = arith.constant 0 : index
    %c0_59 = arith.constant 0 : index
    %169 = vector.load %arg6[%168, %c0_58, %c0_59] : memref<8x2x32xbf16, #tpu.memory_space<vmem>>, vector<1x2x32xbf16>
    %170 = vector.shape_cast %169 : vector<1x2x32xbf16> to vector<2x32xbf16>
    %171 = vector.shape_cast %167 : vector<2x32xbf16> to vector<1x2x32xbf16>
    tpu.vector_store %arg6[%168, %c0_58, %c0_59], %171 {strides = array<i32>} : memref<8x2x32xbf16, #tpu.memory_space<vmem>>, vector<1x2x32xbf16>,
    %c7_i32_60 = arith.constant 7 : i32
    %172 = arith.subi %c7_i32_60, %c1_i32 : i32
    %173 = arith.index_cast %172 : i32 to index
    %c0_61 = arith.constant 0 : index
    %c0_62 = arith.constant 0 : index
    %174 = vector.load %arg3[%173, %c0_61, %c0_62] : memref<8x2x128xbf16, #tpu.memory_space<vmem>>, vector<1x2x128xbf16>
    %175 = vector.shape_cast %174 : vector<1x2x128xbf16> to vector<2x128xbf16>
    %176 = arith.addi %4, %c1_i32 : i32
    %c7_i32_63 = arith.constant 7 : i32
    %177 = arith.subi %c7_i32_63, %176 : i32
    %c0_64 = arith.constant 0 : index
    %c0_65 = arith.constant 0 : index
    %178 = vector.load %arg10[%c0_64, %c0_65] : memref<2x32xf32, #tpu.memory_space<vmem>>, vector<2x32xf32>
    %c0_66 = arith.constant 0 : index
    %c0_67 = arith.constant 0 : index
    %179 = vector.load %arg11[%c0_66, %c0_67] : memref<2x32xf32, #tpu.memory_space<vmem>>, vector<2x32xf32>
    %180 = arith.extf %175 : vector<2x128xbf16> to vector<2x128xf32>
    %181 = arith.truncf %178 : vector<2x32xf32> to vector<2x32xbf16>
    %c0_68 = arith.constant 0 : index
    %c0_69 = arith.constant 0 : index
    %182 = vector.load %arg5[%c0_68, %c0_69] : memref<32x128xbf16, #tpu.memory_space<vmem>>, vector<32x128xbf16>
    %cst_70 = arith.constant dense<0.000000e+00> : vector<2x128xf32>
    %183 = tpu.matmul %181, %182, %cst_70 {dimension_numbers = #tpu.dot_dimension_numbers<[1], [0], [0], [1], [0, 0, 1, 1], [], []>} : vector<2x32xbf16>, vector<32x128xbf16>, vector<2x128xf32> -> vector<2x128xf32>
    %184 = arith.addf %180, %183 : vector<2x128xf32>
    %185 = vector.extract_strided_slice %184 {offsets = [0, 0], sizes = [2, 32], strides = [1, 1]} : vector<2x128xf32> to vector<2x32xf32>
    %186 = arith.negf %185 : vector<2x32xf32>
    %187 = math.exp %186 : vector<2x32xf32>
    %cst_71 = arith.constant 1.000000e+00 : f32
    %188 = vector.broadcast %cst_71 : f32 to vector<2x32xf32>
    %189 = arith.addf %188, %187 : vector<2x32xf32>
    %190 = arith.divf %188, %189 : vector<2x32xf32>
    %191 = vector.extract_strided_slice %184 {offsets = [0, 32], sizes = [2, 32], strides = [1, 1]} : vector<2x128xf32> to vector<2x32xf32>
    %192 = arith.negf %191 : vector<2x32xf32>
    %193 = math.exp %192 : vector<2x32xf32>
    %cst_72 = arith.constant 1.000000e+00 : f32
    %194 = vector.broadcast %cst_72 : f32 to vector<2x32xf32>
    %195 = arith.addf %194, %193 : vector<2x32xf32>
    %196 = arith.divf %194, %195 : vector<2x32xf32>
    %197 = vector.extract_strided_slice %184 {offsets = [0, 64], sizes = [2, 32], strides = [1, 1]} : vector<2x128xf32> to vector<2x32xf32>
    %198 = math.tanh %197 : vector<2x32xf32>
    %199 = vector.extract_strided_slice %184 {offsets = [0, 96], sizes = [2, 32], strides = [1, 1]} : vector<2x128xf32> to vector<2x32xf32>
    %200 = arith.negf %199 : vector<2x32xf32>
    %201 = math.exp %200 : vector<2x32xf32>
    %cst_73 = arith.constant 1.000000e+00 : f32
    %202 = vector.broadcast %cst_73 : f32 to vector<2x32xf32>
    %203 = arith.addf %202, %201 : vector<2x32xf32>
    %204 = arith.divf %202, %203 : vector<2x32xf32>
    %205 = arith.mulf %196, %179 : vector<2x32xf32>
    %206 = arith.mulf %190, %198 : vector<2x32xf32>
    %207 = arith.addf %205, %206 : vector<2x32xf32>
    %208 = math.tanh %207 : vector<2x32xf32>
    %209 = arith.mulf %204, %208 : vector<2x32xf32>
    %210 = vector.broadcast %177 : i32 to vector<2x1xi32>
    %211 = arith.cmpi slt, %210, %3 : vector<2x1xi32>
    %212 = vector.shape_cast %211 : vector<2x1xi1> to vector<2x1xi1>
    %213 = vector.broadcast %212 : vector<2x1xi1> to vector<2x32xi1>
    %214 = arith.select %213, %209, %178 : vector<2x32xi1>, vector<2x32xf32>
    %c0_74 = arith.constant 0 : index
    %c0_75 = arith.constant 0 : index
    %215 = vector.load %arg10[%c0_74, %c0_75] : memref<2x32xf32, #tpu.memory_space<vmem>>, vector<2x32xf32>
    tpu.vector_store %arg10[%c0_74, %c0_75], %214 {strides = array<i32>} : memref<2x32xf32, #tpu.memory_space<vmem>>, vector<2x32xf32>,
    %216 = vector.shape_cast %211 : vector<2x1xi1> to vector<2x1xi1>
    %217 = vector.broadcast %216 : vector<2x1xi1> to vector<2x32xi1>
    %218 = arith.select %217, %207, %179 : vector<2x32xi1>, vector<2x32xf32>
    %c0_76 = arith.constant 0 : index
    %c0_77 = arith.constant 0 : index
    %219 = vector.load %arg11[%c0_76, %c0_77] : memref<2x32xf32, #tpu.memory_space<vmem>>, vector<2x32xf32>
    tpu.vector_store %arg11[%c0_76, %c0_77], %218 {strides = array<i32>} : memref<2x32xf32, #tpu.memory_space<vmem>>, vector<2x32xf32>,
    %cst_78 = arith.constant 0.000000e+00 : f32
    %220 = vector.broadcast %cst_78 : f32 to vector<2x32xf32>
    %221 = vector.shape_cast %211 : vector<2x1xi1> to vector<2x1xi1>
    %222 = vector.broadcast %221 : vector<2x1xi1> to vector<2x32xi1>
    %223 = arith.select %222, %209, %220 : vector<2x32xi1>, vector<2x32xf32>
    %224 = arith.truncf %223 : vector<2x32xf32> to vector<2x32xbf16>
    %225 = arith.index_cast %172 : i32 to index
    %c0_79 = arith.constant 0 : index
    %c0_80 = arith.constant 0 : index
    %226 = vector.load %arg7[%225, %c0_79, %c0_80] : memref<8x2x32xbf16, #tpu.memory_space<vmem>>, vector<1x2x32xbf16>
    %227 = vector.shape_cast %226 : vector<1x2x32xbf16> to vector<2x32xbf16>
    %228 = vector.shape_cast %224 : vector<2x32xbf16> to vector<1x2x32xbf16>
    tpu.vector_store %arg7[%225, %c0_79, %c0_80], %228 {strides = array<i32>} : memref<8x2x32xbf16, #tpu.memory_space<vmem>>, vector<1x2x32xbf16>,
    %c2_i32 = arith.constant 2 : i32
    %229 = arith.index_cast %c2_i32 : i32 to index
    %c0_81 = arith.constant 0 : index
    %c0_82 = arith.constant 0 : index
    %230 = vector.load %arg2[%229, %c0_81, %c0_82] : memref<8x2x128xbf16, #tpu.memory_space<vmem>>, vector<1x2x128xbf16>
    %231 = vector.shape_cast %230 : vector<1x2x128xbf16> to vector<2x128xbf16>
    %232 = arith.addi %4, %c2_i32 : i32
    %c0_83 = arith.constant 0 : index
    %c0_84 = arith.constant 0 : index
    %233 = vector.load %arg8[%c0_83, %c0_84] : memref<2x32xf32, #tpu.memory_space<vmem>>, vector<2x32xf32>
    %c0_85 = arith.constant 0 : index
    %c0_86 = arith.constant 0 : index
    %234 = vector.load %arg9[%c0_85, %c0_86] : memref<2x32xf32, #tpu.memory_space<vmem>>, vector<2x32xf32>
    %235 = arith.extf %231 : vector<2x128xbf16> to vector<2x128xf32>
    %236 = arith.truncf %233 : vector<2x32xf32> to vector<2x32xbf16>
    %c0_87 = arith.constant 0 : index
    %c0_88 = arith.constant 0 : index
    %237 = vector.load %arg4[%c0_87, %c0_88] : memref<32x128xbf16, #tpu.memory_space<vmem>>, vector<32x128xbf16>
    %cst_89 = arith.constant dense<0.000000e+00> : vector<2x128xf32>
    %238 = tpu.matmul %236, %237, %cst_89 {dimension_numbers = #tpu.dot_dimension_numbers<[1], [0], [0], [1], [0, 0, 1, 1], [], []>} : vector<2x32xbf16>, vector<32x128xbf16>, vector<2x128xf32> -> vector<2x128xf32>
    %239 = arith.addf %235, %238 : vector<2x128xf32>
    %240 = vector.extract_strided_slice %239 {offsets = [0, 0], sizes = [2, 32], strides = [1, 1]} : vector<2x128xf32> to vector<2x32xf32>
    %241 = arith.negf %240 : vector<2x32xf32>
    %242 = math.exp %241 : vector<2x32xf32>
    %cst_90 = arith.constant 1.000000e+00 : f32
    %243 = vector.broadcast %cst_90 : f32 to vector<2x32xf32>
    %244 = arith.addf %243, %242 : vector<2x32xf32>
    %245 = arith.divf %243, %244 : vector<2x32xf32>
    %246 = vector.extract_strided_slice %239 {offsets = [0, 32], sizes = [2, 32], strides = [1, 1]} : vector<2x128xf32> to vector<2x32xf32>
    %247 = arith.negf %246 : vector<2x32xf32>
    %248 = math.exp %247 : vector<2x32xf32>
    %cst_91 = arith.constant 1.000000e+00 : f32
    %249 = vector.broadcast %cst_91 : f32 to vector<2x32xf32>
    %250 = arith.addf %249, %248 : vector<2x32xf32>
    %251 = arith.divf %249, %250 : vector<2x32xf32>
    %252 = vector.extract_strided_slice %239 {offsets = [0, 64], sizes = [2, 32], strides = [1, 1]} : vector<2x128xf32> to vector<2x32xf32>
    %253 = math.tanh %252 : vector<2x32xf32>
    %254 = vector.extract_strided_slice %239 {offsets = [0, 96], sizes = [2, 32], strides = [1, 1]} : vector<2x128xf32> to vector<2x32xf32>
    %255 = arith.negf %254 : vector<2x32xf32>
    %256 = math.exp %255 : vector<2x32xf32>
    %cst_92 = arith.constant 1.000000e+00 : f32
    %257 = vector.broadcast %cst_92 : f32 to vector<2x32xf32>
    %258 = arith.addf %257, %256 : vector<2x32xf32>
    %259 = arith.divf %257, %258 : vector<2x32xf32>
    %260 = arith.mulf %251, %234 : vector<2x32xf32>
    %261 = arith.mulf %245, %253 : vector<2x32xf32>
    %262 = arith.addf %260, %261 : vector<2x32xf32>
    %263 = math.tanh %262 : vector<2x32xf32>
    %264 = arith.mulf %259, %263 : vector<2x32xf32>
    %265 = vector.broadcast %232 : i32 to vector<2x1xi32>
    %266 = arith.cmpi slt, %265, %3 : vector<2x1xi32>
    %267 = vector.shape_cast %266 : vector<2x1xi1> to vector<2x1xi1>
    %268 = vector.broadcast %267 : vector<2x1xi1> to vector<2x32xi1>
    %269 = arith.select %268, %264, %233 : vector<2x32xi1>, vector<2x32xf32>
    %c0_93 = arith.constant 0 : index
    %c0_94 = arith.constant 0 : index
    %270 = vector.load %arg8[%c0_93, %c0_94] : memref<2x32xf32, #tpu.memory_space<vmem>>, vector<2x32xf32>
    tpu.vector_store %arg8[%c0_93, %c0_94], %269 {strides = array<i32>} : memref<2x32xf32, #tpu.memory_space<vmem>>, vector<2x32xf32>,
    %271 = vector.shape_cast %266 : vector<2x1xi1> to vector<2x1xi1>
    %272 = vector.broadcast %271 : vector<2x1xi1> to vector<2x32xi1>
    %273 = arith.select %272, %262, %234 : vector<2x32xi1>, vector<2x32xf32>
    %c0_95 = arith.constant 0 : index
    %c0_96 = arith.constant 0 : index
    %274 = vector.load %arg9[%c0_95, %c0_96] : memref<2x32xf32, #tpu.memory_space<vmem>>, vector<2x32xf32>
    tpu.vector_store %arg9[%c0_95, %c0_96], %273 {strides = array<i32>} : memref<2x32xf32, #tpu.memory_space<vmem>>, vector<2x32xf32>,
    %cst_97 = arith.constant 0.000000e+00 : f32
    %275 = vector.broadcast %cst_97 : f32 to vector<2x32xf32>
    %276 = vector.shape_cast %266 : vector<2x1xi1> to vector<2x1xi1>
    %277 = vector.broadcast %276 : vector<2x1xi1> to vector<2x32xi1>
    %278 = arith.select %277, %264, %275 : vector<2x32xi1>, vector<2x32xf32>
    %279 = arith.truncf %278 : vector<2x32xf32> to vector<2x32xbf16>
    %280 = arith.index_cast %c2_i32 : i32 to index
    %c0_98 = arith.constant 0 : index
    %c0_99 = arith.constant 0 : index
    %281 = vector.load %arg6[%280, %c0_98, %c0_99] : memref<8x2x32xbf16, #tpu.memory_space<vmem>>, vector<1x2x32xbf16>
    %282 = vector.shape_cast %281 : vector<1x2x32xbf16> to vector<2x32xbf16>
    %283 = vector.shape_cast %279 : vector<2x32xbf16> to vector<1x2x32xbf16>
    tpu.vector_store %arg6[%280, %c0_98, %c0_99], %283 {strides = array<i32>} : memref<8x2x32xbf16, #tpu.memory_space<vmem>>, vector<1x2x32xbf16>,
    %c7_i32_100 = arith.constant 7 : i32
    %284 = arith.subi %c7_i32_100, %c2_i32 : i32
    %285 = arith.index_cast %284 : i32 to index
    %c0_101 = arith.constant 0 : index
    %c0_102 = arith.constant 0 : index
    %286 = vector.load %arg3[%285, %c0_101, %c0_102] : memref<8x2x128xbf16, #tpu.memory_space<vmem>>, vector<1x2x128xbf16>
    %287 = vector.shape_cast %286 : vector<1x2x128xbf16> to vector<2x128xbf16>
    %288 = arith.addi %4, %c2_i32 : i32
    %c7_i32_103 = arith.constant 7 : i32
    %289 = arith.subi %c7_i32_103, %288 : i32
    %c0_104 = arith.constant 0 : index
    %c0_105 = arith.constant 0 : index
    %290 = vector.load %arg10[%c0_104, %c0_105] : memref<2x32xf32, #tpu.memory_space<vmem>>, vector<2x32xf32>
    %c0_106 = arith.constant 0 : index
    %c0_107 = arith.constant 0 : index
    %291 = vector.load %arg11[%c0_106, %c0_107] : memref<2x32xf32, #tpu.memory_space<vmem>>, vector<2x32xf32>
    %292 = arith.extf %287 : vector<2x128xbf16> to vector<2x128xf32>
    %293 = arith.truncf %290 : vector<2x32xf32> to vector<2x32xbf16>
    %c0_108 = arith.constant 0 : index
    %c0_109 = arith.constant 0 : index
    %294 = vector.load %arg5[%c0_108, %c0_109] : memref<32x128xbf16, #tpu.memory_space<vmem>>, vector<32x128xbf16>
    %cst_110 = arith.constant dense<0.000000e+00> : vector<2x128xf32>
    %295 = tpu.matmul %293, %294, %cst_110 {dimension_numbers = #tpu.dot_dimension_numbers<[1], [0], [0], [1], [0, 0, 1, 1], [], []>} : vector<2x32xbf16>, vector<32x128xbf16>, vector<2x128xf32> -> vector<2x128xf32>
    %296 = arith.addf %292, %295 : vector<2x128xf32>
    %297 = vector.extract_strided_slice %296 {offsets = [0, 0], sizes = [2, 32], strides = [1, 1]} : vector<2x128xf32> to vector<2x32xf32>
    %298 = arith.negf %297 : vector<2x32xf32>
    %299 = math.exp %298 : vector<2x32xf32>
    %cst_111 = arith.constant 1.000000e+00 : f32
    %300 = vector.broadcast %cst_111 : f32 to vector<2x32xf32>
    %301 = arith.addf %300, %299 : vector<2x32xf32>
    %302 = arith.divf %300, %301 : vector<2x32xf32>
    %303 = vector.extract_strided_slice %296 {offsets = [0, 32], sizes = [2, 32], strides = [1, 1]} : vector<2x128xf32> to vector<2x32xf32>
    %304 = arith.negf %303 : vector<2x32xf32>
    %305 = math.exp %304 : vector<2x32xf32>
    %cst_112 = arith.constant 1.000000e+00 : f32
    %306 = vector.broadcast %cst_112 : f32 to vector<2x32xf32>
    %307 = arith.addf %306, %305 : vector<2x32xf32>
    %308 = arith.divf %306, %307 : vector<2x32xf32>
    %309 = vector.extract_strided_slice %296 {offsets = [0, 64], sizes = [2, 32], strides = [1, 1]} : vector<2x128xf32> to vector<2x32xf32>
    %310 = math.tanh %309 : vector<2x32xf32>
    %311 = vector.extract_strided_slice %296 {offsets = [0, 96], sizes = [2, 32], strides = [1, 1]} : vector<2x128xf32> to vector<2x32xf32>
    %312 = arith.negf %311 : vector<2x32xf32>
    %313 = math.exp %312 : vector<2x32xf32>
    %cst_113 = arith.constant 1.000000e+00 : f32
    %314 = vector.broadcast %cst_113 : f32 to vector<2x32xf32>
    %315 = arith.addf %314, %313 : vector<2x32xf32>
    %316 = arith.divf %314, %315 : vector<2x32xf32>
    %317 = arith.mulf %308, %291 : vector<2x32xf32>
    %318 = arith.mulf %302, %310 : vector<2x32xf32>
    %319 = arith.addf %317, %318 : vector<2x32xf32>
    %320 = math.tanh %319 : vector<2x32xf32>
    %321 = arith.mulf %316, %320 : vector<2x32xf32>
    %322 = vector.broadcast %289 : i32 to vector<2x1xi32>
    %323 = arith.cmpi slt, %322, %3 : vector<2x1xi32>
    %324 = vector.shape_cast %323 : vector<2x1xi1> to vector<2x1xi1>
    %325 = vector.broadcast %324 : vector<2x1xi1> to vector<2x32xi1>
    %326 = arith.select %325, %321, %290 : vector<2x32xi1>, vector<2x32xf32>
    %c0_114 = arith.constant 0 : index
    %c0_115 = arith.constant 0 : index
    %327 = vector.load %arg10[%c0_114, %c0_115] : memref<2x32xf32, #tpu.memory_space<vmem>>, vector<2x32xf32>
    tpu.vector_store %arg10[%c0_114, %c0_115], %326 {strides = array<i32>} : memref<2x32xf32, #tpu.memory_space<vmem>>, vector<2x32xf32>,
    %328 = vector.shape_cast %323 : vector<2x1xi1> to vector<2x1xi1>
    %329 = vector.broadcast %328 : vector<2x1xi1> to vector<2x32xi1>
    %330 = arith.select %329, %319, %291 : vector<2x32xi1>, vector<2x32xf32>
    %c0_116 = arith.constant 0 : index
    %c0_117 = arith.constant 0 : index
    %331 = vector.load %arg11[%c0_116, %c0_117] : memref<2x32xf32, #tpu.memory_space<vmem>>, vector<2x32xf32>
    tpu.vector_store %arg11[%c0_116, %c0_117], %330 {strides = array<i32>} : memref<2x32xf32, #tpu.memory_space<vmem>>, vector<2x32xf32>,
    %cst_118 = arith.constant 0.000000e+00 : f32
    %332 = vector.broadcast %cst_118 : f32 to vector<2x32xf32>
    %333 = vector.shape_cast %323 : vector<2x1xi1> to vector<2x1xi1>
    %334 = vector.broadcast %333 : vector<2x1xi1> to vector<2x32xi1>
    %335 = arith.select %334, %321, %332 : vector<2x32xi1>, vector<2x32xf32>
    %336 = arith.truncf %335 : vector<2x32xf32> to vector<2x32xbf16>
    %337 = arith.index_cast %284 : i32 to index
    %c0_119 = arith.constant 0 : index
    %c0_120 = arith.constant 0 : index
    %338 = vector.load %arg7[%337, %c0_119, %c0_120] : memref<8x2x32xbf16, #tpu.memory_space<vmem>>, vector<1x2x32xbf16>
    %339 = vector.shape_cast %338 : vector<1x2x32xbf16> to vector<2x32xbf16>
    %340 = vector.shape_cast %336 : vector<2x32xbf16> to vector<1x2x32xbf16>
    tpu.vector_store %arg7[%337, %c0_119, %c0_120], %340 {strides = array<i32>} : memref<8x2x32xbf16, #tpu.memory_space<vmem>>, vector<1x2x32xbf16>,
    %c3_i32 = arith.constant 3 : i32
    %341 = arith.index_cast %c3_i32 : i32 to index
    %c0_121 = arith.constant 0 : index
    %c0_122 = arith.constant 0 : index
    %342 = vector.load %arg2[%341, %c0_121, %c0_122] : memref<8x2x128xbf16, #tpu.memory_space<vmem>>, vector<1x2x128xbf16>
    %343 = vector.shape_cast %342 : vector<1x2x128xbf16> to vector<2x128xbf16>
    %344 = arith.addi %4, %c3_i32 : i32
    %c0_123 = arith.constant 0 : index
    %c0_124 = arith.constant 0 : index
    %345 = vector.load %arg8[%c0_123, %c0_124] : memref<2x32xf32, #tpu.memory_space<vmem>>, vector<2x32xf32>
    %c0_125 = arith.constant 0 : index
    %c0_126 = arith.constant 0 : index
    %346 = vector.load %arg9[%c0_125, %c0_126] : memref<2x32xf32, #tpu.memory_space<vmem>>, vector<2x32xf32>
    %347 = arith.extf %343 : vector<2x128xbf16> to vector<2x128xf32>
    %348 = arith.truncf %345 : vector<2x32xf32> to vector<2x32xbf16>
    %c0_127 = arith.constant 0 : index
    %c0_128 = arith.constant 0 : index
    %349 = vector.load %arg4[%c0_127, %c0_128] : memref<32x128xbf16, #tpu.memory_space<vmem>>, vector<32x128xbf16>
    %cst_129 = arith.constant dense<0.000000e+00> : vector<2x128xf32>
    %350 = tpu.matmul %348, %349, %cst_129 {dimension_numbers = #tpu.dot_dimension_numbers<[1], [0], [0], [1], [0, 0, 1, 1], [], []>} : vector<2x32xbf16>, vector<32x128xbf16>, vector<2x128xf32> -> vector<2x128xf32>
    %351 = arith.addf %347, %350 : vector<2x128xf32>
    %352 = vector.extract_strided_slice %351 {offsets = [0, 0], sizes = [2, 32], strides = [1, 1]} : vector<2x128xf32> to vector<2x32xf32>
    %353 = arith.negf %352 : vector<2x32xf32>
    %354 = math.exp %353 : vector<2x32xf32>
    %cst_130 = arith.constant 1.000000e+00 : f32
    %355 = vector.broadcast %cst_130 : f32 to vector<2x32xf32>
    %356 = arith.addf %355, %354 : vector<2x32xf32>
    %357 = arith.divf %355, %356 : vector<2x32xf32>
    %358 = vector.extract_strided_slice %351 {offsets = [0, 32], sizes = [2, 32], strides = [1, 1]} : vector<2x128xf32> to vector<2x32xf32>
    %359 = arith.negf %358 : vector<2x32xf32>
    %360 = math.exp %359 : vector<2x32xf32>
    %cst_131 = arith.constant 1.000000e+00 : f32
    %361 = vector.broadcast %cst_131 : f32 to vector<2x32xf32>
    %362 = arith.addf %361, %360 : vector<2x32xf32>
    %363 = arith.divf %361, %362 : vector<2x32xf32>
    %364 = vector.extract_strided_slice %351 {offsets = [0, 64], sizes = [2, 32], strides = [1, 1]} : vector<2x128xf32> to vector<2x32xf32>
    %365 = math.tanh %364 : vector<2x32xf32>
    %366 = vector.extract_strided_slice %351 {offsets = [0, 96], sizes = [2, 32], strides = [1, 1]} : vector<2x128xf32> to vector<2x32xf32>
    %367 = arith.negf %366 : vector<2x32xf32>
    %368 = math.exp %367 : vector<2x32xf32>
    %cst_132 = arith.constant 1.000000e+00 : f32
    %369 = vector.broadcast %cst_132 : f32 to vector<2x32xf32>
    %370 = arith.addf %369, %368 : vector<2x32xf32>
    %371 = arith.divf %369, %370 : vector<2x32xf32>
    %372 = arith.mulf %363, %346 : vector<2x32xf32>
    %373 = arith.mulf %357, %365 : vector<2x32xf32>
    %374 = arith.addf %372, %373 : vector<2x32xf32>
    %375 = math.tanh %374 : vector<2x32xf32>
    %376 = arith.mulf %371, %375 : vector<2x32xf32>
    %377 = vector.broadcast %344 : i32 to vector<2x1xi32>
    %378 = arith.cmpi slt, %377, %3 : vector<2x1xi32>
    %379 = vector.shape_cast %378 : vector<2x1xi1> to vector<2x1xi1>
    %380 = vector.broadcast %379 : vector<2x1xi1> to vector<2x32xi1>
    %381 = arith.select %380, %376, %345 : vector<2x32xi1>, vector<2x32xf32>
    %c0_133 = arith.constant 0 : index
    %c0_134 = arith.constant 0 : index
    %382 = vector.load %arg8[%c0_133, %c0_134] : memref<2x32xf32, #tpu.memory_space<vmem>>, vector<2x32xf32>
    tpu.vector_store %arg8[%c0_133, %c0_134], %381 {strides = array<i32>} : memref<2x32xf32, #tpu.memory_space<vmem>>, vector<2x32xf32>,
    %383 = vector.shape_cast %378 : vector<2x1xi1> to vector<2x1xi1>
    %384 = vector.broadcast %383 : vector<2x1xi1> to vector<2x32xi1>
    %385 = arith.select %384, %374, %346 : vector<2x32xi1>, vector<2x32xf32>
    %c0_135 = arith.constant 0 : index
    %c0_136 = arith.constant 0 : index
    %386 = vector.load %arg9[%c0_135, %c0_136] : memref<2x32xf32, #tpu.memory_space<vmem>>, vector<2x32xf32>
    tpu.vector_store %arg9[%c0_135, %c0_136], %385 {strides = array<i32>} : memref<2x32xf32, #tpu.memory_space<vmem>>, vector<2x32xf32>,
    %cst_137 = arith.constant 0.000000e+00 : f32
    %387 = vector.broadcast %cst_137 : f32 to vector<2x32xf32>
    %388 = vector.shape_cast %378 : vector<2x1xi1> to vector<2x1xi1>
    %389 = vector.broadcast %388 : vector<2x1xi1> to vector<2x32xi1>
    %390 = arith.select %389, %376, %387 : vector<2x32xi1>, vector<2x32xf32>
    %391 = arith.truncf %390 : vector<2x32xf32> to vector<2x32xbf16>
    %392 = arith.index_cast %c3_i32 : i32 to index
    %c0_138 = arith.constant 0 : index
    %c0_139 = arith.constant 0 : index
    %393 = vector.load %arg6[%392, %c0_138, %c0_139] : memref<8x2x32xbf16, #tpu.memory_space<vmem>>, vector<1x2x32xbf16>
    %394 = vector.shape_cast %393 : vector<1x2x32xbf16> to vector<2x32xbf16>
    %395 = vector.shape_cast %391 : vector<2x32xbf16> to vector<1x2x32xbf16>
    tpu.vector_store %arg6[%392, %c0_138, %c0_139], %395 {strides = array<i32>} : memref<8x2x32xbf16, #tpu.memory_space<vmem>>, vector<1x2x32xbf16>,
    %c7_i32_140 = arith.constant 7 : i32
    %396 = arith.subi %c7_i32_140, %c3_i32 : i32
    %397 = arith.index_cast %396 : i32 to index
    %c0_141 = arith.constant 0 : index
    %c0_142 = arith.constant 0 : index
    %398 = vector.load %arg3[%397, %c0_141, %c0_142] : memref<8x2x128xbf16, #tpu.memory_space<vmem>>, vector<1x2x128xbf16>
    %399 = vector.shape_cast %398 : vector<1x2x128xbf16> to vector<2x128xbf16>
    %400 = arith.addi %4, %c3_i32 : i32
    %c7_i32_143 = arith.constant 7 : i32
    %401 = arith.subi %c7_i32_143, %400 : i32
    %c0_144 = arith.constant 0 : index
    %c0_145 = arith.constant 0 : index
    %402 = vector.load %arg10[%c0_144, %c0_145] : memref<2x32xf32, #tpu.memory_space<vmem>>, vector<2x32xf32>
    %c0_146 = arith.constant 0 : index
    %c0_147 = arith.constant 0 : index
    %403 = vector.load %arg11[%c0_146, %c0_147] : memref<2x32xf32, #tpu.memory_space<vmem>>, vector<2x32xf32>
    %404 = arith.extf %399 : vector<2x128xbf16> to vector<2x128xf32>
    %405 = arith.truncf %402 : vector<2x32xf32> to vector<2x32xbf16>
    %c0_148 = arith.constant 0 : index
    %c0_149 = arith.constant 0 : index
    %406 = vector.load %arg5[%c0_148, %c0_149] : memref<32x128xbf16, #tpu.memory_space<vmem>>, vector<32x128xbf16>
    %cst_150 = arith.constant dense<0.000000e+00> : vector<2x128xf32>
    %407 = tpu.matmul %405, %406, %cst_150 {dimension_numbers = #tpu.dot_dimension_numbers<[1], [0], [0], [1], [0, 0, 1, 1], [], []>} : vector<2x32xbf16>, vector<32x128xbf16>, vector<2x128xf32> -> vector<2x128xf32>
    %408 = arith.addf %404, %407 : vector<2x128xf32>
    %409 = vector.extract_strided_slice %408 {offsets = [0, 0], sizes = [2, 32], strides = [1, 1]} : vector<2x128xf32> to vector<2x32xf32>
    %410 = arith.negf %409 : vector<2x32xf32>
    %411 = math.exp %410 : vector<2x32xf32>
    %cst_151 = arith.constant 1.000000e+00 : f32
    %412 = vector.broadcast %cst_151 : f32 to vector<2x32xf32>
    %413 = arith.addf %412, %411 : vector<2x32xf32>
    %414 = arith.divf %412, %413 : vector<2x32xf32>
    %415 = vector.extract_strided_slice %408 {offsets = [0, 32], sizes = [2, 32], strides = [1, 1]} : vector<2x128xf32> to vector<2x32xf32>
    %416 = arith.negf %415 : vector<2x32xf32>
    %417 = math.exp %416 : vector<2x32xf32>
    %cst_152 = arith.constant 1.000000e+00 : f32
    %418 = vector.broadcast %cst_152 : f32 to vector<2x32xf32>
    %419 = arith.addf %418, %417 : vector<2x32xf32>
    %420 = arith.divf %418, %419 : vector<2x32xf32>
    %421 = vector.extract_strided_slice %408 {offsets = [0, 64], sizes = [2, 32], strides = [1, 1]} : vector<2x128xf32> to vector<2x32xf32>
    %422 = math.tanh %421 : vector<2x32xf32>
    %423 = vector.extract_strided_slice %408 {offsets = [0, 96], sizes = [2, 32], strides = [1, 1]} : vector<2x128xf32> to vector<2x32xf32>
    %424 = arith.negf %423 : vector<2x32xf32>
    %425 = math.exp %424 : vector<2x32xf32>
    %cst_153 = arith.constant 1.000000e+00 : f32
    %426 = vector.broadcast %cst_153 : f32 to vector<2x32xf32>
    %427 = arith.addf %426, %425 : vector<2x32xf32>
    %428 = arith.divf %426, %427 : vector<2x32xf32>
    %429 = arith.mulf %420, %403 : vector<2x32xf32>
    %430 = arith.mulf %414, %422 : vector<2x32xf32>
    %431 = arith.addf %429, %430 : vector<2x32xf32>
    %432 = math.tanh %431 : vector<2x32xf32>
    %433 = arith.mulf %428, %432 : vector<2x32xf32>
    %434 = vector.broadcast %401 : i32 to vector<2x1xi32>
    %435 = arith.cmpi slt, %434, %3 : vector<2x1xi32>
    %436 = vector.shape_cast %435 : vector<2x1xi1> to vector<2x1xi1>
    %437 = vector.broadcast %436 : vector<2x1xi1> to vector<2x32xi1>
    %438 = arith.select %437, %433, %402 : vector<2x32xi1>, vector<2x32xf32>
    %c0_154 = arith.constant 0 : index
    %c0_155 = arith.constant 0 : index
    %439 = vector.load %arg10[%c0_154, %c0_155] : memref<2x32xf32, #tpu.memory_space<vmem>>, vector<2x32xf32>
    tpu.vector_store %arg10[%c0_154, %c0_155], %438 {strides = array<i32>} : memref<2x32xf32, #tpu.memory_space<vmem>>, vector<2x32xf32>,
    %440 = vector.shape_cast %435 : vector<2x1xi1> to vector<2x1xi1>
    %441 = vector.broadcast %440 : vector<2x1xi1> to vector<2x32xi1>
    %442 = arith.select %441, %431, %403 : vector<2x32xi1>, vector<2x32xf32>
    %c0_156 = arith.constant 0 : index
    %c0_157 = arith.constant 0 : index
    %443 = vector.load %arg11[%c0_156, %c0_157] : memref<2x32xf32, #tpu.memory_space<vmem>>, vector<2x32xf32>
    tpu.vector_store %arg11[%c0_156, %c0_157], %442 {strides = array<i32>} : memref<2x32xf32, #tpu.memory_space<vmem>>, vector<2x32xf32>,
    %cst_158 = arith.constant 0.000000e+00 : f32
    %444 = vector.broadcast %cst_158 : f32 to vector<2x32xf32>
    %445 = vector.shape_cast %435 : vector<2x1xi1> to vector<2x1xi1>
    %446 = vector.broadcast %445 : vector<2x1xi1> to vector<2x32xi1>
    %447 = arith.select %446, %433, %444 : vector<2x32xi1>, vector<2x32xf32>
    %448 = arith.truncf %447 : vector<2x32xf32> to vector<2x32xbf16>
    %449 = arith.index_cast %396 : i32 to index
    %c0_159 = arith.constant 0 : index
    %c0_160 = arith.constant 0 : index
    %450 = vector.load %arg7[%449, %c0_159, %c0_160] : memref<8x2x32xbf16, #tpu.memory_space<vmem>>, vector<1x2x32xbf16>
    %451 = vector.shape_cast %450 : vector<1x2x32xbf16> to vector<2x32xbf16>
    %452 = vector.shape_cast %448 : vector<2x32xbf16> to vector<1x2x32xbf16>
    tpu.vector_store %arg7[%449, %c0_159, %c0_160], %452 {strides = array<i32>} : memref<8x2x32xbf16, #tpu.memory_space<vmem>>, vector<1x2x32xbf16>,
    %c4_i32 = arith.constant 4 : i32
    %453 = arith.index_cast %c4_i32 : i32 to index
    %c0_161 = arith.constant 0 : index
    %c0_162 = arith.constant 0 : index
    %454 = vector.load %arg2[%453, %c0_161, %c0_162] : memref<8x2x128xbf16, #tpu.memory_space<vmem>>, vector<1x2x128xbf16>
    %455 = vector.shape_cast %454 : vector<1x2x128xbf16> to vector<2x128xbf16>
    %456 = arith.addi %4, %c4_i32 : i32
    %c0_163 = arith.constant 0 : index
    %c0_164 = arith.constant 0 : index
    %457 = vector.load %arg8[%c0_163, %c0_164] : memref<2x32xf32, #tpu.memory_space<vmem>>, vector<2x32xf32>
    %c0_165 = arith.constant 0 : index
    %c0_166 = arith.constant 0 : index
    %458 = vector.load %arg9[%c0_165, %c0_166] : memref<2x32xf32, #tpu.memory_space<vmem>>, vector<2x32xf32>
    %459 = arith.extf %455 : vector<2x128xbf16> to vector<2x128xf32>
    %460 = arith.truncf %457 : vector<2x32xf32> to vector<2x32xbf16>
    %c0_167 = arith.constant 0 : index
    %c0_168 = arith.constant 0 : index
    %461 = vector.load %arg4[%c0_167, %c0_168] : memref<32x128xbf16, #tpu.memory_space<vmem>>, vector<32x128xbf16>
    %cst_169 = arith.constant dense<0.000000e+00> : vector<2x128xf32>
    %462 = tpu.matmul %460, %461, %cst_169 {dimension_numbers = #tpu.dot_dimension_numbers<[1], [0], [0], [1], [0, 0, 1, 1], [], []>} : vector<2x32xbf16>, vector<32x128xbf16>, vector<2x128xf32> -> vector<2x128xf32>
    %463 = arith.addf %459, %462 : vector<2x128xf32>
    %464 = vector.extract_strided_slice %463 {offsets = [0, 0], sizes = [2, 32], strides = [1, 1]} : vector<2x128xf32> to vector<2x32xf32>
    %465 = arith.negf %464 : vector<2x32xf32>
    %466 = math.exp %465 : vector<2x32xf32>
    %cst_170 = arith.constant 1.000000e+00 : f32
    %467 = vector.broadcast %cst_170 : f32 to vector<2x32xf32>
    %468 = arith.addf %467, %466 : vector<2x32xf32>
    %469 = arith.divf %467, %468 : vector<2x32xf32>
    %470 = vector.extract_strided_slice %463 {offsets = [0, 32], sizes = [2, 32], strides = [1, 1]} : vector<2x128xf32> to vector<2x32xf32>
    %471 = arith.negf %470 : vector<2x32xf32>
    %472 = math.exp %471 : vector<2x32xf32>
    %cst_171 = arith.constant 1.000000e+00 : f32
    %473 = vector.broadcast %cst_171 : f32 to vector<2x32xf32>
    %474 = arith.addf %473, %472 : vector<2x32xf32>
    %475 = arith.divf %473, %474 : vector<2x32xf32>
    %476 = vector.extract_strided_slice %463 {offsets = [0, 64], sizes = [2, 32], strides = [1, 1]} : vector<2x128xf32> to vector<2x32xf32>
    %477 = math.tanh %476 : vector<2x32xf32>
    %478 = vector.extract_strided_slice %463 {offsets = [0, 96], sizes = [2, 32], strides = [1, 1]} : vector<2x128xf32> to vector<2x32xf32>
    %479 = arith.negf %478 : vector<2x32xf32>
    %480 = math.exp %479 : vector<2x32xf32>
    %cst_172 = arith.constant 1.000000e+00 : f32
    %481 = vector.broadcast %cst_172 : f32 to vector<2x32xf32>
    %482 = arith.addf %481, %480 : vector<2x32xf32>
    %483 = arith.divf %481, %482 : vector<2x32xf32>
    %484 = arith.mulf %475, %458 : vector<2x32xf32>
    %485 = arith.mulf %469, %477 : vector<2x32xf32>
    %486 = arith.addf %484, %485 : vector<2x32xf32>
    %487 = math.tanh %486 : vector<2x32xf32>
    %488 = arith.mulf %483, %487 : vector<2x32xf32>
    %489 = vector.broadcast %456 : i32 to vector<2x1xi32>
    %490 = arith.cmpi slt, %489, %3 : vector<2x1xi32>
    %491 = vector.shape_cast %490 : vector<2x1xi1> to vector<2x1xi1>
    %492 = vector.broadcast %491 : vector<2x1xi1> to vector<2x32xi1>
    %493 = arith.select %492, %488, %457 : vector<2x32xi1>, vector<2x32xf32>
    %c0_173 = arith.constant 0 : index
    %c0_174 = arith.constant 0 : index
    %494 = vector.load %arg8[%c0_173, %c0_174] : memref<2x32xf32, #tpu.memory_space<vmem>>, vector<2x32xf32>
    tpu.vector_store %arg8[%c0_173, %c0_174], %493 {strides = array<i32>} : memref<2x32xf32, #tpu.memory_space<vmem>>, vector<2x32xf32>,
    %495 = vector.shape_cast %490 : vector<2x1xi1> to vector<2x1xi1>
    %496 = vector.broadcast %495 : vector<2x1xi1> to vector<2x32xi1>
    %497 = arith.select %496, %486, %458 : vector<2x32xi1>, vector<2x32xf32>
    %c0_175 = arith.constant 0 : index
    %c0_176 = arith.constant 0 : index
    %498 = vector.load %arg9[%c0_175, %c0_176] : memref<2x32xf32, #tpu.memory_space<vmem>>, vector<2x32xf32>
    tpu.vector_store %arg9[%c0_175, %c0_176], %497 {strides = array<i32>} : memref<2x32xf32, #tpu.memory_space<vmem>>, vector<2x32xf32>,
    %cst_177 = arith.constant 0.000000e+00 : f32
    %499 = vector.broadcast %cst_177 : f32 to vector<2x32xf32>
    %500 = vector.shape_cast %490 : vector<2x1xi1> to vector<2x1xi1>
    %501 = vector.broadcast %500 : vector<2x1xi1> to vector<2x32xi1>
    %502 = arith.select %501, %488, %499 : vector<2x32xi1>, vector<2x32xf32>
    %503 = arith.truncf %502 : vector<2x32xf32> to vector<2x32xbf16>
    %504 = arith.index_cast %c4_i32 : i32 to index
    %c0_178 = arith.constant 0 : index
    %c0_179 = arith.constant 0 : index
    %505 = vector.load %arg6[%504, %c0_178, %c0_179] : memref<8x2x32xbf16, #tpu.memory_space<vmem>>, vector<1x2x32xbf16>
    %506 = vector.shape_cast %505 : vector<1x2x32xbf16> to vector<2x32xbf16>
    %507 = vector.shape_cast %503 : vector<2x32xbf16> to vector<1x2x32xbf16>
    tpu.vector_store %arg6[%504, %c0_178, %c0_179], %507 {strides = array<i32>} : memref<8x2x32xbf16, #tpu.memory_space<vmem>>, vector<1x2x32xbf16>,
    %c7_i32_180 = arith.constant 7 : i32
    %508 = arith.subi %c7_i32_180, %c4_i32 : i32
    %509 = arith.index_cast %508 : i32 to index
    %c0_181 = arith.constant 0 : index
    %c0_182 = arith.constant 0 : index
    %510 = vector.load %arg3[%509, %c0_181, %c0_182] : memref<8x2x128xbf16, #tpu.memory_space<vmem>>, vector<1x2x128xbf16>
    %511 = vector.shape_cast %510 : vector<1x2x128xbf16> to vector<2x128xbf16>
    %512 = arith.addi %4, %c4_i32 : i32
    %c7_i32_183 = arith.constant 7 : i32
    %513 = arith.subi %c7_i32_183, %512 : i32
    %c0_184 = arith.constant 0 : index
    %c0_185 = arith.constant 0 : index
    %514 = vector.load %arg10[%c0_184, %c0_185] : memref<2x32xf32, #tpu.memory_space<vmem>>, vector<2x32xf32>
    %c0_186 = arith.constant 0 : index
    %c0_187 = arith.constant 0 : index
    %515 = vector.load %arg11[%c0_186, %c0_187] : memref<2x32xf32, #tpu.memory_space<vmem>>, vector<2x32xf32>
    %516 = arith.extf %511 : vector<2x128xbf16> to vector<2x128xf32>
    %517 = arith.truncf %514 : vector<2x32xf32> to vector<2x32xbf16>
    %c0_188 = arith.constant 0 : index
    %c0_189 = arith.constant 0 : index
    %518 = vector.load %arg5[%c0_188, %c0_189] : memref<32x128xbf16, #tpu.memory_space<vmem>>, vector<32x128xbf16>
    %cst_190 = arith.constant dense<0.000000e+00> : vector<2x128xf32>
    %519 = tpu.matmul %517, %518, %cst_190 {dimension_numbers = #tpu.dot_dimension_numbers<[1], [0], [0], [1], [0, 0, 1, 1], [], []>} : vector<2x32xbf16>, vector<32x128xbf16>, vector<2x128xf32> -> vector<2x128xf32>
    %520 = arith.addf %516, %519 : vector<2x128xf32>
    %521 = vector.extract_strided_slice %520 {offsets = [0, 0], sizes = [2, 32], strides = [1, 1]} : vector<2x128xf32> to vector<2x32xf32>
    %522 = arith.negf %521 : vector<2x32xf32>
    %523 = math.exp %522 : vector<2x32xf32>
    %cst_191 = arith.constant 1.000000e+00 : f32
    %524 = vector.broadcast %cst_191 : f32 to vector<2x32xf32>
    %525 = arith.addf %524, %523 : vector<2x32xf32>
    %526 = arith.divf %524, %525 : vector<2x32xf32>
    %527 = vector.extract_strided_slice %520 {offsets = [0, 32], sizes = [2, 32], strides = [1, 1]} : vector<2x128xf32> to vector<2x32xf32>
    %528 = arith.negf %527 : vector<2x32xf32>
    %529 = math.exp %528 : vector<2x32xf32>
    %cst_192 = arith.constant 1.000000e+00 : f32
    %530 = vector.broadcast %cst_192 : f32 to vector<2x32xf32>
    %531 = arith.addf %530, %529 : vector<2x32xf32>
    %532 = arith.divf %530, %531 : vector<2x32xf32>
    %533 = vector.extract_strided_slice %520 {offsets = [0, 64], sizes = [2, 32], strides = [1, 1]} : vector<2x128xf32> to vector<2x32xf32>
    %534 = math.tanh %533 : vector<2x32xf32>
    %535 = vector.extract_strided_slice %520 {offsets = [0, 96], sizes = [2, 32], strides = [1, 1]} : vector<2x128xf32> to vector<2x32xf32>
    %536 = arith.negf %535 : vector<2x32xf32>
    %537 = math.exp %536 : vector<2x32xf32>
    %cst_193 = arith.constant 1.000000e+00 : f32
    %538 = vector.broadcast %cst_193 : f32 to vector<2x32xf32>
    %539 = arith.addf %538, %537 : vector<2x32xf32>
    %540 = arith.divf %538, %539 : vector<2x32xf32>
    %541 = arith.mulf %532, %515 : vector<2x32xf32>
    %542 = arith.mulf %526, %534 : vector<2x32xf32>
    %543 = arith.addf %541, %542 : vector<2x32xf32>
    %544 = math.tanh %543 : vector<2x32xf32>
    %545 = arith.mulf %540, %544 : vector<2x32xf32>
    %546 = vector.broadcast %513 : i32 to vector<2x1xi32>
    %547 = arith.cmpi slt, %546, %3 : vector<2x1xi32>
    %548 = vector.shape_cast %547 : vector<2x1xi1> to vector<2x1xi1>
    %549 = vector.broadcast %548 : vector<2x1xi1> to vector<2x32xi1>
    %550 = arith.select %549, %545, %514 : vector<2x32xi1>, vector<2x32xf32>
    %c0_194 = arith.constant 0 : index
    %c0_195 = arith.constant 0 : index
    %551 = vector.load %arg10[%c0_194, %c0_195] : memref<2x32xf32, #tpu.memory_space<vmem>>, vector<2x32xf32>
    tpu.vector_store %arg10[%c0_194, %c0_195], %550 {strides = array<i32>} : memref<2x32xf32, #tpu.memory_space<vmem>>, vector<2x32xf32>,
    %552 = vector.shape_cast %547 : vector<2x1xi1> to vector<2x1xi1>
    %553 = vector.broadcast %552 : vector<2x1xi1> to vector<2x32xi1>
    %554 = arith.select %553, %543, %515 : vector<2x32xi1>, vector<2x32xf32>
    %c0_196 = arith.constant 0 : index
    %c0_197 = arith.constant 0 : index
    %555 = vector.load %arg11[%c0_196, %c0_197] : memref<2x32xf32, #tpu.memory_space<vmem>>, vector<2x32xf32>
    tpu.vector_store %arg11[%c0_196, %c0_197], %554 {strides = array<i32>} : memref<2x32xf32, #tpu.memory_space<vmem>>, vector<2x32xf32>,
    %cst_198 = arith.constant 0.000000e+00 : f32
    %556 = vector.broadcast %cst_198 : f32 to vector<2x32xf32>
    %557 = vector.shape_cast %547 : vector<2x1xi1> to vector<2x1xi1>
    %558 = vector.broadcast %557 : vector<2x1xi1> to vector<2x32xi1>
    %559 = arith.select %558, %545, %556 : vector<2x32xi1>, vector<2x32xf32>
    %560 = arith.truncf %559 : vector<2x32xf32> to vector<2x32xbf16>
    %561 = arith.index_cast %508 : i32 to index
    %c0_199 = arith.constant 0 : index
    %c0_200 = arith.constant 0 : index
    %562 = vector.load %arg7[%561, %c0_199, %c0_200] : memref<8x2x32xbf16, #tpu.memory_space<vmem>>, vector<1x2x32xbf16>
    %563 = vector.shape_cast %562 : vector<1x2x32xbf16> to vector<2x32xbf16>
    %564 = vector.shape_cast %560 : vector<2x32xbf16> to vector<1x2x32xbf16>
    tpu.vector_store %arg7[%561, %c0_199, %c0_200], %564 {strides = array<i32>} : memref<8x2x32xbf16, #tpu.memory_space<vmem>>, vector<1x2x32xbf16>,
    %c5_i32 = arith.constant 5 : i32
    %565 = arith.index_cast %c5_i32 : i32 to index
    %c0_201 = arith.constant 0 : index
    %c0_202 = arith.constant 0 : index
    %566 = vector.load %arg2[%565, %c0_201, %c0_202] : memref<8x2x128xbf16, #tpu.memory_space<vmem>>, vector<1x2x128xbf16>
    %567 = vector.shape_cast %566 : vector<1x2x128xbf16> to vector<2x128xbf16>
    %568 = arith.addi %4, %c5_i32 : i32
    %c0_203 = arith.constant 0 : index
    %c0_204 = arith.constant 0 : index
    %569 = vector.load %arg8[%c0_203, %c0_204] : memref<2x32xf32, #tpu.memory_space<vmem>>, vector<2x32xf32>
    %c0_205 = arith.constant 0 : index
    %c0_206 = arith.constant 0 : index
    %570 = vector.load %arg9[%c0_205, %c0_206] : memref<2x32xf32, #tpu.memory_space<vmem>>, vector<2x32xf32>
    %571 = arith.extf %567 : vector<2x128xbf16> to vector<2x128xf32>
    %572 = arith.truncf %569 : vector<2x32xf32> to vector<2x32xbf16>
    %c0_207 = arith.constant 0 : index
    %c0_208 = arith.constant 0 : index
    %573 = vector.load %arg4[%c0_207, %c0_208] : memref<32x128xbf16, #tpu.memory_space<vmem>>, vector<32x128xbf16>
    %cst_209 = arith.constant dense<0.000000e+00> : vector<2x128xf32>
    %574 = tpu.matmul %572, %573, %cst_209 {dimension_numbers = #tpu.dot_dimension_numbers<[1], [0], [0], [1], [0, 0, 1, 1], [], []>} : vector<2x32xbf16>, vector<32x128xbf16>, vector<2x128xf32> -> vector<2x128xf32>
    %575 = arith.addf %571, %574 : vector<2x128xf32>
    %576 = vector.extract_strided_slice %575 {offsets = [0, 0], sizes = [2, 32], strides = [1, 1]} : vector<2x128xf32> to vector<2x32xf32>
    %577 = arith.negf %576 : vector<2x32xf32>
    %578 = math.exp %577 : vector<2x32xf32>
    %cst_210 = arith.constant 1.000000e+00 : f32
    %579 = vector.broadcast %cst_210 : f32 to vector<2x32xf32>
    %580 = arith.addf %579, %578 : vector<2x32xf32>
    %581 = arith.divf %579, %580 : vector<2x32xf32>
    %582 = vector.extract_strided_slice %575 {offsets = [0, 32], sizes = [2, 32], strides = [1, 1]} : vector<2x128xf32> to vector<2x32xf32>
    %583 = arith.negf %582 : vector<2x32xf32>
    %584 = math.exp %583 : vector<2x32xf32>
    %cst_211 = arith.constant 1.000000e+00 : f32
    %585 = vector.broadcast %cst_211 : f32 to vector<2x32xf32>
    %586 = arith.addf %585, %584 : vector<2x32xf32>
    %587 = arith.divf %585, %586 : vector<2x32xf32>
    %588 = vector.extract_strided_slice %575 {offsets = [0, 64], sizes = [2, 32], strides = [1, 1]} : vector<2x128xf32> to vector<2x32xf32>
    %589 = math.tanh %588 : vector<2x32xf32>
    %590 = vector.extract_strided_slice %575 {offsets = [0, 96], sizes = [2, 32], strides = [1, 1]} : vector<2x128xf32> to vector<2x32xf32>
    %591 = arith.negf %590 : vector<2x32xf32>
    %592 = math.exp %591 : vector<2x32xf32>
    %cst_212 = arith.constant 1.000000e+00 : f32
    %593 = vector.broadcast %cst_212 : f32 to vector<2x32xf32>
    %594 = arith.addf %593, %592 : vector<2x32xf32>
    %595 = arith.divf %593, %594 : vector<2x32xf32>
    %596 = arith.mulf %587, %570 : vector<2x32xf32>
    %597 = arith.mulf %581, %589 : vector<2x32xf32>
    %598 = arith.addf %596, %597 : vector<2x32xf32>
    %599 = math.tanh %598 : vector<2x32xf32>
    %600 = arith.mulf %595, %599 : vector<2x32xf32>
    %601 = vector.broadcast %568 : i32 to vector<2x1xi32>
    %602 = arith.cmpi slt, %601, %3 : vector<2x1xi32>
    %603 = vector.shape_cast %602 : vector<2x1xi1> to vector<2x1xi1>
    %604 = vector.broadcast %603 : vector<2x1xi1> to vector<2x32xi1>
    %605 = arith.select %604, %600, %569 : vector<2x32xi1>, vector<2x32xf32>
    %c0_213 = arith.constant 0 : index
    %c0_214 = arith.constant 0 : index
    %606 = vector.load %arg8[%c0_213, %c0_214] : memref<2x32xf32, #tpu.memory_space<vmem>>, vector<2x32xf32>
    tpu.vector_store %arg8[%c0_213, %c0_214], %605 {strides = array<i32>} : memref<2x32xf32, #tpu.memory_space<vmem>>, vector<2x32xf32>,
    %607 = vector.shape_cast %602 : vector<2x1xi1> to vector<2x1xi1>
    %608 = vector.broadcast %607 : vector<2x1xi1> to vector<2x32xi1>
    %609 = arith.select %608, %598, %570 : vector<2x32xi1>, vector<2x32xf32>
    %c0_215 = arith.constant 0 : index
    %c0_216 = arith.constant 0 : index
    %610 = vector.load %arg9[%c0_215, %c0_216] : memref<2x32xf32, #tpu.memory_space<vmem>>, vector<2x32xf32>
    tpu.vector_store %arg9[%c0_215, %c0_216], %609 {strides = array<i32>} : memref<2x32xf32, #tpu.memory_space<vmem>>, vector<2x32xf32>,
    %cst_217 = arith.constant 0.000000e+00 : f32
    %611 = vector.broadcast %cst_217 : f32 to vector<2x32xf32>
    %612 = vector.shape_cast %602 : vector<2x1xi1> to vector<2x1xi1>
    %613 = vector.broadcast %612 : vector<2x1xi1> to vector<2x32xi1>
    %614 = arith.select %613, %600, %611 : vector<2x32xi1>, vector<2x32xf32>
    %615 = arith.truncf %614 : vector<2x32xf32> to vector<2x32xbf16>
    %616 = arith.index_cast %c5_i32 : i32 to index
    %c0_218 = arith.constant 0 : index
    %c0_219 = arith.constant 0 : index
    %617 = vector.load %arg6[%616, %c0_218, %c0_219] : memref<8x2x32xbf16, #tpu.memory_space<vmem>>, vector<1x2x32xbf16>
    %618 = vector.shape_cast %617 : vector<1x2x32xbf16> to vector<2x32xbf16>
    %619 = vector.shape_cast %615 : vector<2x32xbf16> to vector<1x2x32xbf16>
    tpu.vector_store %arg6[%616, %c0_218, %c0_219], %619 {strides = array<i32>} : memref<8x2x32xbf16, #tpu.memory_space<vmem>>, vector<1x2x32xbf16>,
    %c7_i32_220 = arith.constant 7 : i32
    %620 = arith.subi %c7_i32_220, %c5_i32 : i32
    %621 = arith.index_cast %620 : i32 to index
    %c0_221 = arith.constant 0 : index
    %c0_222 = arith.constant 0 : index
    %622 = vector.load %arg3[%621, %c0_221, %c0_222] : memref<8x2x128xbf16, #tpu.memory_space<vmem>>, vector<1x2x128xbf16>
    %623 = vector.shape_cast %622 : vector<1x2x128xbf16> to vector<2x128xbf16>
    %624 = arith.addi %4, %c5_i32 : i32
    %c7_i32_223 = arith.constant 7 : i32
    %625 = arith.subi %c7_i32_223, %624 : i32
    %c0_224 = arith.constant 0 : index
    %c0_225 = arith.constant 0 : index
    %626 = vector.load %arg10[%c0_224, %c0_225] : memref<2x32xf32, #tpu.memory_space<vmem>>, vector<2x32xf32>
    %c0_226 = arith.constant 0 : index
    %c0_227 = arith.constant 0 : index
    %627 = vector.load %arg11[%c0_226, %c0_227] : memref<2x32xf32, #tpu.memory_space<vmem>>, vector<2x32xf32>
    %628 = arith.extf %623 : vector<2x128xbf16> to vector<2x128xf32>
    %629 = arith.truncf %626 : vector<2x32xf32> to vector<2x32xbf16>
    %c0_228 = arith.constant 0 : index
    %c0_229 = arith.constant 0 : index
    %630 = vector.load %arg5[%c0_228, %c0_229] : memref<32x128xbf16, #tpu.memory_space<vmem>>, vector<32x128xbf16>
    %cst_230 = arith.constant dense<0.000000e+00> : vector<2x128xf32>
    %631 = tpu.matmul %629, %630, %cst_230 {dimension_numbers = #tpu.dot_dimension_numbers<[1], [0], [0], [1], [0, 0, 1, 1], [], []>} : vector<2x32xbf16>, vector<32x128xbf16>, vector<2x128xf32> -> vector<2x128xf32>
    %632 = arith.addf %628, %631 : vector<2x128xf32>
    %633 = vector.extract_strided_slice %632 {offsets = [0, 0], sizes = [2, 32], strides = [1, 1]} : vector<2x128xf32> to vector<2x32xf32>
    %634 = arith.negf %633 : vector<2x32xf32>
    %635 = math.exp %634 : vector<2x32xf32>
    %cst_231 = arith.constant 1.000000e+00 : f32
    %636 = vector.broadcast %cst_231 : f32 to vector<2x32xf32>
    %637 = arith.addf %636, %635 : vector<2x32xf32>
    %638 = arith.divf %636, %637 : vector<2x32xf32>
    %639 = vector.extract_strided_slice %632 {offsets = [0, 32], sizes = [2, 32], strides = [1, 1]} : vector<2x128xf32> to vector<2x32xf32>
    %640 = arith.negf %639 : vector<2x32xf32>
    %641 = math.exp %640 : vector<2x32xf32>
    %cst_232 = arith.constant 1.000000e+00 : f32
    %642 = vector.broadcast %cst_232 : f32 to vector<2x32xf32>
    %643 = arith.addf %642, %641 : vector<2x32xf32>
    %644 = arith.divf %642, %643 : vector<2x32xf32>
    %645 = vector.extract_strided_slice %632 {offsets = [0, 64], sizes = [2, 32], strides = [1, 1]} : vector<2x128xf32> to vector<2x32xf32>
    %646 = math.tanh %645 : vector<2x32xf32>
    %647 = vector.extract_strided_slice %632 {offsets = [0, 96], sizes = [2, 32], strides = [1, 1]} : vector<2x128xf32> to vector<2x32xf32>
    %648 = arith.negf %647 : vector<2x32xf32>
    %649 = math.exp %648 : vector<2x32xf32>
    %cst_233 = arith.constant 1.000000e+00 : f32
    %650 = vector.broadcast %cst_233 : f32 to vector<2x32xf32>
    %651 = arith.addf %650, %649 : vector<2x32xf32>
    %652 = arith.divf %650, %651 : vector<2x32xf32>
    %653 = arith.mulf %644, %627 : vector<2x32xf32>
    %654 = arith.mulf %638, %646 : vector<2x32xf32>
    %655 = arith.addf %653, %654 : vector<2x32xf32>
    %656 = math.tanh %655 : vector<2x32xf32>
    %657 = arith.mulf %652, %656 : vector<2x32xf32>
    %658 = vector.broadcast %625 : i32 to vector<2x1xi32>
    %659 = arith.cmpi slt, %658, %3 : vector<2x1xi32>
    %660 = vector.shape_cast %659 : vector<2x1xi1> to vector<2x1xi1>
    %661 = vector.broadcast %660 : vector<2x1xi1> to vector<2x32xi1>
    %662 = arith.select %661, %657, %626 : vector<2x32xi1>, vector<2x32xf32>
    %c0_234 = arith.constant 0 : index
    %c0_235 = arith.constant 0 : index
    %663 = vector.load %arg10[%c0_234, %c0_235] : memref<2x32xf32, #tpu.memory_space<vmem>>, vector<2x32xf32>
    tpu.vector_store %arg10[%c0_234, %c0_235], %662 {strides = array<i32>} : memref<2x32xf32, #tpu.memory_space<vmem>>, vector<2x32xf32>,
    %664 = vector.shape_cast %659 : vector<2x1xi1> to vector<2x1xi1>
    %665 = vector.broadcast %664 : vector<2x1xi1> to vector<2x32xi1>
    %666 = arith.select %665, %655, %627 : vector<2x32xi1>, vector<2x32xf32>
    %c0_236 = arith.constant 0 : index
    %c0_237 = arith.constant 0 : index
    %667 = vector.load %arg11[%c0_236, %c0_237] : memref<2x32xf32, #tpu.memory_space<vmem>>, vector<2x32xf32>
    tpu.vector_store %arg11[%c0_236, %c0_237], %666 {strides = array<i32>} : memref<2x32xf32, #tpu.memory_space<vmem>>, vector<2x32xf32>,
    %cst_238 = arith.constant 0.000000e+00 : f32
    %668 = vector.broadcast %cst_238 : f32 to vector<2x32xf32>
    %669 = vector.shape_cast %659 : vector<2x1xi1> to vector<2x1xi1>
    %670 = vector.broadcast %669 : vector<2x1xi1> to vector<2x32xi1>
    %671 = arith.select %670, %657, %668 : vector<2x32xi1>, vector<2x32xf32>
    %672 = arith.truncf %671 : vector<2x32xf32> to vector<2x32xbf16>
    %673 = arith.index_cast %620 : i32 to index
    %c0_239 = arith.constant 0 : index
    %c0_240 = arith.constant 0 : index
    %674 = vector.load %arg7[%673, %c0_239, %c0_240] : memref<8x2x32xbf16, #tpu.memory_space<vmem>>, vector<1x2x32xbf16>
    %675 = vector.shape_cast %674 : vector<1x2x32xbf16> to vector<2x32xbf16>
    %676 = vector.shape_cast %672 : vector<2x32xbf16> to vector<1x2x32xbf16>
    tpu.vector_store %arg7[%673, %c0_239, %c0_240], %676 {strides = array<i32>} : memref<8x2x32xbf16, #tpu.memory_space<vmem>>, vector<1x2x32xbf16>,
    %c6_i32 = arith.constant 6 : i32
    %677 = arith.index_cast %c6_i32 : i32 to index
    %c0_241 = arith.constant 0 : index
    %c0_242 = arith.constant 0 : index
    %678 = vector.load %arg2[%677, %c0_241, %c0_242] : memref<8x2x128xbf16, #tpu.memory_space<vmem>>, vector<1x2x128xbf16>
    %679 = vector.shape_cast %678 : vector<1x2x128xbf16> to vector<2x128xbf16>
    %680 = arith.addi %4, %c6_i32 : i32
    %c0_243 = arith.constant 0 : index
    %c0_244 = arith.constant 0 : index
    %681 = vector.load %arg8[%c0_243, %c0_244] : memref<2x32xf32, #tpu.memory_space<vmem>>, vector<2x32xf32>
    %c0_245 = arith.constant 0 : index
    %c0_246 = arith.constant 0 : index
    %682 = vector.load %arg9[%c0_245, %c0_246] : memref<2x32xf32, #tpu.memory_space<vmem>>, vector<2x32xf32>
    %683 = arith.extf %679 : vector<2x128xbf16> to vector<2x128xf32>
    %684 = arith.truncf %681 : vector<2x32xf32> to vector<2x32xbf16>
    %c0_247 = arith.constant 0 : index
    %c0_248 = arith.constant 0 : index
    %685 = vector.load %arg4[%c0_247, %c0_248] : memref<32x128xbf16, #tpu.memory_space<vmem>>, vector<32x128xbf16>
    %cst_249 = arith.constant dense<0.000000e+00> : vector<2x128xf32>
    %686 = tpu.matmul %684, %685, %cst_249 {dimension_numbers = #tpu.dot_dimension_numbers<[1], [0], [0], [1], [0, 0, 1, 1], [], []>} : vector<2x32xbf16>, vector<32x128xbf16>, vector<2x128xf32> -> vector<2x128xf32>
    %687 = arith.addf %683, %686 : vector<2x128xf32>
    %688 = vector.extract_strided_slice %687 {offsets = [0, 0], sizes = [2, 32], strides = [1, 1]} : vector<2x128xf32> to vector<2x32xf32>
    %689 = arith.negf %688 : vector<2x32xf32>
    %690 = math.exp %689 : vector<2x32xf32>
    %cst_250 = arith.constant 1.000000e+00 : f32
    %691 = vector.broadcast %cst_250 : f32 to vector<2x32xf32>
    %692 = arith.addf %691, %690 : vector<2x32xf32>
    %693 = arith.divf %691, %692 : vector<2x32xf32>
    %694 = vector.extract_strided_slice %687 {offsets = [0, 32], sizes = [2, 32], strides = [1, 1]} : vector<2x128xf32> to vector<2x32xf32>
    %695 = arith.negf %694 : vector<2x32xf32>
    %696 = math.exp %695 : vector<2x32xf32>
    %cst_251 = arith.constant 1.000000e+00 : f32
    %697 = vector.broadcast %cst_251 : f32 to vector<2x32xf32>
    %698 = arith.addf %697, %696 : vector<2x32xf32>
    %699 = arith.divf %697, %698 : vector<2x32xf32>
    %700 = vector.extract_strided_slice %687 {offsets = [0, 64], sizes = [2, 32], strides = [1, 1]} : vector<2x128xf32> to vector<2x32xf32>
    %701 = math.tanh %700 : vector<2x32xf32>
    %702 = vector.extract_strided_slice %687 {offsets = [0, 96], sizes = [2, 32], strides = [1, 1]} : vector<2x128xf32> to vector<2x32xf32>
    %703 = arith.negf %702 : vector<2x32xf32>
    %704 = math.exp %703 : vector<2x32xf32>
    %cst_252 = arith.constant 1.000000e+00 : f32
    %705 = vector.broadcast %cst_252 : f32 to vector<2x32xf32>
    %706 = arith.addf %705, %704 : vector<2x32xf32>
    %707 = arith.divf %705, %706 : vector<2x32xf32>
    %708 = arith.mulf %699, %682 : vector<2x32xf32>
    %709 = arith.mulf %693, %701 : vector<2x32xf32>
    %710 = arith.addf %708, %709 : vector<2x32xf32>
    %711 = math.tanh %710 : vector<2x32xf32>
    %712 = arith.mulf %707, %711 : vector<2x32xf32>
    %713 = vector.broadcast %680 : i32 to vector<2x1xi32>
    %714 = arith.cmpi slt, %713, %3 : vector<2x1xi32>
    %715 = vector.shape_cast %714 : vector<2x1xi1> to vector<2x1xi1>
    %716 = vector.broadcast %715 : vector<2x1xi1> to vector<2x32xi1>
    %717 = arith.select %716, %712, %681 : vector<2x32xi1>, vector<2x32xf32>
    %c0_253 = arith.constant 0 : index
    %c0_254 = arith.constant 0 : index
    %718 = vector.load %arg8[%c0_253, %c0_254] : memref<2x32xf32, #tpu.memory_space<vmem>>, vector<2x32xf32>
    tpu.vector_store %arg8[%c0_253, %c0_254], %717 {strides = array<i32>} : memref<2x32xf32, #tpu.memory_space<vmem>>, vector<2x32xf32>,
    %719 = vector.shape_cast %714 : vector<2x1xi1> to vector<2x1xi1>
    %720 = vector.broadcast %719 : vector<2x1xi1> to vector<2x32xi1>
    %721 = arith.select %720, %710, %682 : vector<2x32xi1>, vector<2x32xf32>
    %c0_255 = arith.constant 0 : index
    %c0_256 = arith.constant 0 : index
    %722 = vector.load %arg9[%c0_255, %c0_256] : memref<2x32xf32, #tpu.memory_space<vmem>>, vector<2x32xf32>
    tpu.vector_store %arg9[%c0_255, %c0_256], %721 {strides = array<i32>} : memref<2x32xf32, #tpu.memory_space<vmem>>, vector<2x32xf32>,
    %cst_257 = arith.constant 0.000000e+00 : f32
    %723 = vector.broadcast %cst_257 : f32 to vector<2x32xf32>
    %724 = vector.shape_cast %714 : vector<2x1xi1> to vector<2x1xi1>
    %725 = vector.broadcast %724 : vector<2x1xi1> to vector<2x32xi1>
    %726 = arith.select %725, %712, %723 : vector<2x32xi1>, vector<2x32xf32>
    %727 = arith.truncf %726 : vector<2x32xf32> to vector<2x32xbf16>
    %728 = arith.index_cast %c6_i32 : i32 to index
    %c0_258 = arith.constant 0 : index
    %c0_259 = arith.constant 0 : index
    %729 = vector.load %arg6[%728, %c0_258, %c0_259] : memref<8x2x32xbf16, #tpu.memory_space<vmem>>, vector<1x2x32xbf16>
    %730 = vector.shape_cast %729 : vector<1x2x32xbf16> to vector<2x32xbf16>
    %731 = vector.shape_cast %727 : vector<2x32xbf16> to vector<1x2x32xbf16>
    tpu.vector_store %arg6[%728, %c0_258, %c0_259], %731 {strides = array<i32>} : memref<8x2x32xbf16, #tpu.memory_space<vmem>>, vector<1x2x32xbf16>,
    %c7_i32_260 = arith.constant 7 : i32
    %732 = arith.subi %c7_i32_260, %c6_i32 : i32
    %733 = arith.index_cast %732 : i32 to index
    %c0_261 = arith.constant 0 : index
    %c0_262 = arith.constant 0 : index
    %734 = vector.load %arg3[%733, %c0_261, %c0_262] : memref<8x2x128xbf16, #tpu.memory_space<vmem>>, vector<1x2x128xbf16>
    %735 = vector.shape_cast %734 : vector<1x2x128xbf16> to vector<2x128xbf16>
    %736 = arith.addi %4, %c6_i32 : i32
    %c7_i32_263 = arith.constant 7 : i32
    %737 = arith.subi %c7_i32_263, %736 : i32
    %c0_264 = arith.constant 0 : index
    %c0_265 = arith.constant 0 : index
    %738 = vector.load %arg10[%c0_264, %c0_265] : memref<2x32xf32, #tpu.memory_space<vmem>>, vector<2x32xf32>
    %c0_266 = arith.constant 0 : index
    %c0_267 = arith.constant 0 : index
    %739 = vector.load %arg11[%c0_266, %c0_267] : memref<2x32xf32, #tpu.memory_space<vmem>>, vector<2x32xf32>
    %740 = arith.extf %735 : vector<2x128xbf16> to vector<2x128xf32>
    %741 = arith.truncf %738 : vector<2x32xf32> to vector<2x32xbf16>
    %c0_268 = arith.constant 0 : index
    %c0_269 = arith.constant 0 : index
    %742 = vector.load %arg5[%c0_268, %c0_269] : memref<32x128xbf16, #tpu.memory_space<vmem>>, vector<32x128xbf16>
    %cst_270 = arith.constant dense<0.000000e+00> : vector<2x128xf32>
    %743 = tpu.matmul %741, %742, %cst_270 {dimension_numbers = #tpu.dot_dimension_numbers<[1], [0], [0], [1], [0, 0, 1, 1], [], []>} : vector<2x32xbf16>, vector<32x128xbf16>, vector<2x128xf32> -> vector<2x128xf32>
    %744 = arith.addf %740, %743 : vector<2x128xf32>
    %745 = vector.extract_strided_slice %744 {offsets = [0, 0], sizes = [2, 32], strides = [1, 1]} : vector<2x128xf32> to vector<2x32xf32>
    %746 = arith.negf %745 : vector<2x32xf32>
    %747 = math.exp %746 : vector<2x32xf32>
    %cst_271 = arith.constant 1.000000e+00 : f32
    %748 = vector.broadcast %cst_271 : f32 to vector<2x32xf32>
    %749 = arith.addf %748, %747 : vector<2x32xf32>
    %750 = arith.divf %748, %749 : vector<2x32xf32>
    %751 = vector.extract_strided_slice %744 {offsets = [0, 32], sizes = [2, 32], strides = [1, 1]} : vector<2x128xf32> to vector<2x32xf32>
    %752 = arith.negf %751 : vector<2x32xf32>
    %753 = math.exp %752 : vector<2x32xf32>
    %cst_272 = arith.constant 1.000000e+00 : f32
    %754 = vector.broadcast %cst_272 : f32 to vector<2x32xf32>
    %755 = arith.addf %754, %753 : vector<2x32xf32>
    %756 = arith.divf %754, %755 : vector<2x32xf32>
    %757 = vector.extract_strided_slice %744 {offsets = [0, 64], sizes = [2, 32], strides = [1, 1]} : vector<2x128xf32> to vector<2x32xf32>
    %758 = math.tanh %757 : vector<2x32xf32>
    %759 = vector.extract_strided_slice %744 {offsets = [0, 96], sizes = [2, 32], strides = [1, 1]} : vector<2x128xf32> to vector<2x32xf32>
    %760 = arith.negf %759 : vector<2x32xf32>
    %761 = math.exp %760 : vector<2x32xf32>
    %cst_273 = arith.constant 1.000000e+00 : f32
    %762 = vector.broadcast %cst_273 : f32 to vector<2x32xf32>
    %763 = arith.addf %762, %761 : vector<2x32xf32>
    %764 = arith.divf %762, %763 : vector<2x32xf32>
    %765 = arith.mulf %756, %739 : vector<2x32xf32>
    %766 = arith.mulf %750, %758 : vector<2x32xf32>
    %767 = arith.addf %765, %766 : vector<2x32xf32>
    %768 = math.tanh %767 : vector<2x32xf32>
    %769 = arith.mulf %764, %768 : vector<2x32xf32>
    %770 = vector.broadcast %737 : i32 to vector<2x1xi32>
    %771 = arith.cmpi slt, %770, %3 : vector<2x1xi32>
    %772 = vector.shape_cast %771 : vector<2x1xi1> to vector<2x1xi1>
    %773 = vector.broadcast %772 : vector<2x1xi1> to vector<2x32xi1>
    %774 = arith.select %773, %769, %738 : vector<2x32xi1>, vector<2x32xf32>
    %c0_274 = arith.constant 0 : index
    %c0_275 = arith.constant 0 : index
    %775 = vector.load %arg10[%c0_274, %c0_275] : memref<2x32xf32, #tpu.memory_space<vmem>>, vector<2x32xf32>
    tpu.vector_store %arg10[%c0_274, %c0_275], %774 {strides = array<i32>} : memref<2x32xf32, #tpu.memory_space<vmem>>, vector<2x32xf32>,
    %776 = vector.shape_cast %771 : vector<2x1xi1> to vector<2x1xi1>
    %777 = vector.broadcast %776 : vector<2x1xi1> to vector<2x32xi1>
    %778 = arith.select %777, %767, %739 : vector<2x32xi1>, vector<2x32xf32>
    %c0_276 = arith.constant 0 : index
    %c0_277 = arith.constant 0 : index
    %779 = vector.load %arg11[%c0_276, %c0_277] : memref<2x32xf32, #tpu.memory_space<vmem>>, vector<2x32xf32>
    tpu.vector_store %arg11[%c0_276, %c0_277], %778 {strides = array<i32>} : memref<2x32xf32, #tpu.memory_space<vmem>>, vector<2x32xf32>,
    %cst_278 = arith.constant 0.000000e+00 : f32
    %780 = vector.broadcast %cst_278 : f32 to vector<2x32xf32>
    %781 = vector.shape_cast %771 : vector<2x1xi1> to vector<2x1xi1>
    %782 = vector.broadcast %781 : vector<2x1xi1> to vector<2x32xi1>
    %783 = arith.select %782, %769, %780 : vector<2x32xi1>, vector<2x32xf32>
    %784 = arith.truncf %783 : vector<2x32xf32> to vector<2x32xbf16>
    %785 = arith.index_cast %732 : i32 to index
    %c0_279 = arith.constant 0 : index
    %c0_280 = arith.constant 0 : index
    %786 = vector.load %arg7[%785, %c0_279, %c0_280] : memref<8x2x32xbf16, #tpu.memory_space<vmem>>, vector<1x2x32xbf16>
    %787 = vector.shape_cast %786 : vector<1x2x32xbf16> to vector<2x32xbf16>
    %788 = vector.shape_cast %784 : vector<2x32xbf16> to vector<1x2x32xbf16>
    tpu.vector_store %arg7[%785, %c0_279, %c0_280], %788 {strides = array<i32>} : memref<8x2x32xbf16, #tpu.memory_space<vmem>>, vector<1x2x32xbf16>,
    %c7_i32_281 = arith.constant 7 : i32
    %789 = arith.index_cast %c7_i32_281 : i32 to index
    %c0_282 = arith.constant 0 : index
    %c0_283 = arith.constant 0 : index
    %790 = vector.load %arg2[%789, %c0_282, %c0_283] : memref<8x2x128xbf16, #tpu.memory_space<vmem>>, vector<1x2x128xbf16>
    %791 = vector.shape_cast %790 : vector<1x2x128xbf16> to vector<2x128xbf16>
    %792 = arith.addi %4, %c7_i32_281 : i32
    %c0_284 = arith.constant 0 : index
    %c0_285 = arith.constant 0 : index
    %793 = vector.load %arg8[%c0_284, %c0_285] : memref<2x32xf32, #tpu.memory_space<vmem>>, vector<2x32xf32>
    %c0_286 = arith.constant 0 : index
    %c0_287 = arith.constant 0 : index
    %794 = vector.load %arg9[%c0_286, %c0_287] : memref<2x32xf32, #tpu.memory_space<vmem>>, vector<2x32xf32>
    %795 = arith.extf %791 : vector<2x128xbf16> to vector<2x128xf32>
    %796 = arith.truncf %793 : vector<2x32xf32> to vector<2x32xbf16>
    %c0_288 = arith.constant 0 : index
    %c0_289 = arith.constant 0 : index
    %797 = vector.load %arg4[%c0_288, %c0_289] : memref<32x128xbf16, #tpu.memory_space<vmem>>, vector<32x128xbf16>
    %cst_290 = arith.constant dense<0.000000e+00> : vector<2x128xf32>
    %798 = tpu.matmul %796, %797, %cst_290 {dimension_numbers = #tpu.dot_dimension_numbers<[1], [0], [0], [1], [0, 0, 1, 1], [], []>} : vector<2x32xbf16>, vector<32x128xbf16>, vector<2x128xf32> -> vector<2x128xf32>
    %799 = arith.addf %795, %798 : vector<2x128xf32>
    %800 = vector.extract_strided_slice %799 {offsets = [0, 0], sizes = [2, 32], strides = [1, 1]} : vector<2x128xf32> to vector<2x32xf32>
    %801 = arith.negf %800 : vector<2x32xf32>
    %802 = math.exp %801 : vector<2x32xf32>
    %cst_291 = arith.constant 1.000000e+00 : f32
    %803 = vector.broadcast %cst_291 : f32 to vector<2x32xf32>
    %804 = arith.addf %803, %802 : vector<2x32xf32>
    %805 = arith.divf %803, %804 : vector<2x32xf32>
    %806 = vector.extract_strided_slice %799 {offsets = [0, 32], sizes = [2, 32], strides = [1, 1]} : vector<2x128xf32> to vector<2x32xf32>
    %807 = arith.negf %806 : vector<2x32xf32>
    %808 = math.exp %807 : vector<2x32xf32>
    %cst_292 = arith.constant 1.000000e+00 : f32
    %809 = vector.broadcast %cst_292 : f32 to vector<2x32xf32>
    %810 = arith.addf %809, %808 : vector<2x32xf32>
    %811 = arith.divf %809, %810 : vector<2x32xf32>
    %812 = vector.extract_strided_slice %799 {offsets = [0, 64], sizes = [2, 32], strides = [1, 1]} : vector<2x128xf32> to vector<2x32xf32>
    %813 = math.tanh %812 : vector<2x32xf32>
    %814 = vector.extract_strided_slice %799 {offsets = [0, 96], sizes = [2, 32], strides = [1, 1]} : vector<2x128xf32> to vector<2x32xf32>
    %815 = arith.negf %814 : vector<2x32xf32>
    %816 = math.exp %815 : vector<2x32xf32>
    %cst_293 = arith.constant 1.000000e+00 : f32
    %817 = vector.broadcast %cst_293 : f32 to vector<2x32xf32>
    %818 = arith.addf %817, %816 : vector<2x32xf32>
    %819 = arith.divf %817, %818 : vector<2x32xf32>
    %820 = arith.mulf %811, %794 : vector<2x32xf32>
    %821 = arith.mulf %805, %813 : vector<2x32xf32>
    %822 = arith.addf %820, %821 : vector<2x32xf32>
    %823 = math.tanh %822 : vector<2x32xf32>
    %824 = arith.mulf %819, %823 : vector<2x32xf32>
    %825 = vector.broadcast %792 : i32 to vector<2x1xi32>
    %826 = arith.cmpi slt, %825, %3 : vector<2x1xi32>
    %827 = vector.shape_cast %826 : vector<2x1xi1> to vector<2x1xi1>
    %828 = vector.broadcast %827 : vector<2x1xi1> to vector<2x32xi1>
    %829 = arith.select %828, %824, %793 : vector<2x32xi1>, vector<2x32xf32>
    %c0_294 = arith.constant 0 : index
    %c0_295 = arith.constant 0 : index
    %830 = vector.load %arg8[%c0_294, %c0_295] : memref<2x32xf32, #tpu.memory_space<vmem>>, vector<2x32xf32>
    tpu.vector_store %arg8[%c0_294, %c0_295], %829 {strides = array<i32>} : memref<2x32xf32, #tpu.memory_space<vmem>>, vector<2x32xf32>,
    %831 = vector.shape_cast %826 : vector<2x1xi1> to vector<2x1xi1>
    %832 = vector.broadcast %831 : vector<2x1xi1> to vector<2x32xi1>
    %833 = arith.select %832, %822, %794 : vector<2x32xi1>, vector<2x32xf32>
    %c0_296 = arith.constant 0 : index
    %c0_297 = arith.constant 0 : index
    %834 = vector.load %arg9[%c0_296, %c0_297] : memref<2x32xf32, #tpu.memory_space<vmem>>, vector<2x32xf32>
    tpu.vector_store %arg9[%c0_296, %c0_297], %833 {strides = array<i32>} : memref<2x32xf32, #tpu.memory_space<vmem>>, vector<2x32xf32>,
    %cst_298 = arith.constant 0.000000e+00 : f32
    %835 = vector.broadcast %cst_298 : f32 to vector<2x32xf32>
    %836 = vector.shape_cast %826 : vector<2x1xi1> to vector<2x1xi1>
    %837 = vector.broadcast %836 : vector<2x1xi1> to vector<2x32xi1>
    %838 = arith.select %837, %824, %835 : vector<2x32xi1>, vector<2x32xf32>
    %839 = arith.truncf %838 : vector<2x32xf32> to vector<2x32xbf16>
    %840 = arith.index_cast %c7_i32_281 : i32 to index
    %c0_299 = arith.constant 0 : index
    %c0_300 = arith.constant 0 : index
    %841 = vector.load %arg6[%840, %c0_299, %c0_300] : memref<8x2x32xbf16, #tpu.memory_space<vmem>>, vector<1x2x32xbf16>
    %842 = vector.shape_cast %841 : vector<1x2x32xbf16> to vector<2x32xbf16>
    %843 = vector.shape_cast %839 : vector<2x32xbf16> to vector<1x2x32xbf16>
    tpu.vector_store %arg6[%840, %c0_299, %c0_300], %843 {strides = array<i32>} : memref<8x2x32xbf16, #tpu.memory_space<vmem>>, vector<1x2x32xbf16>,
    %c7_i32_301 = arith.constant 7 : i32
    %844 = arith.subi %c7_i32_301, %c7_i32_281 : i32
    %845 = arith.index_cast %844 : i32 to index
    %c0_302 = arith.constant 0 : index
    %c0_303 = arith.constant 0 : index
    %846 = vector.load %arg3[%845, %c0_302, %c0_303] : memref<8x2x128xbf16, #tpu.memory_space<vmem>>, vector<1x2x128xbf16>
    %847 = vector.shape_cast %846 : vector<1x2x128xbf16> to vector<2x128xbf16>
    %848 = arith.addi %4, %c7_i32_281 : i32
    %c7_i32_304 = arith.constant 7 : i32
    %849 = arith.subi %c7_i32_304, %848 : i32
    %c0_305 = arith.constant 0 : index
    %c0_306 = arith.constant 0 : index
    %850 = vector.load %arg10[%c0_305, %c0_306] : memref<2x32xf32, #tpu.memory_space<vmem>>, vector<2x32xf32>
    %c0_307 = arith.constant 0 : index
    %c0_308 = arith.constant 0 : index
    %851 = vector.load %arg11[%c0_307, %c0_308] : memref<2x32xf32, #tpu.memory_space<vmem>>, vector<2x32xf32>
    %852 = arith.extf %847 : vector<2x128xbf16> to vector<2x128xf32>
    %853 = arith.truncf %850 : vector<2x32xf32> to vector<2x32xbf16>
    %c0_309 = arith.constant 0 : index
    %c0_310 = arith.constant 0 : index
    %854 = vector.load %arg5[%c0_309, %c0_310] : memref<32x128xbf16, #tpu.memory_space<vmem>>, vector<32x128xbf16>
    %cst_311 = arith.constant dense<0.000000e+00> : vector<2x128xf32>
    %855 = tpu.matmul %853, %854, %cst_311 {dimension_numbers = #tpu.dot_dimension_numbers<[1], [0], [0], [1], [0, 0, 1, 1], [], []>} : vector<2x32xbf16>, vector<32x128xbf16>, vector<2x128xf32> -> vector<2x128xf32>
    %856 = arith.addf %852, %855 : vector<2x128xf32>
    %857 = vector.extract_strided_slice %856 {offsets = [0, 0], sizes = [2, 32], strides = [1, 1]} : vector<2x128xf32> to vector<2x32xf32>
    %858 = arith.negf %857 : vector<2x32xf32>
    %859 = math.exp %858 : vector<2x32xf32>
    %cst_312 = arith.constant 1.000000e+00 : f32
    %860 = vector.broadcast %cst_312 : f32 to vector<2x32xf32>
    %861 = arith.addf %860, %859 : vector<2x32xf32>
    %862 = arith.divf %860, %861 : vector<2x32xf32>
    %863 = vector.extract_strided_slice %856 {offsets = [0, 32], sizes = [2, 32], strides = [1, 1]} : vector<2x128xf32> to vector<2x32xf32>
    %864 = arith.negf %863 : vector<2x32xf32>
    %865 = math.exp %864 : vector<2x32xf32>
    %cst_313 = arith.constant 1.000000e+00 : f32
    %866 = vector.broadcast %cst_313 : f32 to vector<2x32xf32>
    %867 = arith.addf %866, %865 : vector<2x32xf32>
    %868 = arith.divf %866, %867 : vector<2x32xf32>
    %869 = vector.extract_strided_slice %856 {offsets = [0, 64], sizes = [2, 32], strides = [1, 1]} : vector<2x128xf32> to vector<2x32xf32>
    %870 = math.tanh %869 : vector<2x32xf32>
    %871 = vector.extract_strided_slice %856 {offsets = [0, 96], sizes = [2, 32], strides = [1, 1]} : vector<2x128xf32> to vector<2x32xf32>
    %872 = arith.negf %871 : vector<2x32xf32>
    %873 = math.exp %872 : vector<2x32xf32>
    %cst_314 = arith.constant 1.000000e+00 : f32
    %874 = vector.broadcast %cst_314 : f32 to vector<2x32xf32>
    %875 = arith.addf %874, %873 : vector<2x32xf32>
    %876 = arith.divf %874, %875 : vector<2x32xf32>
    %877 = arith.mulf %868, %851 : vector<2x32xf32>
    %878 = arith.mulf %862, %870 : vector<2x32xf32>
    %879 = arith.addf %877, %878 : vector<2x32xf32>
    %880 = math.tanh %879 : vector<2x32xf32>
    %881 = arith.mulf %876, %880 : vector<2x32xf32>
    %882 = vector.broadcast %849 : i32 to vector<2x1xi32>
    %883 = arith.cmpi slt, %882, %3 : vector<2x1xi32>
    %884 = vector.shape_cast %883 : vector<2x1xi1> to vector<2x1xi1>
    %885 = vector.broadcast %884 : vector<2x1xi1> to vector<2x32xi1>
    %886 = arith.select %885, %881, %850 : vector<2x32xi1>, vector<2x32xf32>
    %c0_315 = arith.constant 0 : index
    %c0_316 = arith.constant 0 : index
    %887 = vector.load %arg10[%c0_315, %c0_316] : memref<2x32xf32, #tpu.memory_space<vmem>>, vector<2x32xf32>
    tpu.vector_store %arg10[%c0_315, %c0_316], %886 {strides = array<i32>} : memref<2x32xf32, #tpu.memory_space<vmem>>, vector<2x32xf32>,
    %888 = vector.shape_cast %883 : vector<2x1xi1> to vector<2x1xi1>
    %889 = vector.broadcast %888 : vector<2x1xi1> to vector<2x32xi1>
    %890 = arith.select %889, %879, %851 : vector<2x32xi1>, vector<2x32xf32>
    %c0_317 = arith.constant 0 : index
    %c0_318 = arith.constant 0 : index
    %891 = vector.load %arg11[%c0_317, %c0_318] : memref<2x32xf32, #tpu.memory_space<vmem>>, vector<2x32xf32>
    tpu.vector_store %arg11[%c0_317, %c0_318], %890 {strides = array<i32>} : memref<2x32xf32, #tpu.memory_space<vmem>>, vector<2x32xf32>,
    %cst_319 = arith.constant 0.000000e+00 : f32
    %892 = vector.broadcast %cst_319 : f32 to vector<2x32xf32>
    %893 = vector.shape_cast %883 : vector<2x1xi1> to vector<2x1xi1>
    %894 = vector.broadcast %893 : vector<2x1xi1> to vector<2x32xi1>
    %895 = arith.select %894, %881, %892 : vector<2x32xi1>, vector<2x32xf32>
    %896 = arith.truncf %895 : vector<2x32xf32> to vector<2x32xbf16>
    %897 = arith.index_cast %844 : i32 to index
    %c0_320 = arith.constant 0 : index
    %c0_321 = arith.constant 0 : index
    %898 = vector.load %arg7[%897, %c0_320, %c0_321] : memref<8x2x32xbf16, #tpu.memory_space<vmem>>, vector<1x2x32xbf16>
    %899 = vector.shape_cast %898 : vector<1x2x32xbf16> to vector<2x32xbf16>
    %900 = vector.shape_cast %896 : vector<2x32xbf16> to vector<1x2x32xbf16>
    tpu.vector_store %arg7[%897, %c0_320, %c0_321], %900 {strides = array<i32>} : memref<8x2x32xbf16, #tpu.memory_space<vmem>>, vector<1x2x32xbf16>,
    %c8_i32_322 = arith.constant 8 : i32
    return
  }
  func.func @transform_0(%arg0: i32) -> (i32, i32) {
    %c0_i32 = arith.constant 0 : i32
    %c0_i32_0 = arith.constant 0 : i32
    %c0_i32_1 = arith.constant 0 : i32
    return %c0_i32, %c0_i32_0 : i32, i32
  }
  func.func @transform_1(%arg0: i32) -> (i32, i32, i32) {
    %c0_i32 = arith.constant 0 : i32
    %c0_i32_0 = arith.constant 0 : i32
    %c0_i32_1 = arith.constant 0 : i32
    return %arg0, %c0_i32, %c0_i32_0 : i32, i32, i32
  }
  func.func @transform_2(%arg0: i32) -> (i32, i32, i32) {
    %c0_i32 = arith.constant 0 : i32
    %0 = arith.subi %c0_i32, %arg0 : i32
    %c0_i32_0 = arith.constant 0 : i32
    %c1_i32 = arith.constant 1 : i32
    %c0_i32_1 = arith.constant 0 : i32
    return %0, %c0_i32_0, %c1_i32 : i32, i32, i32
  }
  func.func @transform_3(%arg0: i32) -> (i32, i32) {
    %c0_i32 = arith.constant 0 : i32
    %c0_i32_0 = arith.constant 0 : i32
    %c0_i32_1 = arith.constant 0 : i32
    return %c0_i32, %c0_i32_0 : i32, i32
  }
  func.func @transform_4(%arg0: i32) -> (i32, i32) {
    %c0_i32 = arith.constant 0 : i32
    %c0_i32_0 = arith.constant 0 : i32
    %c0_i32_1 = arith.constant 0 : i32
    return %c0_i32, %c0_i32_0 : i32, i32
  }
  func.func @transform_5(%arg0: i32) -> (i32, i32, i32) {
    %c0_i32 = arith.constant 0 : i32
    %c0_i32_0 = arith.constant 0 : i32
    %c0_i32_1 = arith.constant 0 : i32
    return %arg0, %c0_i32, %c0_i32_0 : i32, i32, i32
  }
  func.func @transform_6(%arg0: i32) -> (i32, i32, i32) {
    %c0_i32 = arith.constant 0 : i32
    %0 = arith.subi %c0_i32, %arg0 : i32
    %c0_i32_0 = arith.constant 0 : i32
    %c0_i32_1 = arith.constant 0 : i32
    %c0_i32_2 = arith.constant 0 : i32
    return %0, %c0_i32_0, %c0_i32_1 : i32, i32, i32
  }
}

module attributes {stable_mosaic.version = 11 : i64} {
  func.func @_dense2_kernel(%arg0: i32, %arg1: i32, %arg2: memref<16x32xbf16, #tpu.memory_space<vmem>>, %arg3: memref<16x32xbf16, #tpu.memory_space<vmem>>, %arg4: memref<32x128xbf16, #tpu.memory_space<vmem>>, %arg5: memref<32x128xbf16, #tpu.memory_space<vmem>>, %arg6: memref<1x128xf32, #tpu.memory_space<vmem>>, %arg7: memref<16x128xf32, #tpu.memory_space<vmem>>) attributes {dimension_semantics = [#tpu.dimension_semantics<parallel>, #tpu.dimension_semantics<parallel>], iteration_bounds = array<i64: 1, 1>, scalar_prefetch = 0 : i64, scratch_operands = 0 : i64, tpu.core_type = #tpu.core_type<tc>, window_params = [{transform_indices = @transform_0, window_bounds = array<i64: 16, 32>}, {transform_indices = @transform_1, window_bounds = array<i64: 16, 32>}, {pipeline_mode = #tpu.pipeline_mode<synchronous>, transform_indices = @transform_2, window_bounds = array<i64: 32, 128>}, {pipeline_mode = #tpu.pipeline_mode<synchronous>, transform_indices = @transform_3, window_bounds = array<i64: 32, 128>}, {pipeline_mode = #tpu.pipeline_mode<synchronous>, transform_indices = @transform_4, window_bounds = array<i64: 1, 128>}, {transform_indices = @transform_5, window_bounds = array<i64: 16, 128>}]} {
    %c0 = arith.constant 0 : index
    %c0_0 = arith.constant 0 : index
    %0 = vector.load %arg2[%c0, %c0_0] : memref<16x32xbf16, #tpu.memory_space<vmem>>, vector<16x32xbf16>
    %c0_1 = arith.constant 0 : index
    %c0_2 = arith.constant 0 : index
    %1 = vector.load %arg4[%c0_1, %c0_2] : memref<32x128xbf16, #tpu.memory_space<vmem>>, vector<32x128xbf16>
    %cst = arith.constant dense<0.000000e+00> : vector<16x128xf32>
    %2 = tpu.matmul %0, %1, %cst {dimension_numbers = #tpu.dot_dimension_numbers<[1], [0], [0], [1], [0, 0, 1, 1], [], []>} : vector<16x32xbf16>, vector<32x128xbf16>, vector<16x128xf32> -> vector<16x128xf32>
    %c0_3 = arith.constant 0 : index
    %c0_4 = arith.constant 0 : index
    %3 = vector.load %arg3[%c0_3, %c0_4] : memref<16x32xbf16, #tpu.memory_space<vmem>>, vector<16x32xbf16>
    %c0_5 = arith.constant 0 : index
    %c0_6 = arith.constant 0 : index
    %4 = vector.load %arg5[%c0_5, %c0_6] : memref<32x128xbf16, #tpu.memory_space<vmem>>, vector<32x128xbf16>
    %cst_7 = arith.constant dense<0.000000e+00> : vector<16x128xf32>
    %5 = tpu.matmul %3, %4, %cst_7 {dimension_numbers = #tpu.dot_dimension_numbers<[1], [0], [0], [1], [0, 0, 1, 1], [], []>} : vector<16x32xbf16>, vector<32x128xbf16>, vector<16x128xf32> -> vector<16x128xf32>
    %6 = arith.addf %2, %5 : vector<16x128xf32>
    %c0_8 = arith.constant 0 : index
    %c0_9 = arith.constant 0 : index
    %7 = vector.load %arg6[%c0_8, %c0_9] : memref<1x128xf32, #tpu.memory_space<vmem>>, vector<1x128xf32>
    %8 = vector.broadcast %7 : vector<1x128xf32> to vector<16x128xf32>
    %9 = arith.addf %6, %8 : vector<16x128xf32>
    %c0_10 = arith.constant 0 : index
    %c0_11 = arith.constant 0 : index
    %10 = vector.load %arg7[%c0_10, %c0_11] : memref<16x128xf32, #tpu.memory_space<vmem>>, vector<16x128xf32>
    tpu.vector_store %arg7[%c0_10, %c0_11], %9 {strides = array<i32>} : memref<16x128xf32, #tpu.memory_space<vmem>>, vector<16x128xf32>,
    return
  }
  func.func @transform_0(%arg0: i32, %arg1: i32) -> (i32, i32) {
    %c0_i32 = arith.constant 0 : i32
    %c0_i32_0 = arith.constant 0 : i32
    return %arg0, %c0_i32 : i32, i32
  }
  func.func @transform_1(%arg0: i32, %arg1: i32) -> (i32, i32) {
    %c0_i32 = arith.constant 0 : i32
    %c0_i32_0 = arith.constant 0 : i32
    return %arg0, %c0_i32 : i32, i32
  }
  func.func @transform_2(%arg0: i32, %arg1: i32) -> (i32, i32) {
    %c0_i32 = arith.constant 0 : i32
    %c0_i32_0 = arith.constant 0 : i32
    %c0_i32_1 = arith.constant 0 : i32
    return %c0_i32, %c0_i32_0 : i32, i32
  }
  func.func @transform_3(%arg0: i32, %arg1: i32) -> (i32, i32) {
    %c0_i32 = arith.constant 0 : i32
    %c0_i32_0 = arith.constant 0 : i32
    %c0_i32_1 = arith.constant 0 : i32
    return %c0_i32, %c0_i32_0 : i32, i32
  }
  func.func @transform_4(%arg0: i32, %arg1: i32) -> (i32, i32) {
    %c0_i32 = arith.constant 0 : i32
    %c0_i32_0 = arith.constant 0 : i32
    %c0_i32_1 = arith.constant 0 : i32
    return %c0_i32, %c0_i32_0 : i32, i32
  }
  func.func @transform_5(%arg0: i32, %arg1: i32) -> (i32, i32) {
    %c0_i32 = arith.constant 0 : i32
    return %arg0, %arg1 : i32, i32
  }
}

</mosaic_0001>

<bundles_post_ra>
// kernel: bilstm_seq_label_forward.6
= control target key start
LH: loop header
LB: loop body
LE: loop exit
PB: predicated region body
PF: predicated region fallthrough
CT: control target
= control target key end

     0   :  { %8 = vsyncpa [#allocation3], 0  ;;  %s700_s0 = inlined_call_operand.hbm [shape: bf16[16,64], index: 0, kind: input, shape index: {}]   ;;  %s701_s1 = inlined_call_operand.hbm [shape: bf16[24,16], index: 1, kind: input, shape index: {}]   ;;  %s702_s2 = inlined_call_operand.hbm [shape: f32[1,16], index: 2, kind: input, shape index: {}]   ;;  %s703_s3 = inlined_call_operand.hbm [shape: bf16[16,16], index: 3, kind: output, shape index: {}]  }
   0x1   :  { %9 = vsyncpa [#allocation6], 0 }
   0x2   :  { %10 = vsyncpa [#allocation4], 0  ;;  %s591_s12 = smov [#allocation5]   ;;  %s592_s14 = smov [#allocation2]  }
   0x3   :  { %s28_s13 = sshll.u32 %s591_s12, 4  ;;  %s16_s15 = sshll.u32 %s592_s14, 4  ;;  %s29_s13 = int_to_ptr.vmem [resolvable:$true] %s28_s13  ;;  %s624_s15 = int_to_ptr.vmem [resolvable:$true] %s16_s15 }
   0x4   :  { %s497_s18 = scalar_lea.hbm %s701_s1, 192 }
   0x5   :  { %p498_p0 = scmp.ne.s32.totalorder %s701_s1, %s497_s18  ;;  %p501_p1 = scmp.lt.u32.totalorder %s497_s18, %s701_s1 }
   0x7   :  { %p503_p2 = pnand %p501_p1, %p498_p0 }
   0x9   :  { %506 = shalt.err (!%p503_p2)
}
   0xa   :  { %s507_s23 = scalar_lea.vmem %s29_s13, 192  ;;  %p512_p4 = scmp.lt.s32.totalorder %s29_s13, %s29_s13 }
   0xb   :  { %p508_p3 = scmp.ne.s32.totalorder %s29_s13, %s507_s23  ;;  %p513_p5 = scmp.lt.s32.totalorder %s507_s23, %s507_s23 }
   0xd   :  { %p514_p6 = por %p513_p5, %p512_p4 }
   0xf   :  { %p515_p7 = pnand %p514_p6, %p508_p3 }
  0x11   :  { %518 = shalt.err (!%p515_p7)
}
  0x12   :  { %s593_s24 = smov 64   ;;  %s594_s25 = smov 4  }
  0x13   :  { %34 = dma.hbm_to_vmem [thread:$0]  %s701_s1, 192, %s29_s13, [#allocation6], %s593_s24, %s593_s24, %s594_s25  }
  0x14   :  { %s519_s30 = scalar_lea.hbm %s700_s0, 128 }
  0x15   :  { %p520_p8 = scmp.ne.s32.totalorder %s700_s0, %s519_s30  ;;  %p523_p9 = scmp.lt.u32.totalorder %s519_s30, %s700_s0 }
  0x17   :  { %p525_p10 = pnand %p523_p9, %p520_p8 }
  0x19   :  { %528 = shalt.err (!%p525_p10)
}
  0x1a   :  { %s529_s8 = scalar_lea.vmem %s624_s15, 128  ;;  %p534_p12 = scmp.lt.s32.totalorder %s624_s15, %s624_s15 }
  0x1b   :  { %p530_p11 = scmp.ne.s32.totalorder %s624_s15, %s529_s8  ;;  %p535_p13 = scmp.lt.s32.totalorder %s529_s8, %s529_s8 }
  0x1d   :  { %p536_p0 = por %p535_p13, %p534_p12 }
  0x1f   :  { %p537_p1 = pnand %p536_p0, %p530_p11 }
  0x21   :  { %540 = shalt.err (!%p537_p1)
}
  0x22   :  { %22 = dma.hbm_to_vmem [thread:$0]  %s700_s0, 128, %s624_s15, [#allocation3], %s593_s24, %s593_s24, %s594_s25  }
  0x23   :  { %s595_s10 = smov [#allocation7]   ;;  %s541_s14 = scalar_lea.hbm %s702_s2, 16 }
  0x24   :  { %s41_s11 = sshll.u32 %s595_s10, 4  ;;  %p542_p2 = scmp.ne.s32.totalorder %s702_s2, %s541_s14  ;;  %s42_s11 = int_to_ptr.vmem [resolvable:$true] %s41_s11 }
  0x25   :  { %p545_p3 = scmp.lt.u32.totalorder %s541_s14, %s702_s2 }
  0x27   :  { %p547_p4 = pnand %p545_p3, %p542_p2 }
  0x29   :  { %550 = shalt.err (!%p547_p4)
}
  0x2a   :  { %s551_s20 = scalar_lea.vmem %s42_s11, 16  ;;  %s555_s0 = scalar_lea.vmem %s42_s11, 32 }
  0x2b   :  { %p552_p5 = scmp.ne.s32.totalorder %s42_s11, %s551_s20  ;;  %p556_p6 = scmp.lt.s32.totalorder %s42_s11, %s42_s11 }
  0x2c   :  { %p557_p7 = scmp.lt.s32.totalorder %s555_s0, %s551_s20 }
  0x2e   :  { %p558_p8 = por %p557_p7, %p556_p6 }
  0x30   :  { %p559_p9 = pnand %p558_p8, %p552_p5 }
  0x32   :  { %562 = shalt.err (!%p559_p9)
}
  0x33   :  { %44 = dma.hbm_to_vmem [thread:$0]  %s702_s2, 16, %s42_s11, [#allocation6]  }
  0x34   :  { %585 = dma.done.wait [#allocation3], 128  }
  0x35   :  { %586 = vsyncadd [#allocation3], 4294967168 }
  0x36   :  { %587 = dma.done.wait [#allocation6], 208  }
  0x37   :  { %588 = vsyncadd [#allocation6], 4294967088  ;;  %v596_v0 = vmov 0.0   ;;  %vm597_vm0 = vmmov 0   ;;  %v494_v1 = vld [vmem:[#allocation2] sm:$0xff]   ;;  %v495_v2 = vld [vmem:[#allocation5] sm:$0xff]  }
  0x38   :  { %433 = vmatprep.subr.bf16.mxu0 %v596_v0  ;;  %441 = vmatprep.subr.bf16.mxu1 %v596_v0  ;;  %vm78_vm1 = vcmask 1043456   ;;  %s598_s22 = smov 120   ;;  %s599_s23 = smov 104   ;;  %v496_v3 = vld [vmem:[#allocation5 + $0x8] ss:$0 sps:$4 sm:$0xff]   ;;  %vm74_vm2 = vcmask 195584  }
  0x39   :  { %437 = vmatprep.mubr.msk.bf16.mxu0 %vm597_vm0, %v596_v0  ;;  %445 = vmatprep.mubr.msk.bf16.mxu1 %vm597_vm0, %v596_v0  ;;  %v80_v4 = vsel %vm78_vm1, %v496_v3, 0  ;;  %s600_s2 = smov 112   ;;  %s601_s26 = smov 96   ;;  %v410_v39 = vld [vmem:[#allocation7] ss:$0 sm:$0xff]  ;;  %vm380_vm3 = vcmask 125952  }
  0x3a   :  { %123 = vrot.lane.b32.xlu0 %v494_v1, %s598_s22  ;;  %219 = vrot.lane.b32.xlu1 %v494_v1, %s599_s23  ;;  %s602_s27 = smov 88   ;;  %s603_s28 = smov [#allocation8]  }
  0x3b   :  { %434 = vmatpush3.bf16.msra.mxu0 %v495_v2  ;;  %442 = vmatpush3.bf16.msra.mxu1 %v495_v2  ;;  %s388_s29 = sshll.u32 %s603_s28, 4  ;;  %s389_s29 = int_to_ptr.vmem [resolvable:$true] %s388_s29 }
  0x3c   :  { %435 = vmatprep.subr.bf16.mxu0 %v596_v0  ;;  %443 = vmatprep.subr.bf16.mxu1 %v596_v0  ;;  %s563_s30 = scalar_lea.vmem %s389_s29, 128  ;;  %p568_p11 = scmp.lt.s32.totalorder %s389_s29, %s389_s29 }
  0x3d   :  { %p564_p10 = scmp.ne.s32.totalorder %s389_s29, %s563_s30  ;;  %p569_p12 = scmp.lt.s32.totalorder %s563_s30, %s563_s30 }
  0x3e   :  { %171 = vrot.lane.b32.xlu0 %v494_v1, %s600_s2  ;;  %267 = vrot.lane.b32.xlu1 %v494_v1, %s601_s26 }
  0x3f   :  { %436 = vmatpush3.bf16.msra.mxu0 %v80_v4  ;;  %444 = vmatpush3.bf16.msra.mxu1 %v80_v4  ;;  %p570_p13 = por %p569_p12, %p568_p11 }
  0x40   :  { %449 = vmatprep.subr.bf16.mxu0 %v596_v0  ;;  %457 = vmatprep.subr.bf16.mxu1 %v596_v0 }
  0x41   :  { %p571_p0 = pnand %p570_p13, %p564_p10 }
  0x42   :  { %315 = vrot.lane.b32.xlu0 %v494_v1, %s602_s27  ;;  %438 = vmatmul.mubr.msk.bf16.vlgmr.msra.gmra.mrb[0].mxu0 %vm74_vm2, %v494_v1 }
  0x43   :  { %450 = vmatpush3.bf16.msra.mxu0 %v495_v2  ;;  %453 = vmatprep.mubr.msk.bf16.mxu0 %vm597_vm0, %v596_v0 }
  0x44   :  { %451 = vmatprep.subr.bf16.mxu0 %v596_v0 }
  0x47   :  { %452 = vmatpush3.bf16.msra.mxu0 %v80_v4 }
  0x48   :  { %465 = vmatprep.subr.bf16.mxu0 %v596_v0 }
  0xac   :  { %v124_v5 = vpop.permute.xlu0 %123  ;;  %v220_v7 = vpop.permute.xlu1 %219 }
  0xad   :  { %446 = vmatmul.mubr.msk.bf16.vlgmr.msra.gmra.mrb[0].mxu1 %vm74_vm2, %v124_v5 }
  0xae   :  { %458 = vmatpush3.bf16.msra.mxu1 %v495_v2  ;;  %461 = vmatprep.mubr.msk.bf16.mxu1 %vm597_vm0, %v596_v0 }
  0xaf   :  { %459 = vmatprep.subr.bf16.mxu1 %v596_v0 }
  0xb0   :  { %v172_v6 = vpop.permute.xlu0 %171  ;;  %v268_v8 = vpop.permute.xlu1 %267 }
  0xb1   :  { %454 = vmatmul.mubr.msk.bf16.vlgmr.msra.gmra.mrb[4].mxu0 %vm74_vm2, %v172_v6 }
  0xb2   :  { %460 = vmatpush3.bf16.msra.mxu1 %v80_v4  ;;  %466 = vmatpush3.bf16.msra.mxu0 %v495_v2 }
  0xb3   :  { %473 = vmatprep.subr.bf16.mxu1 %v596_v0  ;;  %467 = vmatprep.subr.bf16.mxu0 %v596_v0 }
  0xb4   :  { %469 = vmatprep.mubr.msk.bf16.mxu0 %vm597_vm0, %v596_v0  ;;  %v316_v9 = vpop.permute.xlu0 %315 }
  0xb5   :  { %462 = vmatmul.mubr.msk.bf16.vlgmr.msra.gmra.mrb[4].mxu1 %vm74_vm2, %v220_v7 }
  0xb6   :  { %474 = vmatpush3.bf16.msra.mxu1 %v495_v2  ;;  %468 = vmatpush3.bf16.msra.mxu0 %v80_v4 }
  0xb7   :  { %475 = vmatprep.subr.bf16.mxu1 %v596_v0  ;;  %477 = vmatprep.mubr.msk.bf16.mxu1 %vm597_vm0, %v596_v0 }
  0xb9   :  { %470 = vmatmul.mubr.msk.bf16.vlgmr.msra.gmra.mrb[8].mxu0 %vm74_vm2, %v268_v8 }
  0xba   :  { %476 = vmatpush3.bf16.msra.mxu1 %v80_v4 }
  0xbd   :  { %478 = vmatmul.mubr.msk.bf16.vlgmr.msra.gmra.mrb[8].mxu1 %vm74_vm2, %v316_v9 }
 0x115   :  { %v116_v10 = vpop.f32.mrb[0].mxu0 }
 0x116   :  { %v439_v11 = vpop.f32.mrb[1].mxu0 }
 0x117   :  { %v119_v12 = vpop.f32.mrb[2].mxu0 }
 0x118   :  { %v440_v13 = vpop.f32.mrb[3].mxu0 }
 0x180   :  { %v162_v14 = vpop.f32.mrb[0].mxu1 }
 0x181   :  { %v169_v15 = vmax.f32 %v116_v10, %v162_v14  ;;  %v447_v16 = vpop.f32.mrb[1].mxu1 }
 0x182   :  { %v165_v17 = vpop.f32.mrb[2].mxu1 }
 0x183   :  { %v170_v18 = vmax.f32 %v119_v12, %v165_v17  ;;  %v448_v19 = vpop.f32.mrb[3].mxu1 }
 0x184   :  { %v210_v20 = vpop.f32.mrb[4].mxu0 }
 0x185   :  { %v217_v21 = vmax.f32 %v169_v15, %v210_v20  ;;  %v455_v22 = vpop.f32.mrb[5].mxu0 }
 0x186   :  { %v213_v23 = vpop.f32.mrb[6].mxu0 }
 0x187   :  { %v218_v24 = vmax.f32 %v170_v18, %v213_v23  ;;  %v456_v25 = vpop.f32.mrb[7].mxu0 }
 0x188   :  { %v258_v26 = vpop.f32.mrb[4].mxu1 }
 0x189   :  { %v265_v27 = vmax.f32 %v217_v21, %v258_v26  ;;  %v463_v28 = vpop.f32.mrb[5].mxu1 }
 0x18a   :  { %v261_v29 = vpop.f32.mrb[6].mxu1 }
 0x18b   :  { %v266_v30 = vmax.f32 %v218_v24, %v261_v29  ;;  %v464_v31 = vpop.f32.mrb[7].mxu1 }
 0x18c   :  { %v306_v32 = vpop.f32.mrb[8].mxu0 }
 0x18d   :  { %v313_v33 = vmax.f32 %v265_v27, %v306_v32  ;;  %v471_v34 = vpop.f32.mrb[9].mxu0 }
 0x18e   :  { %v309_v35 = vpop.f32.mrb[10].mxu0 }
 0x18f   :  { %v314_v36 = vmax.f32 %v266_v30, %v309_v35  ;;  %v472_v37 = vpop.f32.mrb[11].mxu0 }
 0x190   :  { %v354_v38 = vpop.f32.mrb[8].mxu1 }
 0x191   :  { %v361_v40 = vmax.f32 %v313_v33, %v354_v38  ;;  %v479_v41 = vpop.f32.mrb[9].mxu1 }
 0x192   :  { %v357_v42 = vpop.f32.mrb[10].mxu1 }
 0x193   :  { %v370_v43 = vadd.f32 %v410_v39, %v361_v40  ;;  %v362_v44 = vmax.f32 %v314_v36, %v357_v42  ;;  %v480_v45 = vpop.f32.mrb[11].mxu1 }
 0x195   :  { %v413_v46 = vpack.c.bf16 %v370_v43, %v370_v43  ;;  %v371_v47 = vadd.f32 %v410_v39, %v362_v44 }
 0x197   :  { %v414_v48 = vpack.c.bf16 %v371_v47, %v371_v47  ;;  %381 = vst.msk [vmem:[#allocation8] sm:$0xf] %vm380_vm3, %v413_v46 }
 0x199   :  { %382 = vst.msk [vmem:[#allocation8 + $0x4] sm:$0xf] %vm380_vm3, %v414_v48 }
 0x19a   :  { %574 = shalt.err (!%p571_p0)
}
 0x19b   :  { %s575_s6 = scalar_lea.hbm %s703_s3, 128 }
 0x19c   :  { %p576_p1 = scmp.ne.s32.totalorder %s703_s3, %s575_s6  ;;  %p579_p2 = scmp.lt.u32.totalorder %s575_s6, %s703_s3 }
 0x19e   :  { %p581_p3 = pnand %p579_p2, %p576_p1 }
 0x1a0   :  { %584 = shalt.err (!%p581_p3)
}
 0x1a1   :  { %394 = dma.vmem_to_hbm [thread:$0]  %s389_s29, 128, %s703_s3, [#allocation4], %s593_s24, %s593_s24, %s594_s25  }
 0x1a2   :  { %589 = dma.done.wait [#allocation4], 128  }
 0x1a3   :  { %590 = vsyncadd [#allocation4], 4294967168 }
 0x1a4   :  { %398 = vsyncpa [#allocation3], 1 }
 0x1a5   :  { %399 = vsyncpa [#allocation6], 1 }
 0x1a6   :  { %400 = vsyncpa [#allocation4], 1 }

// kernel: bilstm_seq_label_forward.7
= control target key start
LH: loop header
LB: loop body
LE: loop exit
PB: predicated region body
PF: predicated region fallthrough
CT: control target
= control target key end

     0   :  { %10 = vsyncpa [#allocation3], 0  ;;  %s571_s0 = inlined_call_operand.hbm [shape: bf16[16,16], index: 0, kind: input, shape index: {}]   ;;  %s572_s1 = inlined_call_operand.hbm [shape: bf16[16,16], index: 1, kind: input, shape index: {}]   ;;  %s573_s2 = inlined_call_operand.hbm [shape: bf16[16,256], index: 2, kind: input, shape index: {}]   ;;  %s574_s3 = inlined_call_operand.hbm [shape: bf16[16,256], index: 3, kind: input, shape index: {}]   ;;  %s575_s4 = inlined_call_operand.hbm [shape: f32[1,256], index: 4, kind: input, shape index: {}]   ;;  %s576_s5 = inlined_call_operand.hbm [shape: bf16[16,256], index: 5, kind: output, shape index: {}]  }
   0x1   :  { %11 = vsyncpa [#allocation6], 0 }
   0x2   :  { %12 = vsyncpa [#allocation9], 0 }
   0x3   :  { %13 = vsyncpa [#allocation4], 0  ;;  %s443_s18 = smov [#allocation5]   ;;  %s303_s22 = scalar_lea.hbm %s572_s1, 128 }
   0x4   :  { %s31_s19 = sshll.u32 %s443_s18, 4  ;;  %p304_p0 = scmp.ne.s32.totalorder %s572_s1, %s303_s22  ;;  %s32_s19 = int_to_ptr.vmem [resolvable:$true] %s31_s19 }
   0x5   :  { %p307_p1 = scmp.lt.u32.totalorder %s303_s22, %s572_s1 }
   0x7   :  { %p309_p2 = pnand %p307_p1, %p304_p0 }
   0x9   :  { %312 = shalt.err (!%p309_p2)
}
   0xa   :  { %s313_s27 = scalar_lea.vmem %s32_s19, 128  ;;  %p318_p4 = scmp.lt.s32.totalorder %s32_s19, %s32_s19 }
   0xb   :  { %p314_p3 = scmp.ne.s32.totalorder %s32_s19, %s313_s27  ;;  %p319_p5 = scmp.lt.s32.totalorder %s313_s27, %s313_s27 }
   0xd   :  { %p320_p6 = por %p319_p5, %p318_p4 }
   0xf   :  { %p321_p7 = pnand %p320_p6, %p314_p3 }
  0x11   :  { %324 = shalt.err (!%p321_p7)
}
  0x12   :  { %s444_s28 = smov 64   ;;  %s445_s29 = smov 4  }
  0x13   :  { %37 = dma.hbm_to_vmem [thread:$0]  %s572_s1, 128, %s32_s19, [#allocation6], %s444_s28, %s444_s28, %s445_s29  }
  0x14   :  { %s446_s7 = smov [#allocation8]   ;;  %s447_s9 = smov [#allocation2]  }
  0x15   :  { %s55_s8 = sshll.u32 %s446_s7, 4  ;;  %s19_s10 = sshll.u32 %s447_s9, 4  ;;  %s56_s8 = int_to_ptr.vmem [resolvable:$true] %s55_s8  ;;  %s20_s10 = int_to_ptr.vmem [resolvable:$true] %s19_s10 }
  0x16   :  { %s325_s13 = scalar_lea.hbm %s574_s3, 256 }
  0x17   :  { %p326_p8 = scmp.ne.s32.totalorder %s574_s3, %s325_s13  ;;  %p329_p9 = scmp.lt.u32.totalorder %s325_s13, %s574_s3 }
  0x19   :  { %p331_p10 = pnand %p329_p9, %p326_p8 }
  0x1b   :  { %334 = shalt.err (!%p331_p10)
}
  0x1c   :  { %s335_s1 = scalar_lea.vmem %s56_s8, 256  ;;  %p340_p12 = scmp.lt.s32.totalorder %s56_s8, %s56_s8 }
  0x1d   :  { %p336_p11 = scmp.ne.s32.totalorder %s56_s8, %s335_s1  ;;  %p341_p13 = scmp.lt.s32.totalorder %s335_s1, %s335_s1 }
  0x1f   :  { %p342_p0 = por %p341_p13, %p340_p12 }
  0x21   :  { %p343_p1 = pnand %p342_p0, %p336_p11 }
  0x23   :  { %346 = shalt.err (!%p343_p1)
}
  0x24   :  { %s448_s18 = smov 128   ;;  %s449_s19 = smov 8  }
  0x25   :  { %61 = dma.hbm_to_vmem [thread:$0]  %s574_s3, 256, %s56_s8, [#allocation9], %s448_s18, %s448_s18, %s449_s19  }
  0x26   :  { %s347_s24 = scalar_lea.hbm %s571_s0, 128 }
  0x27   :  { %p348_p2 = scmp.ne.s32.totalorder %s571_s0, %s347_s24  ;;  %p351_p3 = scmp.lt.u32.totalorder %s347_s24, %s571_s0 }
  0x29   :  { %p353_p4 = pnand %p351_p3, %p348_p2 }
  0x2b   :  { %356 = shalt.err (!%p353_p4)
}
  0x2c   :  { %s357_s6 = scalar_lea.vmem %s20_s10, 128  ;;  %p362_p6 = scmp.lt.s32.totalorder %s20_s10, %s20_s10 }
  0x2d   :  { %p358_p5 = scmp.ne.s32.totalorder %s20_s10, %s357_s6  ;;  %p363_p7 = scmp.lt.s32.totalorder %s357_s6, %s357_s6 }
  0x2f   :  { %p364_p8 = por %p363_p7, %p362_p6 }
  0x31   :  { %p365_p9 = pnand %p364_p8, %p358_p5 }
  0x33   :  { %368 = shalt.err (!%p365_p9)
}
  0x34   :  { %25 = dma.hbm_to_vmem [thread:$0]  %s571_s0, 128, %s20_s10, [#allocation3], %s444_s28, %s444_s28, %s445_s29  }
  0x35   :  { %s450_s8 = smov [#allocation7]   ;;  %s451_s11 = smov [#allocation10]  }
  0x36   :  { %s43_s9 = sshll.u32 %s450_s8, 4  ;;  %s68_s12 = sshll.u32 %s451_s11, 4  ;;  %s44_s9 = int_to_ptr.vmem [resolvable:$true] %s43_s9  ;;  %s69_s12 = int_to_ptr.vmem [resolvable:$true] %s68_s12 }
  0x37   :  { %s369_s15 = scalar_lea.hbm %s573_s2, 256 }
  0x38   :  { %p370_p10 = scmp.ne.s32.totalorder %s573_s2, %s369_s15  ;;  %p373_p11 = scmp.lt.u32.totalorder %s369_s15, %s573_s2 }
  0x3a   :  { %p375_p12 = pnand %p373_p11, %p370_p10 }
  0x3c   :  { %378 = shalt.err (!%p375_p12)
}
  0x3d   :  { %s379_s0 = scalar_lea.vmem %s44_s9, 256  ;;  %p384_p0 = scmp.lt.s32.totalorder %s44_s9, %s44_s9 }
  0x3e   :  { %p380_p13 = scmp.ne.s32.totalorder %s44_s9, %s379_s0  ;;  %p385_p1 = scmp.lt.s32.totalorder %s379_s0, %s379_s0 }
  0x40   :  { %p386_p2 = por %p385_p1, %p384_p0 }
  0x42   :  { %p387_p3 = pnand %p386_p2, %p380_p13 }
  0x44   :  { %390 = shalt.err (!%p387_p3)
}
  0x45   :  { %49 = dma.hbm_to_vmem [thread:$0]  %s573_s2, 256, %s44_s9, [#allocation6], %s448_s18, %s448_s18, %s449_s19  }
  0x46   :  { %s391_s22 = scalar_lea.hbm %s575_s4, 32 }
  0x47   :  { %p392_p4 = scmp.ne.s32.totalorder %s575_s4, %s391_s22  ;;  %p395_p5 = scmp.lt.u32.totalorder %s391_s22, %s575_s4 }
  0x49   :  { %p397_p6 = pnand %p395_p5, %p392_p4 }
  0x4b   :  { %400 = shalt.err (!%p397_p6)
}
  0x4c   :  { %s401_s27 = scalar_lea.vmem %s69_s12, 32  ;;  %p406_p8 = scmp.lt.s32.totalorder %s69_s12, %s69_s12 }
  0x4d   :  { %p402_p7 = scmp.ne.s32.totalorder %s69_s12, %s401_s27  ;;  %p407_p9 = scmp.lt.s32.totalorder %s401_s27, %s401_s27 }
  0x4f   :  { %p408_p10 = por %p407_p9, %p406_p8 }
  0x51   :  { %p409_p11 = pnand %p408_p10, %p402_p7 }
  0x53   :  { %412 = shalt.err (!%p409_p11)
}
  0x54   :  { %71 = dma.hbm_to_vmem [thread:$0]  %s575_s4, 32, %s69_s12, [#allocation9]  }
  0x55   :  { %435 = dma.done.wait [#allocation3], 128  }
  0x56   :  { %436 = vsyncadd [#allocation3], 4294967168 }
  0x57   :  { %437 = dma.done.wait [#allocation6], 384  }
  0x58   :  { %438 = vsyncadd [#allocation6], 4294966912 }
  0x59   :  { %439 = dma.done.wait [#allocation9], 288  }
  0x5a   :  { %440 = vsyncadd [#allocation9], 4294967008  ;;  %v452_v0 = vmov 0   ;;  %v295_v1 = vld [vmem:[#allocation8 + $0x4] ss:$8 sps:$4 sm:$0xff]   ;;  %vm111_vm0 = vcmask 130048   ;;  %v221_v7 = vlaneseq }
  0x5b   :  { %147 = vmatprep.mubr.bf16.mxu1 %v452_v0  ;;  %208 = vmatprep.mubr.bf16.mxu0 %v452_v0  ;;  %v297_v2 = vld [vmem:[#allocation7 + $0x4] ss:$8 sps:$4 sm:$0xff]   ;;  %v299_v3 = vld [vmem:[#allocation8] ss:$8 sps:$4 sm:$0xff]   ;;  %v300_v4 = vld [vmem:[#allocation7] ss:$8 sps:$4 sm:$0xff]  }
  0x5c   :  { %115 = vmatprep.subr.bf16.mxu1 %v295_v1  ;;  %176 = vmatprep.subr.bf16.mxu0 %v297_v2  ;;  %v301_v5 = vld [vmem:[#allocation5] sm:$0xff]   ;;  %v302_v6 = vld [vmem:[#allocation2] sm:$0xff]   ;;  %v222_v8 = vshrl.u32 %v221_v7, 7  ;;  %v219_v10 = vld [vmem:[#allocation10] sm:$0x3]  ;;  %s453_s4 = smov [#allocation11]  }
  0x5d   :  { %116 = vmatpush1.bf16.msra.mxu1 %v299_v3  ;;  %177 = vmatpush1.bf16.msra.mxu0 %v300_v4  ;;  %s254_s6 = sshll.u32 %s453_s4, 4  ;;  %s255_s6 = int_to_ptr.vmem [resolvable:$true] %s254_s6 }
  0x5e   :  { %v223_v9 = vsub.s32 0, %v222_v8  ;;  %v227_v11 = vsub.s32 1, %v222_v8  ;;  %s413_s3 = scalar_lea.vmem %s255_s6, 256  ;;  %p418_p13 = scmp.lt.s32.totalorder %s255_s6, %s255_s6 }
  0x5f   :  { %p414_p12 = scmp.ne.s32.totalorder %s255_s6, %s413_s3  ;;  %p419_p0 = scmp.lt.s32.totalorder %s413_s3, %s413_s3 }
  0x60   :  { %271 = vmatmul.mubr.msk.bf16.vlgmr.msra.gmra.mrb[0].mxu1 %vm111_vm0, %v301_v5  ;;  %275 = vmatmul.mubr.msk.bf16.vlgmr.msra.gmra.mrb[0].mxu0 %vm111_vm0, %v302_v6  ;;  %v224_v12 = vrot.slane %v219_v10, %v223_v9  ;;  %v228_v15 = vrot.slane %v219_v10, %v227_v11 }
  0x61   :  { %p420_p1 = por %p419_p0, %p418_p13 }
  0x63   :  { %p421_p2 = pnand %p420_p1, %p414_p12 }
 0x133   :  { %v149_v13 = vpop.f32.mrb[0].mxu1  ;;  %v210_v14 = vpop.f32.mrb[0].mxu0 }
 0x134   :  { %v211_v16 = vadd.f32 %v210_v14, %v149_v13  ;;  %v151_v17 = vpop.f32.mrb[1].mxu1  ;;  %v212_v18 = vpop.f32.mrb[1].mxu0 }
 0x135   :  { %v213_v19 = vadd.f32 %v212_v18, %v151_v17  ;;  %v153_v20 = vpop.f32.mrb[2].mxu1  ;;  %v214_v21 = vpop.f32.mrb[2].mxu0 }
 0x136   :  { %v231_v22 = vadd.f32 %v224_v12, %v211_v16  ;;  %v215_v23 = vadd.f32 %v214_v21, %v153_v20  ;;  %v155_v24 = vpop.f32.mrb[3].mxu1  ;;  %v216_v25 = vpop.f32.mrb[3].mxu0 }
 0x137   :  { %v232_v26 = vadd.f32 %v228_v15, %v213_v19  ;;  %v217_v27 = vadd.f32 %v216_v25, %v155_v24 }
 0x138   :  { %v233_v28 = vadd.f32 %v224_v12, %v215_v23 }
 0x139   :  { %v278_v29 = vpack.c.bf16 %v232_v26, %v231_v22  ;;  %v234_v30 = vadd.f32 %v228_v15, %v217_v27 }
 0x13b   :  { %247 = vst [vmem:[#allocation11] sm:$0xff] %v278_v29  ;;  %v279_v31 = vpack.c.bf16 %v234_v30, %v233_v28 }
 0x13d   :  { %248 = vst [vmem:[#allocation11 + $0x8] sm:$0xff] %v279_v31 }
 0x13e   :  { %424 = shalt.err (!%p421_p2)
}
 0x13f   :  { %s425_s9 = scalar_lea.hbm %s576_s5, 256 }
 0x140   :  { %p426_p3 = scmp.ne.s32.totalorder %s576_s5, %s425_s9  ;;  %p429_p4 = scmp.lt.u32.totalorder %s425_s9, %s576_s5 }
 0x142   :  { %p431_p5 = pnand %p429_p4, %p426_p3 }
 0x144   :  { %434 = shalt.err (!%p431_p5)
}
 0x145   :  { %260 = dma.vmem_to_hbm [thread:$0]  %s255_s6, 256, %s576_s5, [#allocation4], %s448_s18, %s448_s18, %s449_s19  }
 0x146   :  { %441 = dma.done.wait [#allocation4], 256  }
 0x147   :  { %442 = vsyncadd [#allocation4], 4294967040 }
 0x148   :  { %264 = vsyncpa [#allocation3], 1 }
 0x149   :  { %265 = vsyncpa [#allocation6], 1 }
 0x14a   :  { %266 = vsyncpa [#allocation9], 1 }
 0x14b   :  { %267 = vsyncpa [#allocation4], 1 }

// kernel: bilstm_seq_label_forward.9
= control target key start
LH: loop header
LB: loop body
LE: loop exit
PB: predicated region body
PF: predicated region fallthrough
CT: control target
= control target key end

     0   :  { %10 = vsyncpa [#allocation3], 0  ;;  %s605_s0 = inlined_call_operand.hbm [shape: bf16[16,32], index: 0, kind: input, shape index: {}]   ;;  %s606_s1 = inlined_call_operand.hbm [shape: bf16[16,32], index: 1, kind: input, shape index: {}]   ;;  %s607_s2 = inlined_call_operand.hbm [shape: bf16[32,256], index: 2, kind: input, shape index: {}]   ;;  %s608_s3 = inlined_call_operand.hbm [shape: bf16[32,256], index: 3, kind: input, shape index: {}]   ;;  %s609_s4 = inlined_call_operand.hbm [shape: f32[1,256], index: 4, kind: input, shape index: {}]   ;;  %s610_s5 = inlined_call_operand.hbm [shape: bf16[16,256], index: 5, kind: output, shape index: {}]  }
   0x1   :  { %11 = vsyncpa [#allocation6], 0 }
   0x2   :  { %12 = vsyncpa [#allocation9], 0 }
   0x3   :  { %13 = vsyncpa [#allocation4], 0  ;;  %s477_s18 = smov [#allocation5]   ;;  %s337_s22 = scalar_lea.hbm %s606_s1, 128 }
   0x4   :  { %s31_s19 = sshll.u32 %s477_s18, 4  ;;  %p338_p0 = scmp.ne.s32.totalorder %s606_s1, %s337_s22  ;;  %s32_s19 = int_to_ptr.vmem [resolvable:$true] %s31_s19 }
   0x5   :  { %p341_p1 = scmp.lt.u32.totalorder %s337_s22, %s606_s1 }
   0x7   :  { %p343_p2 = pnand %p341_p1, %p338_p0 }
   0x9   :  { %346 = shalt.err (!%p343_p2)
}
   0xa   :  { %s347_s27 = scalar_lea.vmem %s32_s19, 128  ;;  %p352_p4 = scmp.lt.s32.totalorder %s32_s19, %s32_s19 }
   0xb   :  { %p348_p3 = scmp.ne.s32.totalorder %s32_s19, %s347_s27  ;;  %p353_p5 = scmp.lt.s32.totalorder %s347_s27, %s347_s27 }
   0xd   :  { %p354_p6 = por %p353_p5, %p352_p4 }
   0xf   :  { %p355_p7 = pnand %p354_p6, %p348_p3 }
  0x11   :  { %358 = shalt.err (!%p355_p7)
}
  0x12   :  { %s478_s28 = smov 64   ;;  %s479_s29 = smov 4  }
  0x13   :  { %37 = dma.hbm_to_vmem [thread:$0]  %s606_s1, 128, %s32_s19, [#allocation6], %s478_s28, %s478_s28, %s479_s29  }
  0x14   :  { %s480_s7 = smov [#allocation8]   ;;  %s481_s9 = smov [#allocation2]  }
  0x15   :  { %s55_s8 = sshll.u32 %s480_s7, 4  ;;  %s19_s10 = sshll.u32 %s481_s9, 4  ;;  %s56_s8 = int_to_ptr.vmem [resolvable:$true] %s55_s8  ;;  %s20_s10 = int_to_ptr.vmem [resolvable:$true] %s19_s10 }
  0x16   :  { %s359_s13 = scalar_lea.hbm %s608_s3, 512 }
  0x17   :  { %p360_p8 = scmp.ne.s32.totalorder %s608_s3, %s359_s13  ;;  %p363_p9 = scmp.lt.u32.totalorder %s359_s13, %s608_s3 }
  0x19   :  { %p365_p10 = pnand %p363_p9, %p360_p8 }
  0x1b   :  { %368 = shalt.err (!%p365_p10)
}
  0x1c   :  { %s369_s1 = scalar_lea.vmem %s56_s8, 512  ;;  %p374_p12 = scmp.lt.s32.totalorder %s56_s8, %s56_s8 }
  0x1d   :  { %p370_p11 = scmp.ne.s32.totalorder %s56_s8, %s369_s1  ;;  %p375_p13 = scmp.lt.s32.totalorder %s369_s1, %s369_s1 }
  0x1f   :  { %p376_p0 = por %p375_p13, %p374_p12 }
  0x21   :  { %p377_p1 = pnand %p376_p0, %p370_p11 }
  0x23   :  { %380 = shalt.err (!%p377_p1)
}
  0x24   :  { %s482_s18 = smov 128   ;;  %s483_s19 = smov 8  }
  0x25   :  { %61 = dma.hbm_to_vmem [thread:$0]  %s608_s3, 512, %s56_s8, [#allocation9], %s482_s18, %s482_s18, %s483_s19  }
  0x26   :  { %s381_s24 = scalar_lea.hbm %s605_s0, 128 }
  0x27   :  { %p382_p2 = scmp.ne.s32.totalorder %s605_s0, %s381_s24  ;;  %p385_p3 = scmp.lt.u32.totalorder %s381_s24, %s605_s0 }
  0x29   :  { %p387_p4 = pnand %p385_p3, %p382_p2 }
  0x2b   :  { %390 = shalt.err (!%p387_p4)
}
  0x2c   :  { %s391_s6 = scalar_lea.vmem %s20_s10, 128  ;;  %p396_p6 = scmp.lt.s32.totalorder %s20_s10, %s20_s10 }
  0x2d   :  { %p392_p5 = scmp.ne.s32.totalorder %s20_s10, %s391_s6  ;;  %p397_p7 = scmp.lt.s32.totalorder %s391_s6, %s391_s6 }
  0x2f   :  { %p398_p8 = por %p397_p7, %p396_p6 }
  0x31   :  { %p399_p9 = pnand %p398_p8, %p392_p5 }
  0x33   :  { %402 = shalt.err (!%p399_p9)
}
  0x34   :  { %25 = dma.hbm_to_vmem [thread:$0]  %s605_s0, 128, %s20_s10, [#allocation3], %s478_s28, %s478_s28, %s479_s29  }
  0x35   :  { %s484_s8 = smov [#allocation7]   ;;  %s485_s11 = smov [#allocation10]  }
  0x36   :  { %s43_s9 = sshll.u32 %s484_s8, 4  ;;  %s68_s12 = sshll.u32 %s485_s11, 4  ;;  %s44_s9 = int_to_ptr.vmem [resolvable:$true] %s43_s9  ;;  %s69_s12 = int_to_ptr.vmem [resolvable:$true] %s68_s12 }
  0x37   :  { %s403_s15 = scalar_lea.hbm %s607_s2, 512 }
  0x38   :  { %p404_p10 = scmp.ne.s32.totalorder %s607_s2, %s403_s15  ;;  %p407_p11 = scmp.lt.u32.totalorder %s403_s15, %s607_s2 }
  0x3a   :  { %p409_p12 = pnand %p407_p11, %p404_p10 }
  0x3c   :  { %412 = shalt.err (!%p409_p12)
}
  0x3d   :  { %s413_s0 = scalar_lea.vmem %s44_s9, 512  ;;  %p418_p0 = scmp.lt.s32.totalorder %s44_s9, %s44_s9 }
  0x3e   :  { %p414_p13 = scmp.ne.s32.totalorder %s44_s9, %s413_s0  ;;  %p419_p1 = scmp.lt.s32.totalorder %s413_s0, %s413_s0 }
  0x40   :  { %p420_p2 = por %p419_p1, %p418_p0 }
  0x42   :  { %p421_p3 = pnand %p420_p2, %p414_p13 }
  0x44   :  { %424 = shalt.err (!%p421_p3)
}
  0x45   :  { %49 = dma.hbm_to_vmem [thread:$0]  %s607_s2, 512, %s44_s9, [#allocation6], %s482_s18, %s482_s18, %s483_s19  }
  0x46   :  { %s425_s22 = scalar_lea.hbm %s609_s4, 32 }
  0x47   :  { %p426_p4 = scmp.ne.s32.totalorder %s609_s4, %s425_s22  ;;  %p429_p5 = scmp.lt.u32.totalorder %s425_s22, %s609_s4 }
  0x49   :  { %p431_p6 = pnand %p429_p5, %p426_p4 }
  0x4b   :  { %434 = shalt.err (!%p431_p6)
}
  0x4c   :  { %s435_s27 = scalar_lea.vmem %s69_s12, 32  ;;  %p440_p8 = scmp.lt.s32.totalorder %s69_s12, %s69_s12 }
  0x4d   :  { %p436_p7 = scmp.ne.s32.totalorder %s69_s12, %s435_s27  ;;  %p441_p9 = scmp.lt.s32.totalorder %s435_s27, %s435_s27 }
  0x4f   :  { %p442_p10 = por %p441_p9, %p440_p8 }
  0x51   :  { %p443_p11 = pnand %p442_p10, %p436_p7 }
  0x53   :  { %446 = shalt.err (!%p443_p11)
}
  0x54   :  { %71 = dma.hbm_to_vmem [thread:$0]  %s609_s4, 32, %s69_s12, [#allocation9]  }
  0x55   :  { %469 = dma.done.wait [#allocation3], 128  }
  0x56   :  { %470 = vsyncadd [#allocation3], 4294967168 }
  0x57   :  { %471 = dma.done.wait [#allocation6], 640  }
  0x58   :  { %472 = vsyncadd [#allocation6], 4294966656 }
  0x59   :  { %473 = dma.done.wait [#allocation9], 544  }
  0x5a   :  { %474 = vsyncadd [#allocation9], 4294966752  ;;  %v486_v0 = vmov 0   ;;  %v323_v1 = vld [vmem:[#allocation8 + $0x4] ss:$8 sps:$4 sm:$0xff]   ;;  %v335_v9 = vld [vmem:[#allocation5] sm:$0xff]   ;;  %v245_v11 = vlaneseq }
  0x5b   :  { %161 = vmatprep.mubr.bf16.mxu1 %v486_v0  ;;  %232 = vmatprep.mubr.bf16.mxu0 %v486_v0  ;;  %v325_v2 = vld [vmem:[#allocation7 + $0x4] ss:$8 sps:$4 sm:$0xff]   ;;  %v327_v3 = vld [vmem:[#allocation8] ss:$8 sps:$4 sm:$0xff]   ;;  %v329_v5 = vld [vmem:[#allocation8 + $0x14] ss:$8 sps:$4 sm:$0xff]  }
  0x5c   :  { %129 = vmatprep.subr.bf16.mxu1 %v323_v1  ;;  %v328_v4 = vld [vmem:[#allocation7] ss:$8 sps:$4 sm:$0xff]   ;;  %200 = vmatprep.subr.bf16.mxu0 %v325_v2  ;;  %v331_v6 = vld [vmem:[#allocation7 + $0x14] ss:$8 sps:$4 sm:$0xff]   ;;  %v333_v7 = vld [vmem:[#allocation8 + $0x10] ss:$8 sps:$4 sm:$0xff]  }
  0x5d   :  { %130 = vmatpush1.bf16.msra.mxu1 %v327_v3  ;;  %201 = vmatpush1.bf16.msra.mxu0 %v328_v4  ;;  %v334_v8 = vld [vmem:[#allocation7 + $0x10] ss:$8 sps:$4 sm:$0xff]   ;;  %vm125_vm0 = vcmask 261120   ;;  %v246_v12 = vshrl.u32 %v245_v11, 7  ;;  %v243_v14 = vld [vmem:[#allocation10] sm:$0x3] }
  0x5e   :  { %131 = vmatprep.subr.bf16.mxu1 %v329_v5  ;;  %202 = vmatprep.subr.bf16.mxu0 %v331_v6  ;;  %v336_v10 = vld [vmem:[#allocation2] sm:$0xff]   ;;  %s487_s4 = smov [#allocation11]  }
  0x5f   :  { %v247_v13 = vsub.s32 0, %v246_v12  ;;  %v251_v15 = vsub.s32 1, %v246_v12  ;;  %s278_s6 = sshll.u32 %s487_s4, 4  ;;  %s279_s6 = int_to_ptr.vmem [resolvable:$true] %s278_s6 }
  0x60   :  { %s447_s3 = scalar_lea.vmem %s279_s6, 256  ;;  %p452_p13 = scmp.lt.s32.totalorder %s279_s6, %s279_s6 }
  0x61   :  { %132 = vmatpush1.bf16.msra.mxu1 %v333_v7  ;;  %203 = vmatpush1.bf16.msra.mxu0 %v334_v8  ;;  %v248_v16 = vrot.slane %v243_v14, %v247_v13  ;;  %v252_v19 = vrot.slane %v243_v14, %v251_v15  ;;  %p448_p12 = scmp.ne.s32.totalorder %s279_s6, %s447_s3  ;;  %p453_p0 = scmp.lt.s32.totalorder %s447_s3, %s447_s3 }
  0x63   :  { %p454_p1 = por %p453_p0, %p452_p13 }
  0x64   :  { %297 = vmatmul.mubr.msk.bf16.vlgmr.msra.gmra.mrb[0].mxu1 %vm125_vm0, %v335_v9  ;;  %303 = vmatmul.mubr.msk.bf16.vlgmr.msra.gmra.mrb[0].mxu0 %vm125_vm0, %v336_v10 }
  0x65   :  { %p455_p2 = pnand %p454_p1, %p448_p12 }
 0x137   :  { %v163_v17 = vpop.f32.mrb[0].mxu1  ;;  %v234_v18 = vpop.f32.mrb[0].mxu0 }
 0x138   :  { %v235_v20 = vadd.f32 %v234_v18, %v163_v17  ;;  %v165_v21 = vpop.f32.mrb[1].mxu1  ;;  %v236_v22 = vpop.f32.mrb[1].mxu0 }
 0x139   :  { %v237_v23 = vadd.f32 %v236_v22, %v165_v21  ;;  %v167_v24 = vpop.f32.mrb[2].mxu1  ;;  %v238_v25 = vpop.f32.mrb[2].mxu0 }
 0x13a   :  { %v255_v26 = vadd.f32 %v248_v16, %v235_v20  ;;  %v239_v27 = vadd.f32 %v238_v25, %v167_v24  ;;  %v169_v28 = vpop.f32.mrb[3].mxu1  ;;  %v240_v29 = vpop.f32.mrb[3].mxu0 }
 0x13b   :  { %v256_v30 = vadd.f32 %v252_v19, %v237_v23  ;;  %v241_v31 = vadd.f32 %v240_v29, %v169_v28 }
 0x13c   :  { %v257_v32 = vadd.f32 %v248_v16, %v239_v27 }
 0x13d   :  { %v306_v33 = vpack.c.bf16 %v256_v30, %v255_v26  ;;  %v258_v34 = vadd.f32 %v252_v19, %v241_v31 }
 0x13f   :  { %271 = vst [vmem:[#allocation11] sm:$0xff] %v306_v33  ;;  %v307_v35 = vpack.c.bf16 %v258_v34, %v257_v32 }
 0x141   :  { %272 = vst [vmem:[#allocation11 + $0x8] sm:$0xff] %v307_v35 }
 0x142   :  { %458 = shalt.err (!%p455_p2)
}
 0x143   :  { %s459_s9 = scalar_lea.hbm %s610_s5, 256 }
 0x144   :  { %p460_p3 = scmp.ne.s32.totalorder %s610_s5, %s459_s9  ;;  %p463_p4 = scmp.lt.u32.totalorder %s459_s9, %s610_s5 }
 0x146   :  { %p465_p5 = pnand %p463_p4, %p460_p3 }
 0x148   :  { %468 = shalt.err (!%p465_p5)
}
 0x149   :  { %284 = dma.vmem_to_hbm [thread:$0]  %s279_s6, 256, %s610_s5, [#allocation4], %s482_s18, %s482_s18, %s483_s19  }
 0x14a   :  { %475 = dma.done.wait [#allocation4], 256  }
 0x14b   :  { %476 = vsyncadd [#allocation4], 4294967040 }
 0x14c   :  { %288 = vsyncpa [#allocation3], 1 }
 0x14d   :  { %289 = vsyncpa [#allocation6], 1 }
 0x14e   :  { %290 = vsyncpa [#allocation9], 1 }
 0x14f   :  { %291 = vsyncpa [#allocation4], 1 }

// kernel: bilstm_seq_label_forward.11
= control target key start
LH: loop header
LB: loop body
LE: loop exit
PB: predicated region body
PF: predicated region fallthrough
CT: control target
= control target key end

     0   :  { %10 = vsyncpa [#allocation3], 0  ;;  %s582_s0 = inlined_call_operand.hbm [shape: bf16[16,32], index: 0, kind: input, shape index: {}]   ;;  %s583_s1 = inlined_call_operand.hbm [shape: bf16[16,32], index: 1, kind: input, shape index: {}]   ;;  %s584_s2 = inlined_call_operand.hbm [shape: bf16[32,128], index: 2, kind: input, shape index: {}]   ;;  %s585_s3 = inlined_call_operand.hbm [shape: bf16[32,128], index: 3, kind: input, shape index: {}]   ;;  %s586_s4 = inlined_call_operand.hbm [shape: f32[1,128], index: 4, kind: input, shape index: {}]   ;;  %s587_s5 = inlined_call_operand.hbm [shape: f32[16,128], index: 5, kind: output, shape index: {}]  }
   0x1   :  { %11 = vsyncpa [#allocation6], 0 }
   0x2   :  { %12 = vsyncpa [#allocation9], 0 }
   0x3   :  { %13 = vsyncpa [#allocation4], 0  ;;  %s442_s18 = smov [#allocation5]   ;;  %s443_s20 = smov [#allocation8]  }
   0x4   :  { %s31_s19 = sshll.u32 %s442_s18, 4  ;;  %s55_s21 = sshll.u32 %s443_s20, 4  ;;  %s32_s19 = int_to_ptr.vmem [resolvable:$true] %s31_s19  ;;  %s484_s21 = int_to_ptr.vmem [resolvable:$true] %s55_s21 }
   0x5   :  { %s302_s24 = scalar_lea.hbm %s583_s1, 128 }
   0x6   :  { %p303_p0 = scmp.ne.s32.totalorder %s583_s1, %s302_s24  ;;  %p306_p1 = scmp.lt.u32.totalorder %s302_s24, %s583_s1 }
   0x8   :  { %p308_p2 = pnand %p306_p1, %p303_p0 }
   0xa   :  { %311 = shalt.err (!%p308_p2)
}
   0xb   :  { %s312_s29 = scalar_lea.vmem %s32_s19, 128  ;;  %p317_p4 = scmp.lt.s32.totalorder %s32_s19, %s32_s19 }
   0xc   :  { %p313_p3 = scmp.ne.s32.totalorder %s32_s19, %s312_s29  ;;  %p318_p5 = scmp.lt.s32.totalorder %s312_s29, %s312_s29 }
   0xe   :  { %p319_p6 = por %p318_p5, %p317_p4 }
  0x10   :  { %p320_p7 = pnand %p319_p6, %p313_p3 }
  0x12   :  { %323 = shalt.err (!%p320_p7)
}
  0x13   :  { %s444_s30 = smov 64   ;;  %s445_s6 = smov 4  }
  0x14   :  { %37 = dma.hbm_to_vmem [thread:$0]  %s583_s1, 128, %s32_s19, [#allocation6], %s444_s30, %s444_s30, %s445_s6  }
  0x15   :  { %s324_s11 = scalar_lea.hbm %s585_s3, 256 }
  0x16   :  { %p325_p8 = scmp.ne.s32.totalorder %s585_s3, %s324_s11  ;;  %p328_p9 = scmp.lt.u32.totalorder %s324_s11, %s585_s3 }
  0x18   :  { %p330_p10 = pnand %p328_p9, %p325_p8 }
  0x1a   :  { %333 = shalt.err (!%p330_p10)
}
  0x1b   :  { %s334_s16 = scalar_lea.vmem %s484_s21, 256  ;;  %p339_p12 = scmp.lt.s32.totalorder %s484_s21, %s484_s21 }
  0x1c   :  { %p335_p11 = scmp.ne.s32.totalorder %s484_s21, %s334_s16  ;;  %p340_p13 = scmp.lt.s32.totalorder %s334_s16, %s334_s16 }
  0x1e   :  { %p341_p0 = por %p340_p13, %p339_p12 }
  0x20   :  { %p342_p1 = pnand %p341_p0, %p335_p11 }
  0x22   :  { %345 = shalt.err (!%p342_p1)
}
  0x23   :  { %61 = dma.hbm_to_vmem [thread:$0]  %s585_s3, 256, %s484_s21, [#allocation9], %s444_s30, %s444_s30, %s445_s6  }
  0x24   :  { %s446_s18 = smov [#allocation2]   ;;  %s447_s20 = smov [#allocation7]  }
  0x25   :  { %s19_s19 = sshll.u32 %s446_s18, 4  ;;  %s43_s22 = sshll.u32 %s447_s20, 4  ;;  %s20_s19 = int_to_ptr.vmem [resolvable:$true] %s19_s19  ;;  %s521_s22 = int_to_ptr.vmem [resolvable:$true] %s43_s22 }
  0x26   :  { %s346_s25 = scalar_lea.hbm %s582_s0, 128 }
  0x27   :  { %p347_p2 = scmp.ne.s32.totalorder %s582_s0, %s346_s25  ;;  %p350_p3 = scmp.lt.u32.totalorder %s346_s25, %s582_s0 }
  0x29   :  { %p352_p4 = pnand %p350_p3, %p347_p2 }
  0x2b   :  { %355 = shalt.err (!%p352_p4)
}
  0x2c   :  { %s356_s3 = scalar_lea.vmem %s20_s19, 128  ;;  %p361_p6 = scmp.lt.s32.totalorder %s20_s19, %s20_s19 }
  0x2d   :  { %p357_p5 = scmp.ne.s32.totalorder %s20_s19, %s356_s3  ;;  %p362_p7 = scmp.lt.s32.totalorder %s356_s3, %s356_s3 }
  0x2f   :  { %p363_p8 = por %p362_p7, %p361_p6 }
  0x31   :  { %p364_p9 = pnand %p363_p8, %p357_p5 }
  0x33   :  { %367 = shalt.err (!%p364_p9)
}
  0x34   :  { %25 = dma.hbm_to_vmem [thread:$0]  %s582_s0, 128, %s20_s19, [#allocation3], %s444_s30, %s444_s30, %s445_s6  }
  0x35   :  { %s368_s10 = scalar_lea.hbm %s584_s2, 256 }
  0x36   :  { %p369_p10 = scmp.ne.s32.totalorder %s584_s2, %s368_s10  ;;  %p372_p11 = scmp.lt.u32.totalorder %s368_s10, %s584_s2 }
  0x38   :  { %p374_p12 = pnand %p372_p11, %p369_p10 }
  0x3a   :  { %377 = shalt.err (!%p374_p12)
}
  0x3b   :  { %s378_s15 = scalar_lea.vmem %s521_s22, 256  ;;  %p383_p0 = scmp.lt.s32.totalorder %s521_s22, %s521_s22 }
  0x3c   :  { %p379_p13 = scmp.ne.s32.totalorder %s521_s22, %s378_s15  ;;  %p384_p1 = scmp.lt.s32.totalorder %s378_s15, %s378_s15 }
  0x3e   :  { %p385_p2 = por %p384_p1, %p383_p0 }
  0x40   :  { %p386_p3 = pnand %p385_p2, %p379_p13 }
  0x42   :  { %389 = shalt.err (!%p386_p3)
}
  0x43   :  { %49 = dma.hbm_to_vmem [thread:$0]  %s584_s2, 256, %s521_s22, [#allocation6], %s444_s30, %s444_s30, %s445_s6  }
  0x44   :  { %s448_s1 = smov [#allocation10]   ;;  %s390_s20 = scalar_lea.hbm %s586_s4, 16 }
  0x45   :  { %s68_s17 = sshll.u32 %s448_s1, 4  ;;  %p391_p4 = scmp.ne.s32.totalorder %s586_s4, %s390_s20  ;;  %s69_s17 = int_to_ptr.vmem [resolvable:$true] %s68_s17 }
  0x46   :  { %p394_p5 = scmp.lt.u32.totalorder %s390_s20, %s586_s4 }
  0x48   :  { %p396_p6 = pnand %p394_p5, %p391_p4 }
  0x4a   :  { %399 = shalt.err (!%p396_p6)
}
  0x4b   :  { %s400_s27 = scalar_lea.vmem %s69_s17, 16  ;;  %s404_s2 = scalar_lea.vmem %s69_s17, 32 }
  0x4c   :  { %p401_p7 = scmp.ne.s32.totalorder %s69_s17, %s400_s27  ;;  %p405_p8 = scmp.lt.s32.totalorder %s69_s17, %s69_s17 }
  0x4d   :  { %p406_p9 = scmp.lt.s32.totalorder %s404_s2, %s400_s27 }
  0x4f   :  { %p407_p10 = por %p406_p9, %p405_p8 }
  0x51   :  { %p408_p11 = pnand %p407_p10, %p401_p7 }
  0x53   :  { %411 = shalt.err (!%p408_p11)
}
  0x54   :  { %71 = dma.hbm_to_vmem [thread:$0]  %s586_s4, 16, %s69_s17, [#allocation9]  }
  0x55   :  { %434 = dma.done.wait [#allocation3], 128  }
  0x56   :  { %435 = vsyncadd [#allocation3], 4294967168 }
  0x57   :  { %436 = dma.done.wait [#allocation6], 384  }
  0x58   :  { %437 = vsyncadd [#allocation6], 4294966912 }
  0x59   :  { %438 = dma.done.wait [#allocation9], 272  }
  0x5a   :  { %439 = vsyncadd [#allocation9], 4294967024  ;;  %v449_v0 = vmov 0.0   ;;  %vm450_vm0 = vmmov 0   ;;  %v296_v1 = vld [vmem:[#allocation8] sm:$0xff]   ;;  %v297_v2 = vld [vmem:[#allocation7] sm:$0xff]  }
  0x5b   :  { %268 = vmatprep.subr.bf16.mxu0 %v449_v0  ;;  %276 = vmatprep.subr.bf16.mxu1 %v449_v0  ;;  %v298_v3 = vld [vmem:[#allocation8 + $0x8] sm:$0xff]   ;;  %v299_v4 = vld [vmem:[#allocation7 + $0x8] sm:$0xff]   ;;  %vm117_vm1 = vcmask 261120   ;;  %v301_v6 = vld [vmem:[#allocation2] sm:$0xff]   ;;  %s451_s4 = smov [#allocation11]  }
  0x5c   :  { %272 = vmatprep.mubr.msk.bf16.mxu0 %vm450_vm0, %v449_v0  ;;  %280 = vmatprep.mubr.msk.bf16.mxu1 %vm450_vm0, %v449_v0  ;;  %v300_v5 = vld [vmem:[#allocation5] sm:$0xff]   ;;  %v261_v9 = vld [vmem:[#allocation10] ss:$0 sm:$0xff]  ;;  %s239_s22 = sshll.u32 %s451_s4, 4  ;;  %s240_s22 = int_to_ptr.vmem [resolvable:$true] %s239_s22 }
  0x5d   :  { %269 = vmatpush3.bf16.msra.mxu0 %v296_v1  ;;  %277 = vmatpush3.bf16.msra.mxu1 %v297_v2  ;;  %s412_s28 = scalar_lea.vmem %s240_s22, 256  ;;  %p417_p13 = scmp.lt.s32.totalorder %s240_s22, %s240_s22 }
  0x5e   :  { %270 = vmatprep.subr.bf16.mxu0 %v449_v0  ;;  %278 = vmatprep.subr.bf16.mxu1 %v449_v0  ;;  %p413_p12 = scmp.ne.s32.totalorder %s240_s22, %s412_s28  ;;  %p418_p0 = scmp.lt.s32.totalorder %s412_s28, %s412_s28 }
  0x60   :  { %p419_p1 = por %p418_p0, %p417_p13 }
  0x61   :  { %271 = vmatpush3.bf16.msra.mxu0 %v298_v3  ;;  %279 = vmatpush3.bf16.msra.mxu1 %v299_v4 }
  0x62   :  { %p420_p2 = pnand %p419_p1, %p413_p12 }
  0x64   :  { %273 = vmatmul.mubr.msk.bf16.vlgmr.msra.gmra.mrb[0].mxu0 %vm117_vm1, %v300_v5  ;;  %281 = vmatmul.mubr.msk.bf16.vlgmr.msra.gmra.mrb[0].mxu1 %vm117_vm1, %v301_v6 }
 0x137   :  { %v155_v7 = vpop.f32.mrb[0].mxu0  ;;  %v216_v8 = vpop.f32.mrb[0].mxu1 }
 0x138   :  { %v274_v10 = vpop.f32.mrb[1].mxu0  ;;  %v217_v11 = vadd.f32 %v216_v8, %v155_v7  ;;  %v282_v12 = vpop.f32.mrb[1].mxu1 }
 0x139   :  { %v158_v13 = vpop.f32.mrb[2].mxu0  ;;  %v219_v14 = vpop.f32.mrb[2].mxu1 }
 0x13a   :  { %v275_v15 = vpop.f32.mrb[3].mxu0  ;;  %v230_v16 = vadd.f32 %v261_v9, %v217_v11  ;;  %v220_v17 = vadd.f32 %v219_v14, %v158_v13  ;;  %v283_v18 = vpop.f32.mrb[3].mxu1 }
 0x13c   :  { %232 = vst [vmem:[#allocation11] sm:$0xff] %v230_v16  ;;  %v231_v19 = vadd.f32 %v261_v9, %v220_v17 }
 0x13e   :  { %233 = vst [vmem:[#allocation11 + $0x8] sm:$0xff] %v231_v19 }
 0x13f   :  { %423 = shalt.err (!%p420_p2)
}
 0x140   :  { %s424_s21 = scalar_lea.hbm %s587_s5, 256 }
 0x141   :  { %p425_p3 = scmp.ne.s32.totalorder %s587_s5, %s424_s21  ;;  %p428_p4 = scmp.lt.u32.totalorder %s424_s21, %s587_s5 }
 0x143   :  { %p430_p5 = pnand %p428_p4, %p425_p3 }
 0x145   :  { %433 = shalt.err (!%p430_p5)
}
 0x146   :  { %s452_s11 = smov 128   ;;  %s453_s12 = smov 8  }
 0x147   :  { %245 = dma.vmem_to_hbm [thread:$0]  %s240_s22, 256, %s587_s5, [#allocation4], %s452_s11, %s452_s11, %s453_s12  }
 0x148   :  { %440 = dma.done.wait [#allocation4], 256  }
 0x149   :  { %441 = vsyncadd [#allocation4], 4294967040 }
 0x14a   :  { %249 = vsyncpa [#allocation3], 1 }
 0x14b   :  { %250 = vsyncpa [#allocation6], 1 }
 0x14c   :  { %251 = vsyncpa [#allocation9], 1 }
 0x14d   :  { %252 = vsyncpa [#allocation4], 1 }

// kernel: bilstm_seq_label_forward.8
= control target key start
LH: loop header
LB: loop body
LE: loop exit
PB: predicated region body
PF: predicated region fallthrough
CT: control target
= control target key end

     0   :  { %12 = vsyncpa [#allocation7], 0  ;;  %s3628_s0 = inlined_call_operand.hbm [shape: s32[2,1], index: 0, kind: input, shape index: {}]   ;;  %s3629_s1 = inlined_call_operand.hbm [shape: bf16[8,2,256], index: 1, kind: input, shape index: {}, may-alias: {1,2}]   ;;  %s3630_s2 = inlined_call_operand.hbm [shape: bf16[8,2,256], index: 2, kind: input, shape index: {}, may-alias: {1,2}]   ;;  %s3631_s3 = inlined_call_operand.hbm [shape: bf16[32,128], index: 3, kind: input, shape index: {}]   ;;  %s3632_s4 = inlined_call_operand.hbm [shape: bf16[32,128], index: 4, kind: input, shape index: {}]   ;;  %s3633_s5 = inlined_call_operand.hbm [shape: bf16[8,2,32], index: 5, kind: output, shape index: {0}]   ;;  %s3634_s6 = inlined_call_operand.hbm [shape: bf16[8,2,32], index: 6, kind: output, shape index: {1}]  }
   0x1   :  { %13 = vsyncpa [#allocation10], 0 }
   0x2   :  { %14 = vsyncpa [#allocation13], 0 }
   0x3   :  { %15 = vsyncpa [#allocation8], 0 }
   0x4   :  { %16 = vsyncpa [#allocation17], 0  ;;  %s2981_s21 = smov [#allocation9]   ;;  %s2814_s25 = scalar_lea.hbm %s3629_s1, 128 }
   0x5   :  { %s32_s22 = sshll.u32 %s2981_s21, 4  ;;  %p2815_p0 = scmp.ne.s32.totalorder %s3629_s1, %s2814_s25  ;;  %s33_s22 = int_to_ptr.vmem [resolvable:$true] %s32_s22 }
   0x6   :  { %s2816_s30 = scalar_lea.hbm %s3629_s1, 256  ;;  %p2818_p2 = scmp.lt.u32.totalorder %s2814_s25, %s3629_s1 }
   0x7   :  { %p2817_p1 = scmp.lt.u32.totalorder %s2816_s30, %s2814_s25 }
   0x9   :  { %p2819_p3 = por %p2818_p2, %p2817_p1 }
   0xb   :  { %p2820_p4 = pnand %p2819_p3, %p2815_p0 }
   0xd   :  { %2823 = shalt.err (!%p2820_p4)
}
   0xe   :  { %s2824_s9 = scalar_lea.vmem %s33_s22, 128  ;;  %p2829_p6 = scmp.lt.s32.totalorder %s33_s22, %s33_s22 }
   0xf   :  { %p2825_p5 = scmp.ne.s32.totalorder %s33_s22, %s2824_s9  ;;  %p2830_p7 = scmp.lt.s32.totalorder %s2824_s9, %s2824_s9 }
  0x11   :  { %p2831_p8 = por %p2830_p7, %p2829_p6 }
  0x13   :  { %p2832_p9 = pnand %p2831_p8, %p2825_p5 }
  0x15   :  { %2835 = shalt.err (!%p2832_p9)
}
  0x16   :  { %s2982_s10 = smov 32   ;;  %s2983_s11 = smov 16  }
  0x17   :  { %s2984_s12 = smov 1   ;;  %s2985_s15 = smov [#allocation12]  }
  0x18   :  { %38 = dma.hbm_to_vmem [thread:$0]  %s3629_s1, 128, %s33_s22, [#allocation10], %s2982_s10, %s2983_s11, %s2984_s12  }
  0x19   :  { %s62_s16 = sshll.u32 %s2985_s15, 4  ;;  %s2836_s19 = scalar_lea.hbm %s3631_s3, 256  ;;  %s63_s16 = int_to_ptr.vmem [resolvable:$true] %s62_s16 }
  0x1a   :  { %p2837_p10 = scmp.ne.s32.totalorder %s3631_s3, %s2836_s19  ;;  %p2840_p11 = scmp.lt.u32.totalorder %s2836_s19, %s3631_s3 }
  0x1c   :  { %p2842_p12 = pnand %p2840_p11, %p2837_p10 }
  0x1e   :  { %2845 = shalt.err (!%p2842_p12)
}
  0x1f   :  { %s2846_s25 = scalar_lea.vmem %s63_s16, 256  ;;  %p2851_p0 = scmp.lt.s32.totalorder %s63_s16, %s63_s16 }
  0x20   :  { %p2847_p13 = scmp.ne.s32.totalorder %s63_s16, %s2846_s25  ;;  %p2852_p1 = scmp.lt.s32.totalorder %s2846_s25, %s2846_s25 }
  0x22   :  { %p2853_p2 = por %p2852_p1, %p2851_p0 }
  0x24   :  { %p2854_p3 = pnand %p2853_p2, %p2847_p13 }
  0x26   :  { %2857 = shalt.err (!%p2854_p3)
}
  0x27   :  { %s2986_s1 = smov 64   ;;  %s2987_s22 = smov 4  }
  0x28   :  { %68 = dma.hbm_to_vmem [thread:$0]  %s3631_s3, 256, %s63_s16, [#allocation13], %s2986_s1, %s2986_s1, %s2987_s22  }
  0x29   :  { %s2988_s28 = smov [#allocation6]   ;;  %s3069_s8 = scalar_lea.hbm %s3630_s2, 16 }
  0x2a   :  { %s23_s29 = sshll.u32 %s2988_s28, 4  ;;  %s2858_s14 = scalar_lea.hbm %s3628_s0, 32  ;;  %s24_s29 = int_to_ptr.vmem [resolvable:$true] %s23_s29 }
  0x2b   :  { %p2859_p4 = scmp.ne.s32.totalorder %s3628_s0, %s2858_s14  ;;  %p2862_p5 = scmp.lt.u32.totalorder %s2858_s14, %s3628_s0 }
  0x2d   :  { %p2864_p6 = pnand %p2862_p5, %p2859_p4 }
  0x2f   :  { %2867 = shalt.err (!%p2864_p6)
}
  0x30   :  { %s2868_s3 = scalar_lea.vmem %s24_s29, 32  ;;  %p2873_p8 = scmp.lt.s32.totalorder %s24_s29, %s24_s29 }
  0x31   :  { %p2869_p7 = scmp.ne.s32.totalorder %s24_s29, %s2868_s3  ;;  %p2874_p9 = scmp.lt.s32.totalorder %s2868_s3, %s2868_s3 }
  0x33   :  { %p2875_p10 = por %p2874_p9, %p2873_p8 }
  0x35   :  { %p2876_p11 = pnand %p2875_p10, %p2869_p7 }
  0x37   :  { %2879 = shalt.err (!%p2876_p11)
}
  0x38   :  { %26 = dma.hbm_to_vmem [thread:$0]  %s3628_s0, 32, %s24_s29, [#allocation7]  }
  0x39   :  { %s2989_s21 = smov [#allocation11]   ;;  %s2990_s24 = smov [#allocation14]  }
  0x3a   :  { %s50_s23 = sshll.u32 %s2989_s21, 4  ;;  %s74_s25 = sshll.u32 %s2990_s24, 4  ;;  %s51_s23 = int_to_ptr.vmem [resolvable:$true] %s50_s23  ;;  %s75_s25 = int_to_ptr.vmem [resolvable:$true] %s74_s25 }
  0x3b   :  { %s2904_s28 = scalar_lea.hbm %s3630_s2, 144  ;;  %s2882_s9 = scalar_lea.hbm %s3630_s2, 256 }
  0x3c   :  { %p2881_p12 = scmp.ne.s32.totalorder %s3069_s8, %s2904_s28  ;;  %p2883_p13 = scmp.lt.u32.totalorder %s3069_s8, %s3630_s2 }
  0x3d   :  { %p2884_p0 = scmp.lt.u32.totalorder %s2882_s9, %s2904_s28  ;;  %p2886_p2 = scmp.lt.u32.totalorder %s2904_s28, %s3069_s8 }
  0x3f   :  { %p2885_p1 = por %p2884_p0, %p2883_p13 }
  0x41   :  { %p2887_p3 = por %p2886_p2, %p2885_p1 }
  0x43   :  { %p2888_p4 = pnand %p2887_p3, %p2881_p12 }
  0x45   :  { %2891 = shalt.err (!%p2888_p4)
}
  0x46   :  { %s2892_s0 = scalar_lea.vmem %s51_s23, 128  ;;  %p2897_p6 = scmp.lt.s32.totalorder %s51_s23, %s51_s23 }
  0x47   :  { %p2893_p5 = scmp.ne.s32.totalorder %s51_s23, %s2892_s0  ;;  %p2898_p7 = scmp.lt.s32.totalorder %s2892_s0, %s2892_s0 }
  0x49   :  { %p2899_p8 = por %p2898_p7, %p2897_p6 }
  0x4b   :  { %p2900_p9 = pnand %p2899_p8, %p2893_p5 }
  0x4d   :  { %2903 = shalt.err (!%p2900_p9)
}
  0x4e   :  { %56 = dma.hbm_to_vmem [thread:$0]  %s3069_s8, 128, %s51_s23, [#allocation10], %s2982_s10, %s2983_s11, %s2984_s12  }
  0x4f   :  { %s2905_s15 = scalar_lea.hbm %s3632_s4, 256 }
  0x50   :  { %p2906_p10 = scmp.ne.s32.totalorder %s3632_s4, %s2905_s15  ;;  %p2909_p11 = scmp.lt.u32.totalorder %s2905_s15, %s3632_s4 }
  0x52   :  { %p2911_p12 = pnand %p2909_p11, %p2906_p10 }
  0x54   :  { %2914 = shalt.err (!%p2911_p12)
}
  0x55   :  { %s2915_s16 = scalar_lea.vmem %s75_s25, 256  ;;  %p2920_p0 = scmp.lt.s32.totalorder %s75_s25, %s75_s25 }
  0x56   :  { %p2916_p13 = scmp.ne.s32.totalorder %s75_s25, %s2915_s16  ;;  %p2921_p1 = scmp.lt.s32.totalorder %s2915_s16, %s2915_s16 }
  0x58   :  { %p2922_p2 = por %p2921_p1, %p2920_p0 }
  0x5a   :  { %p2923_p3 = pnand %p2922_p2, %p2916_p13 }
  0x5c   :  { %2926 = shalt.err (!%p2923_p3)
}
  0x5d   :  { %80 = dma.hbm_to_vmem [thread:$0]  %s3632_s4, 256, %s75_s25, [#allocation13], %s2986_s1, %s2986_s1, %s2987_s22  }
  0x5e   :  { %2971 = dma.done.wait [#allocation7], 32  }
  0x5f   :  { %2972 = vsyncadd [#allocation7], 4294967264 }
  0x60   :  { %2973 = dma.done.wait [#allocation10], 256  }
  0x61   :  { %2974 = vsyncadd [#allocation10], 4294967040 }
  0x62   :  { %2975 = dma.done.wait [#allocation13], 512  }
  0x63   :  { %2976 = vsyncadd [#allocation13], 4294966784  ;;  %vm105_vm0 = vcmask 254976   ;;  %v2991_v0 = vmov 0.0   ;;  %v189_v1 = vlaneseq  ;;  %vm2992_vm1 = vmmov 0   ;;  %v2654_v6 = vld [vmem:[#allocation12] sm:$0xff]  }
  0x64   :  { %2507 = vmatprep.subr.bf16.mxu0 %v2991_v0  ;;  %2515 = vmatprep.subr.bf16.mxu1 %v2991_v0  ;;  %106 = vst.msk [vmem:[#allocation2] sm:$0x3] %vm105_vm0, %v2991_v0  ;;  %107 = vst.msk [vmem:[#allocation3] sm:$0x3] %vm105_vm0, %v2991_v0  ;;  %v2993_v2 = vmov 1983009808  }
  0x65   :  { %108 = vst.msk [vmem:[#allocation4] sm:$0x3] %vm105_vm0, %v2991_v0  ;;  %109 = vst.msk [vmem:[#allocation5] sm:$0x3] %vm105_vm0, %v2991_v0  ;;  %2511 = vmatprep.mubr.msk.bf16.mxu0 %vm2992_vm1, %v2991_v0  ;;  %2519 = vmatprep.mubr.msk.bf16.mxu1 %vm2992_vm1, %v2991_v0  ;;  %v187_v3 = vunpack.c.l.s4 %v2993_v2  ;;  %v190_v5 = vshrl.u32 %v189_v1, 7  ;;  %v2655_v7 = vld [vmem:[#allocation14] sm:$0xff]  }
  0x66   :  { %2508 = vmatpush3.bf16.msra.mxu0 %v2654_v6  ;;  %v2656_v9 = vld [vmem:[#allocation12 + $0x8] sm:$0xff]   ;;  %2516 = vmatpush3.bf16.msra.mxu1 %v2655_v7  ;;  %v2657_v10 = vld [vmem:[#allocation14 + $0x8] sm:$0xff]   ;;  %vm133_vm2 = vcmask 261120   ;;  %v112_v19 = vld [vmem:[#allocation9] sm:$0x1]  ;;  %v2994_v47 = vmov 0  }
  0x67   :  { %v188_v4 = vunpack.c.0.s8 %v187_v3  ;;  %2509 = vmatprep.subr.bf16.mxu0 %v2991_v0  ;;  %2517 = vmatprep.subr.bf16.mxu1 %v2991_v0  ;;  %v252_v20 = vld [vmem:[#allocation11 + $0x7] sm:$0x1]  ;;  %v115_v21 = vunpack.c.l.bf16 %v112_v19  ;;  %v3164_v56 = vld [vmem:[#allocation6] sm:$0x3]  ;;  %v2658_v61 = vld [vmem:[#allocation12] sm:$0xff]   ;;  %s2995_s4 = smov 96  }
  0x68   :  { %v256_v22 = vunpack.c.l.bf16 %v252_v20  ;;  %2653 = vset.pattern.permute.xlu1 %v2994_v47  ;;  %2652 = vset.pattern.permute.xlu0 %v2994_v47  ;;  %vm2383_vm3 = vcmp.gt.s32.totalorder %v3164_v56, 0  ;;  %vm2388_vm4 = vcmp.gt.s32.totalorder %v3164_v56, 7  ;;  %v2659_v62 = vld [vmem:[#allocation14] sm:$0xff]   ;;  %v2660_v63 = vld [vmem:[#allocation12 + $0x8] sm:$0xff]   ;;  %v2661_v3 = vld [vmem:[#allocation14 + $0x8] sm:$0xff]   ;;  %vm249_vm6 = vcmask 253952  }
  0x69   :  { %v3128_v8 = vsub.s32 %v188_v4, %v190_v5  ;;  %v3169_v58 = vsel %vm2383_vm3, 1, %v2994_v47  ;;  %v3175_v60 = vsel %vm2388_vm4, 1, %v2994_v47  ;;  %vm2393_vm8 = vcmp.gt.s32.totalorder %v3164_v56, 1 }
  0x6a   :  { %2510 = vmatpush3.bf16.msra.mxu0 %v2656_v9  ;;  %2518 = vmatpush3.bf16.msra.mxu1 %v2657_v10  ;;  %vm2398_vm9 = vcmp.gt.s32.totalorder %v3164_v56, 6  ;;  %vm2403_vm12 = vcmp.gt.s32.totalorder %v3164_v56, 2  ;;  %vm2408_vm13 = vcmp.gt.s32.totalorder %v3164_v56, 5  ;;  %vm2413_vm3 = vcmp.gt.s32.totalorder %v3164_v56, 3 }
  0x6b   :  { %v3132_v11 = vld [vmem:[#allocation2] sm:$0x3]  ;;  %v3136_v13 = vld [vmem:[#allocation3] sm:$0x3]  ;;  %2523 = vmatprep.subr.bf16.mxu0 %v2991_v0  ;;  %2531 = vmatprep.subr.bf16.mxu1 %v2991_v0  ;;  %vm2418_vm4 = vcmp.gt.s32.totalorder %v3164_v56, 4 }
  0x6c   :  { %v3134_v12 = vld [vmem:[#allocation4] sm:$0x3]  ;;  %v116_v14 = vpack.c.bf16 %v3132_v11, %v3132_v11  ;;  %v192_v15 = vrot.slane %v3136_v13, %v3128_v8  ;;  %v3142_v16 = vld [vmem:[#allocation5] sm:$0x3] }
  0x6d   :  { %v257_v17 = vpack.c.bf16 %v3134_v12, %v3134_v12  ;;  %v332_v18 = vrot.slane %v3142_v16, %v3128_v8 }
  0x6e   :  { %193 = vrot.lane.b32.xlu1 %v192_v15, %s2982_s10  ;;  %2512 = vmatmul.mubr.msk.bf16.vlgmr.msra.gmra.mrb[0].mxu0 %vm133_vm2, %v116_v14 }
  0x6f   :  { %2520 = vmatmul.mubr.msk.bf16.vlgmr.msra.gmra.mrb[0].mxu1 %vm133_vm2, %v257_v17  ;;  %2527 = vmatprep.mubr.msk.bf16.mxu0 %vm2992_vm1, %v2991_v0 }
  0x70   :  { %2535 = vmatprep.mubr.msk.bf16.mxu1 %vm2992_vm1, %v2991_v0  ;;  %2524 = vmatpush3.bf16.msra.mxu0 %v2658_v61 }
  0x71   :  { %2525 = vmatprep.subr.bf16.mxu0 %v2991_v0  ;;  %2532 = vmatpush3.bf16.msra.mxu1 %v2659_v62 }
  0x72   :  { %333 = vrot.lane.b32.xlu1 %v332_v18, %s2982_s10  ;;  %2533 = vmatprep.subr.bf16.mxu1 %v2991_v0 }
  0x74   :  { %2526 = vmatpush3.bf16.msra.mxu0 %v2660_v63 }
  0x75   :  { %2539 = vmatprep.subr.bf16.mxu0 %v2991_v0  ;;  %2534 = vmatpush3.bf16.msra.mxu1 %v2661_v3 }
  0x76   :  { %2547 = vmatprep.subr.bf16.mxu1 %v2991_v0 }
  0xe0   :  { %v194_v48 = vpop.permute.xlu1 %193 }
  0xe4   :  { %v334_v50 = vpop.permute.xlu1 %333 }
 0x141   :  { %v171_v23 = vpop.f32.mrb[0].mxu0 }
 0x142   :  { %v177_v24 = vadd.f32 %v171_v23, %v115_v21  ;;  %v2513_v25 = vpop.f32.mrb[1].mxu0  ;;  %v311_v26 = vpop.f32.mrb[0].mxu1 }
 0x143   :  { %v317_v27 = vadd.f32 %v311_v26, %v256_v22  ;;  %v174_v28 = vpop.f32.mrb[2].mxu0  ;;  %v2521_v29 = vpop.f32.mrb[1].mxu1 }
 0x144   :  { %v2514_v30 = vpop.f32.mrb[3].mxu0  ;;  %v314_v31 = vpop.f32.mrb[2].mxu1  ;;  %2686 = vtanh.f32 %v177_v24  ;;  %v2382_v35 = vmul.f32 -1.442695, %v177_v24 }
 0x145   :  { %v2522_v32 = vpop.f32.mrb[3].mxu1  ;;  %2688 = vtanh.f32 %v317_v27  ;;  %v2387_v36 = vmul.f32 -1.442695, %v317_v27  ;;  %v530_v31 = vld [vmem:[#allocation11 + $0x6] sm:$0x1] }
 0x146   :  { %2690 = vpow2.f32 %v2382_v35  ;;  %v534_v35 = vunpack.c.l.bf16 %v530_v31 }
 0x147   :  { %2692 = vpow2.f32 %v2387_v36 }
 0x14e   :  { %v2687_v33 = vpop.eup %2686 }
 0x14f   :  { %198 = vrot.lane.b32.xlu0 %v2687_v33, %s2986_s1  ;;  %v2689_v34 = vpop.eup %2688 }
 0x150   :  { %v2691_v37 = vpop.eup %2690 }
 0x151   :  { %v181_v38 = vadd.f32 1.0, %v2691_v37  ;;  %v2693_v39 = vpop.eup %2692 }
 0x152   :  { %v321_v40 = vadd.f32 1.0, %v2693_v39 }
 0x153   :  { %338 = vrot.lane.b32.xlu0 %v2689_v34, %s2986_s1  ;;  %2694 = vrcp.f32 %v181_v38 }
 0x154   :  { %2696 = vrcp.f32 %v321_v40 }
 0x15d   :  { %v2695_v41 = vpop.eup %2694 }
 0x15e   :  { %v2697_v44 = vpop.eup %2696  ;;  %v196_v49 = vmul.f32 %v2695_v41, %v194_v48 }
 0x15f   :  { %v336_v53 = vmul.f32 %v2697_v44, %v334_v50 }
 0x1c1   :  { %v199_v42 = vpop.permute.xlu0 %198 }
 0x1c2   :  { %v201_v43 = vmul.f32 %v2695_v41, %v199_v42 }
 0x1c4   :  { %203 = vrot.lane.b32.xlu0 %v201_v43, %s2982_s10 }
 0x1c5   :  { %v339_v45 = vpop.permute.xlu0 %338 }
 0x1c6   :  { %v341_v46 = vmul.f32 %v2697_v44, %v339_v45 }
 0x1c8   :  { %343 = vrot.lane.b32.xlu1 %v341_v46, %s2982_s10 }
 0x236   :  { %v204_v51 = vpop.permute.xlu0 %203 }
 0x237   :  { %v206_v52 = vadd.f32 %v204_v51, %v196_v49 }
 0x239   :  { %2698 = vtanh.f32 %v206_v52  ;;  %v241_v7 = vrot.slane %v206_v52, %v3128_v8 }
 0x23a   :  { %v344_v54 = vpop.permute.xlu1 %343 }
 0x23b   :  { %v346_v55 = vadd.f32 %v344_v54, %v336_v53 }
 0x23d   :  { %2700 = vtanh.f32 %v346_v55  ;;  %v380_v10 = vrot.slane %v346_v55, %v3128_v8 }
 0x243   :  { %v2699_v57 = vpop.eup %2698 }
 0x244   :  { %209 = vrot.lane.b32.xlu0 %v2699_v57, %s2986_s1 }
 0x247   :  { %v2701_v59 = vpop.eup %2700 }
 0x248   :  { %349 = vrot.lane.b32.xlu1 %v2701_v59, %s2986_s1  ;;  %217 = vperm.xlu0 %2652, %v3169_v58  }
 0x24c   :  { %357 = vperm.xlu1 %2653, %v3175_v60  }
 0x2b6   :  { %v210_v1 = vpop.permute.xlu0 %209 }
 0x2b7   :  { %v212_v2 = vmul.f32 %v2695_v41, %v210_v1 }
 0x2b9   :  { %v227_v4 = vrot.slane %v212_v2, %v3128_v8 }
 0x2ba   :  { %v350_v5 = vpop.permute.xlu1 %349 }
 0x2bb   :  { %v352_v6 = vmul.f32 %v2697_v44, %v350_v5  ;;  %228 = vrot.lane.b32.xlu1 %v227_v4, %s2982_s10 }
 0x2bd   :  { %v367_v9 = vrot.slane %v352_v6, %v3128_v8 }
 0x2bf   :  { %368 = vrot.lane.b32.xlu0 %v367_v9, %s2982_s10  ;;  %242 = vrot.lane.b32.xlu1 %v241_v7, %s2995_s4 }
 0x2c3   :  { %381 = vrot.lane.b32.xlu0 %v380_v10, %s2995_s4 }
 0x2c7   :  { %v218_v15 = vpop.permute.xlu0 %217 }
 0x2c8   :  { %vm219_vm5 = vcmp.eq.s32.totalorder %v218_v15, 1  ;;  %v3231_v15 = vsel %vm2393_vm8, 1, %v2994_v47 }
 0x2cb   :  { %v358_v14 = vpop.permute.xlu1 %357 }
 0x2cc   :  { %vm359_vm7 = vcmp.eq.s32.totalorder %v358_v14, 1 }
 0x32d   :  { %v229_v17 = vpop.permute.xlu1 %228 }
 0x32e   :  { %v231_v18 = vsel %vm219_vm5, %v229_v17, %v3132_v11  ;;  %v247_v19 = vsel %vm219_vm5, %v229_v17, 0.0 }
 0x32f   :  { %233 = vst.msk [vmem:[#allocation2] sm:$0x3] %vm105_vm0, %v231_v18  ;;  %v248_v20 = vpack.c.bf16 %v247_v19, %v247_v19  ;;  %v3237_v18 = vsel %vm2398_vm9, 1, %v2994_v47  ;;  %v2662_v19 = vld [vmem:[#allocation12] sm:$0xff]  }
 0x331   :  { %250 = vst.msk [vmem:[#allocation15] sm:$0x1] %vm249_vm6, %v248_v20  ;;  %v243_v21 = vpop.permute.xlu1 %242  ;;  %v369_v22 = vpop.permute.xlu0 %368  ;;  %v2663_v20 = vld [vmem:[#allocation14] sm:$0xff]  }
 0x332   :  { %v245_v23 = vsel %vm219_vm5, %v243_v21, %v3136_v13  ;;  %v371_v24 = vsel %vm359_vm7, %v369_v22, %v3134_v12  ;;  %v386_v25 = vsel %vm359_vm7, %v369_v22, 0.0  ;;  %v2664_v21 = vld [vmem:[#allocation12 + $0x8] sm:$0xff]  }
 0x333   :  { %246 = vst.msk [vmem:[#allocation3] sm:$0x3] %vm105_vm0, %v245_v23  ;;  %372 = vst.msk [vmem:[#allocation4] sm:$0x3] %vm105_vm0, %v371_v24  ;;  %v387_v26 = vpack.c.bf16 %v386_v25, %v386_v25  ;;  %v2665_v24 = vld [vmem:[#allocation14 + $0x8] sm:$0xff]  }
 0x335   :  { %389 = vst.msk [vmem:[#allocation16 + $0x7] sm:$0x1] %vm249_vm6, %v387_v26  ;;  %v382_v11 = vpop.permute.xlu0 %381 }
 0x336   :  { %v384_v27 = vsel %vm359_vm7, %v382_v11, %v3142_v16  ;;  %v3199_v28 = vld [vmem:[#allocation2] sm:$0x3]  ;;  %v391_v16 = vld [vmem:[#allocation9 + $0x1] sm:$0x1] }
 0x337   :  { %385 = vst.msk [vmem:[#allocation5] sm:$0x3] %vm105_vm0, %v384_v27  ;;  %v396_v13 = vpack.c.bf16 %v3199_v28, %v3199_v28  ;;  %v395_v30 = vunpack.c.l.bf16 %v391_v16 }
 0x339   :  { %2528 = vmatmul.mubr.msk.bf16.vlgmr.msra.gmra.mrb[4].mxu0 %vm133_vm2, %v396_v13 }
 0x33a   :  { %v3205_v12 = vld [vmem:[#allocation4] sm:$0x3]  ;;  %2543 = vmatprep.mubr.msk.bf16.mxu0 %vm2992_vm1, %v2991_v0  ;;  %v3214_v44 = vld [vmem:[#allocation3] sm:$0x3]  ;;  %2540 = vmatpush3.bf16.msra.mxu0 %v2662_v19 }
 0x33b   :  { %v535_v29 = vpack.c.bf16 %v3205_v12, %v3205_v12  ;;  %v471_v45 = vrot.slane %v3214_v44, %v3128_v8  ;;  %2541 = vmatprep.subr.bf16.mxu0 %v2991_v0 }
 0x33d   :  { %2536 = vmatmul.mubr.msk.bf16.vlgmr.msra.gmra.mrb[4].mxu1 %vm133_vm2, %v535_v29 }
 0x33e   :  { %2551 = vmatprep.mubr.msk.bf16.mxu1 %vm2992_vm1, %v2991_v0  ;;  %v3219_v48 = vld [vmem:[#allocation5] sm:$0x3]  ;;  %2548 = vmatpush3.bf16.msra.mxu1 %v2663_v20 }
 0x33f   :  { %v610_v49 = vrot.slane %v3219_v48, %v3128_v8  ;;  %2542 = vmatpush3.bf16.msra.mxu0 %v2664_v21  ;;  %2549 = vmatprep.subr.bf16.mxu1 %v2991_v0 }
 0x340   :  { %2555 = vmatprep.subr.bf16.mxu0 %v2991_v0 }
 0x342   :  { %2550 = vmatpush3.bf16.msra.mxu1 %v2665_v24 }
 0x343   :  { %2563 = vmatprep.subr.bf16.mxu1 %v2991_v0 }
 0x40c   :  { %v450_v32 = vpop.f32.mrb[4].mxu0 }
 0x40d   :  { %v456_v33 = vadd.f32 %v450_v32, %v395_v30  ;;  %v2529_v34 = vpop.f32.mrb[5].mxu0 }
 0x40e   :  { %v453_v36 = vpop.f32.mrb[6].mxu0 }
 0x40f   :  { %2702 = vtanh.f32 %v456_v33  ;;  %v2530_v37 = vpop.f32.mrb[7].mxu0  ;;  %v2392_v50 = vmul.f32 -1.442695, %v456_v33 }
 0x410   :  { %v589_v38 = vpop.f32.mrb[4].mxu1 }
 0x411   :  { %v595_v39 = vadd.f32 %v589_v38, %v534_v35  ;;  %v2537_v40 = vpop.f32.mrb[5].mxu1 }
 0x412   :  { %v592_v41 = vpop.f32.mrb[6].mxu1 }
 0x413   :  { %2704 = vtanh.f32 %v595_v39  ;;  %v2538_v42 = vpop.f32.mrb[7].mxu1  ;;  %v2397_v51 = vmul.f32 -1.442695, %v595_v39 }
 0x414   :  { %2706 = vpow2.f32 %v2392_v50 }
 0x415   :  { %2708 = vpow2.f32 %v2397_v51 }
 0x419   :  { %v2703_v43 = vpop.eup %2702 }
 0x41a   :  { %477 = vrot.lane.b32.xlu1 %v2703_v43, %s2986_s1 }
 0x41d   :  { %v2705_v46 = vpop.eup %2704 }
 0x41e   :  { %616 = vrot.lane.b32.xlu0 %v2705_v46, %s2986_s1  ;;  %472 = vrot.lane.b32.xlu1 %v471_v45, %s2982_s10  ;;  %v2707_v52 = vpop.eup %2706  ;;  %v669_v45 = vld [vmem:[#allocation9 + $0x2] sm:$0x1] }
 0x41f   :  { %v460_v53 = vadd.f32 1.0, %v2707_v52  ;;  %v2709_v54 = vpop.eup %2708  ;;  %v673_v46 = vunpack.c.l.bf16 %v669_v45 }
 0x420   :  { %v599_v55 = vadd.f32 1.0, %v2709_v54 }
 0x421   :  { %2710 = vrcp.f32 %v460_v53 }
 0x422   :  { %611 = vrot.lane.b32.xlu0 %v610_v49, %s2982_s10  ;;  %2712 = vrcp.f32 %v599_v55 }
 0x42b   :  { %v2711_v57 = vpop.eup %2710 }
 0x42c   :  { %v2713_v62 = vpop.eup %2712 }
 0x48c   :  { %v478_v59 = vpop.permute.xlu1 %477 }
 0x48d   :  { %v480_v61 = vmul.f32 %v2711_v57, %v478_v59 }
 0x48f   :  { %482 = vrot.lane.b32.xlu1 %v480_v61, %s2982_s10 }
 0x490   :  { %v617_v63 = vpop.permute.xlu0 %616  ;;  %v473_v2 = vpop.permute.xlu1 %472 }
 0x491   :  { %v619_v1 = vmul.f32 %v2713_v62, %v617_v63  ;;  %v475_v3 = vmul.f32 %v2711_v57, %v473_v2 }
 0x493   :  { %621 = vrot.lane.b32.xlu0 %v619_v1, %s2982_s10 }
 0x494   :  { %v612_v4 = vpop.permute.xlu0 %611 }
 0x495   :  { %v614_v7 = vmul.f32 %v2713_v62, %v612_v4 }
 0x501   :  { %v483_v5 = vpop.permute.xlu1 %482 }
 0x502   :  { %v485_v6 = vadd.f32 %v483_v5, %v475_v3 }
 0x504   :  { %2714 = vtanh.f32 %v485_v6  ;;  %v519_v27 = vrot.slane %v485_v6, %v3128_v8 }
 0x505   :  { %v622_v9 = vpop.permute.xlu0 %621 }
 0x506   :  { %v624_v10 = vadd.f32 %v622_v9, %v614_v7 }
 0x508   :  { %2716 = vtanh.f32 %v624_v10  ;;  %v658_v29 = vrot.slane %v624_v10, %v3128_v8 }
 0x50e   :  { %v2715_v14 = vpop.eup %2714 }
 0x50f   :  { %488 = vrot.lane.b32.xlu1 %v2715_v14, %s2986_s1 }
 0x512   :  { %v2717_v17 = vpop.eup %2716 }
 0x513   :  { %627 = vrot.lane.b32.xlu0 %v2717_v17, %s2986_s1  ;;  %496 = vperm.xlu1 %2653, %v3231_v15  }
 0x517   :  { %635 = vperm.xlu0 %2652, %v3237_v18  }
 0x581   :  { %v489_v22 = vpop.permute.xlu1 %488 }
 0x582   :  { %v491_v23 = vmul.f32 %v2711_v57, %v489_v22 }
 0x584   :  { %v506_v25 = vrot.slane %v491_v23, %v3128_v8 }
 0x585   :  { %v628_v26 = vpop.permute.xlu0 %627 }
 0x586   :  { %v630_v11 = vmul.f32 %v2713_v62, %v628_v26  ;;  %507 = vrot.lane.b32.xlu1 %v506_v25, %s2982_s10 }
 0x588   :  { %v645_v13 = vrot.slane %v630_v11, %v3128_v8 }
 0x58a   :  { %646 = vrot.lane.b32.xlu0 %v645_v13, %s2982_s10  ;;  %520 = vrot.lane.b32.xlu1 %v519_v27, %s2995_s4 }
 0x58e   :  { %659 = vrot.lane.b32.xlu0 %v658_v29, %s2995_s4 }
 0x592   :  { %v497_v16 = vpop.permute.xlu1 %496 }
 0x593   :  { %vm498_vm10 = vcmp.eq.s32.totalorder %v497_v16, 1 }
 0x596   :  { %v636_v30 = vpop.permute.xlu0 %635 }
 0x597   :  { %vm637_vm11 = vcmp.eq.s32.totalorder %v636_v30, 1 }
 0x5f8   :  { %v508_v31 = vpop.permute.xlu1 %507 }
 0x5f9   :  { %v510_v32 = vsel %vm498_vm10, %v508_v31, %v3199_v28  ;;  %v525_v33 = vsel %vm498_vm10, %v508_v31, 0.0 }
 0x5fa   :  { %511 = vst.msk [vmem:[#allocation2] sm:$0x3] %vm105_vm0, %v510_v32  ;;  %v526_v34 = vpack.c.bf16 %v525_v33, %v525_v33  ;;  %v3293_v32 = vsel %vm2403_vm12, 1, %v2994_v47 }
 0x5fc   :  { %528 = vst.msk [vmem:[#allocation15 + $0x1] sm:$0x1] %vm249_vm6, %v526_v34  ;;  %v647_v35 = vpop.permute.xlu0 %646  ;;  %v521_v36 = vpop.permute.xlu1 %520  ;;  %v3299_v34 = vsel %vm2408_vm13, 1, %v2994_v47 }
 0x5fd   :  { %v649_v37 = vsel %vm637_vm11, %v647_v35, %v3205_v12  ;;  %v664_v38 = vsel %vm637_vm11, %v647_v35, 0.0  ;;  %v523_v39 = vsel %vm498_vm10, %v521_v36, %v3214_v44  ;;  %v2666_v35 = vld [vmem:[#allocation12] sm:$0xff]   ;;  %v2667_v36 = vld [vmem:[#allocation14] sm:$0xff]  }
 0x5fe   :  { %650 = vst.msk [vmem:[#allocation4] sm:$0x3] %vm105_vm0, %v649_v37  ;;  %v665_v40 = vpack.c.bf16 %v664_v38, %v664_v38  ;;  %524 = vst.msk [vmem:[#allocation3] sm:$0x3] %vm105_vm0, %v523_v39  ;;  %v2668_v37 = vld [vmem:[#allocation12 + $0x8] sm:$0xff]  }
 0x600   :  { %667 = vst.msk [vmem:[#allocation16 + $0x6] sm:$0x1] %vm249_vm6, %v665_v40  ;;  %v660_v28 = vpop.permute.xlu0 %659  ;;  %v2669_v40 = vld [vmem:[#allocation14 + $0x8] sm:$0xff]  }
 0x601   :  { %v662_v41 = vsel %vm637_vm11, %v660_v28, %v3219_v48  ;;  %v3261_v42 = vld [vmem:[#allocation2] sm:$0x3]  ;;  %v808_v48 = vld [vmem:[#allocation11 + $0x5] sm:$0x1] }
 0x602   :  { %663 = vst.msk [vmem:[#allocation5] sm:$0x3] %vm105_vm0, %v662_v41  ;;  %v674_v12 = vpack.c.bf16 %v3261_v42, %v3261_v42  ;;  %v812_v52 = vunpack.c.l.bf16 %v808_v48 }
 0x604   :  { %2544 = vmatmul.mubr.msk.bf16.vlgmr.msra.gmra.mrb[8].mxu0 %vm133_vm2, %v674_v12 }
 0x605   :  { %v3267_v43 = vld [vmem:[#allocation4] sm:$0x3]  ;;  %2559 = vmatprep.mubr.msk.bf16.mxu0 %vm2992_vm1, %v2991_v0  ;;  %v3276_v1 = vld [vmem:[#allocation3] sm:$0x3]  ;;  %2556 = vmatpush3.bf16.msra.mxu0 %v2666_v35 }
 0x606   :  { %v813_v44 = vpack.c.bf16 %v3267_v43, %v3267_v43  ;;  %v749_v2 = vrot.slane %v3276_v1, %v3128_v8  ;;  %2557 = vmatprep.subr.bf16.mxu0 %v2991_v0 }
 0x608   :  { %2552 = vmatmul.mubr.msk.bf16.vlgmr.msra.gmra.mrb[8].mxu1 %vm133_vm2, %v813_v44 }
 0x609   :  { %2567 = vmatprep.mubr.msk.bf16.mxu1 %vm2992_vm1, %v2991_v0  ;;  %v3281_v4 = vld [vmem:[#allocation5] sm:$0x3]  ;;  %2564 = vmatpush3.bf16.msra.mxu1 %v2667_v36 }
 0x60a   :  { %v888_v5 = vrot.slane %v3281_v4, %v3128_v8  ;;  %2558 = vmatpush3.bf16.msra.mxu0 %v2668_v37  ;;  %2565 = vmatprep.subr.bf16.mxu1 %v2991_v0 }
 0x60b   :  { %2571 = vmatprep.subr.bf16.mxu0 %v2991_v0 }
 0x60d   :  { %2566 = vmatpush3.bf16.msra.mxu1 %v2669_v40 }
 0x60e   :  { %2579 = vmatprep.subr.bf16.mxu1 %v2991_v0 }
 0x6d7   :  { %v728_v49 = vpop.f32.mrb[8].mxu0 }
 0x6d8   :  { %v734_v50 = vadd.f32 %v728_v49, %v673_v46  ;;  %v2545_v51 = vpop.f32.mrb[9].mxu0 }
 0x6d9   :  { %v731_v53 = vpop.f32.mrb[10].mxu0 }
 0x6da   :  { %2718 = vtanh.f32 %v734_v50  ;;  %v2546_v54 = vpop.f32.mrb[11].mxu0  ;;  %v2402_v6 = vmul.f32 -1.442695, %v734_v50 }
 0x6db   :  { %v867_v55 = vpop.f32.mrb[8].mxu1 }
 0x6dc   :  { %v873_v57 = vadd.f32 %v867_v55, %v812_v52  ;;  %v2553_v59 = vpop.f32.mrb[9].mxu1 }
 0x6dd   :  { %v870_v61 = vpop.f32.mrb[10].mxu1 }
 0x6de   :  { %2720 = vtanh.f32 %v873_v57  ;;  %v2554_v62 = vpop.f32.mrb[11].mxu1  ;;  %v2407_v7 = vmul.f32 -1.442695, %v873_v57 }
 0x6df   :  { %2722 = vpow2.f32 %v2402_v6  ;;  %v1086_v6 = vld [vmem:[#allocation11 + $0x4] sm:$0x1] }
 0x6e0   :  { %2724 = vpow2.f32 %v2407_v7 }
 0x6e4   :  { %v2719_v63 = vpop.eup %2718 }
 0x6e5   :  { %755 = vrot.lane.b32.xlu1 %v2719_v63, %s2986_s1 }
 0x6e8   :  { %v2721_v3 = vpop.eup %2720 }
 0x6e9   :  { %894 = vrot.lane.b32.xlu0 %v2721_v3, %s2986_s1  ;;  %750 = vrot.lane.b32.xlu1 %v749_v2, %s2982_s10  ;;  %v2723_v9 = vpop.eup %2722 }
 0x6ea   :  { %v738_v10 = vadd.f32 1.0, %v2723_v9  ;;  %v2725_v14 = vpop.eup %2724 }
 0x6eb   :  { %v877_v17 = vadd.f32 1.0, %v2725_v14  ;;  %v1090_v14 = vunpack.c.l.bf16 %v1086_v6 }
 0x6ec   :  { %2726 = vrcp.f32 %v738_v10 }
 0x6ed   :  { %889 = vrot.lane.b32.xlu0 %v888_v5, %s2982_s10  ;;  %2728 = vrcp.f32 %v877_v17 }
 0x6f6   :  { %v2727_v19 = vpop.eup %2726 }
 0x6f7   :  { %v2729_v22 = vpop.eup %2728 }
 0x757   :  { %v756_v20 = vpop.permute.xlu1 %755 }
 0x758   :  { %v758_v21 = vmul.f32 %v2727_v19, %v756_v20 }
 0x75a   :  { %760 = vrot.lane.b32.xlu1 %v758_v21, %s2982_s10 }
 0x75b   :  { %v895_v23 = vpop.permute.xlu0 %894  ;;  %v751_v25 = vpop.permute.xlu1 %750 }
 0x75c   :  { %v897_v24 = vmul.f32 %v2729_v22, %v895_v23  ;;  %v753_v26 = vmul.f32 %v2727_v19, %v751_v25 }
 0x75e   :  { %899 = vrot.lane.b32.xlu0 %v897_v24, %s2982_s10 }
 0x75f   :  { %v890_v11 = vpop.permute.xlu0 %889 }
 0x760   :  { %v892_v29 = vmul.f32 %v2729_v22, %v890_v11 }
 0x7cc   :  { %v761_v27 = vpop.permute.xlu1 %760 }
 0x7cd   :  { %v763_v13 = vadd.f32 %v761_v27, %v753_v26 }
 0x7cf   :  { %2730 = vtanh.f32 %v763_v13  ;;  %v797_v44 = vrot.slane %v763_v13, %v3128_v8 }
 0x7d0   :  { %v900_v16 = vpop.permute.xlu0 %899 }
 0x7d1   :  { %v902_v30 = vadd.f32 %v900_v16, %v892_v29 }
 0x7d3   :  { %2732 = vtanh.f32 %v902_v30  ;;  %v936_v46 = vrot.slane %v902_v30, %v3128_v8 }
 0x7d9   :  { %v2731_v31 = vpop.eup %2730 }
 0x7da   :  { %766 = vrot.lane.b32.xlu1 %v2731_v31, %s2986_s1 }
 0x7dd   :  { %v2733_v33 = vpop.eup %2732 }
 0x7de   :  { %905 = vrot.lane.b32.xlu0 %v2733_v33, %s2986_s1  ;;  %774 = vperm.xlu1 %2653, %v3293_v32  }
 0x7e2   :  { %913 = vperm.xlu0 %2652, %v3299_v34  }
 0x84c   :  { %v767_v38 = vpop.permute.xlu1 %766 }
 0x84d   :  { %v769_v39 = vmul.f32 %v2727_v19, %v767_v38 }
 0x84f   :  { %v784_v28 = vrot.slane %v769_v39, %v3128_v8 }
 0x850   :  { %v906_v41 = vpop.permute.xlu0 %905 }
 0x851   :  { %v908_v12 = vmul.f32 %v2729_v22, %v906_v41  ;;  %785 = vrot.lane.b32.xlu1 %v784_v28, %s2982_s10 }
 0x853   :  { %v923_v45 = vrot.slane %v908_v12, %v3128_v8 }
 0x855   :  { %924 = vrot.lane.b32.xlu0 %v923_v45, %s2982_s10  ;;  %798 = vrot.lane.b32.xlu1 %v797_v44, %s2995_s4 }
 0x859   :  { %937 = vrot.lane.b32.xlu0 %v936_v46, %s2995_s4 }
 0x85d   :  { %v775_v48 = vpop.permute.xlu1 %774 }
 0x85e   :  { %vm776_vm14 = vcmp.eq.s32.totalorder %v775_v48, 1 }
 0x861   :  { %v914_v49 = vpop.permute.xlu0 %913 }
 0x862   :  { %vm915_vm15 = vcmp.eq.s32.totalorder %v914_v49, 1 }
 0x8c3   :  { %v786_v50 = vpop.permute.xlu1 %785 }
 0x8c4   :  { %v788_v51 = vsel %vm776_vm14, %v786_v50, %v3261_v42  ;;  %v803_v52 = vsel %vm776_vm14, %v786_v50, 0.0 }
 0x8c5   :  { %789 = vst.msk [vmem:[#allocation2] sm:$0x3] %vm105_vm0, %v788_v51  ;;  %v804_v53 = vpack.c.bf16 %v803_v52, %v803_v52 }
 0x8c7   :  { %806 = vst.msk [vmem:[#allocation15 + $0x2] sm:$0x1] %vm249_vm6, %v804_v53  ;;  %v925_v54 = vpop.permute.xlu0 %924  ;;  %v799_v55 = vpop.permute.xlu1 %798  ;;  %v3355_v53 = vsel %vm2413_vm3, 1, %v2994_v47 }
 0x8c8   :  { %v927_v57 = vsel %vm915_vm15, %v925_v54, %v3267_v43  ;;  %v942_v59 = vsel %vm915_vm15, %v925_v54, 0.0  ;;  %v801_v61 = vsel %vm776_vm14, %v799_v55, %v3276_v1  ;;  %v3361_v55 = vsel %vm2418_vm4, 1, %v2994_v47 }
 0x8c9   :  { %928 = vst.msk [vmem:[#allocation4] sm:$0x3] %vm105_vm0, %v927_v57  ;;  %v943_v62 = vpack.c.bf16 %v942_v59, %v942_v59  ;;  %802 = vst.msk [vmem:[#allocation3] sm:$0x3] %vm105_vm0, %v801_v61  ;;  %v2670_v57 = vld [vmem:[#allocation12] sm:$0xff]   ;;  %v2671_v59 = vld [vmem:[#allocation14] sm:$0xff]  }
 0x8ca   :  { %v2672_v61 = vld [vmem:[#allocation12 + $0x8] sm:$0xff]  }
 0x8cb   :  { %945 = vst.msk [vmem:[#allocation16 + $0x5] sm:$0x1] %vm249_vm6, %v943_v62  ;;  %v938_v42 = vpop.permute.xlu0 %937 }
 0x8cc   :  { %v940_v63 = vsel %vm915_vm15, %v938_v42, %v3281_v4  ;;  %v3323_v2 = vld [vmem:[#allocation2] sm:$0x3]  ;;  %v947_v4 = vld [vmem:[#allocation9 + $0x3] sm:$0x1]  ;;  %v2673_v42 = vld [vmem:[#allocation14 + $0x8] sm:$0xff]  }
 0x8cd   :  { %941 = vst.msk [vmem:[#allocation5] sm:$0x3] %vm105_vm0, %v940_v63  ;;  %v952_v43 = vpack.c.bf16 %v3323_v2, %v3323_v2  ;;  %v951_v5 = vunpack.c.l.bf16 %v947_v4 }
 0x8cf   :  { %2560 = vmatmul.mubr.msk.bf16.vlgmr.msra.gmra.mrb[12].mxu0 %vm133_vm2, %v952_v43 }
 0x8d0   :  { %v3329_v1 = vld [vmem:[#allocation4] sm:$0x3]  ;;  %2575 = vmatprep.mubr.msk.bf16.mxu0 %vm2992_vm1, %v2991_v0  ;;  %v3338_v26 = vld [vmem:[#allocation3] sm:$0x3]  ;;  %2572 = vmatpush3.bf16.msra.mxu0 %v2670_v57 }
 0x8d1   :  { %v1091_v3 = vpack.c.bf16 %v3329_v1, %v3329_v1  ;;  %v1027_v11 = vrot.slane %v3338_v26, %v3128_v8  ;;  %2573 = vmatprep.subr.bf16.mxu0 %v2991_v0 }
 0x8d3   :  { %2568 = vmatmul.mubr.msk.bf16.vlgmr.msra.gmra.mrb[12].mxu1 %vm133_vm2, %v1091_v3 }
 0x8d4   :  { %2583 = vmatprep.mubr.msk.bf16.mxu1 %vm2992_vm1, %v2991_v0  ;;  %v3343_v13 = vld [vmem:[#allocation5] sm:$0x3]  ;;  %2580 = vmatpush3.bf16.msra.mxu1 %v2671_v59 }
 0x8d5   :  { %v1166_v29 = vrot.slane %v3343_v13, %v3128_v8  ;;  %2574 = vmatpush3.bf16.msra.mxu0 %v2672_v61  ;;  %2581 = vmatprep.subr.bf16.mxu1 %v2991_v0 }
 0x8d6   :  { %2587 = vmatprep.subr.bf16.mxu0 %v2991_v0 }
 0x8d8   :  { %2582 = vmatpush3.bf16.msra.mxu1 %v2673_v42 }
 0x8d9   :  { %2595 = vmatprep.subr.bf16.mxu1 %v2991_v0 }
 0x9a2   :  { %v1006_v7 = vpop.f32.mrb[12].mxu0 }
 0x9a3   :  { %v1012_v9 = vadd.f32 %v1006_v7, %v951_v5  ;;  %v2561_v10 = vpop.f32.mrb[13].mxu0 }
 0x9a4   :  { %v1009_v17 = vpop.f32.mrb[14].mxu0 }
 0x9a5   :  { %2734 = vtanh.f32 %v1012_v9  ;;  %v2562_v19 = vpop.f32.mrb[15].mxu0  ;;  %v2412_v16 = vmul.f32 -1.442695, %v1012_v9 }
 0x9a6   :  { %v1145_v20 = vpop.f32.mrb[12].mxu1 }
 0x9a7   :  { %v1151_v21 = vadd.f32 %v1145_v20, %v1090_v14  ;;  %v2569_v22 = vpop.f32.mrb[13].mxu1 }
 0x9a8   :  { %v1148_v23 = vpop.f32.mrb[14].mxu1 }
 0x9a9   :  { %2736 = vtanh.f32 %v1151_v21  ;;  %v2570_v24 = vpop.f32.mrb[15].mxu1  ;;  %v2417_v30 = vmul.f32 -1.442695, %v1151_v21 }
 0x9aa   :  { %2738 = vpow2.f32 %v2412_v16  ;;  %v1364_v16 = vld [vmem:[#allocation11 + $0x3] sm:$0x1] }
 0x9ab   :  { %2740 = vpow2.f32 %v2417_v30 }
 0x9af   :  { %v2735_v25 = vpop.eup %2734 }
 0x9b0   :  { %1033 = vrot.lane.b32.xlu1 %v2735_v25, %s2986_s1 }
 0x9b3   :  { %v2737_v27 = vpop.eup %2736 }
 0x9b4   :  { %1172 = vrot.lane.b32.xlu0 %v2737_v27, %s2986_s1  ;;  %1028 = vrot.lane.b32.xlu1 %v1027_v11, %s2982_s10  ;;  %v2739_v31 = vpop.eup %2738 }
 0x9b5   :  { %v1016_v33 = vadd.f32 1.0, %v2739_v31  ;;  %v2741_v35 = vpop.eup %2740 }
 0x9b6   :  { %v1155_v36 = vadd.f32 1.0, %v2741_v35  ;;  %v1368_v35 = vunpack.c.l.bf16 %v1364_v16 }
 0x9b7   :  { %2742 = vrcp.f32 %v1016_v33 }
 0x9b8   :  { %1167 = vrot.lane.b32.xlu0 %v1166_v29, %s2982_s10  ;;  %2744 = vrcp.f32 %v1155_v36 }
 0x9c1   :  { %v2743_v37 = vpop.eup %2742 }
 0x9c2   :  { %v2745_v40 = vpop.eup %2744 }
 0xa22   :  { %v1034_v38 = vpop.permute.xlu1 %1033 }
 0xa23   :  { %v1036_v39 = vmul.f32 %v2743_v37, %v1034_v38 }
 0xa25   :  { %1038 = vrot.lane.b32.xlu1 %v1036_v39, %s2982_s10 }
 0xa26   :  { %v1173_v28 = vpop.permute.xlu0 %1172  ;;  %v1029_v12 = vpop.permute.xlu1 %1028 }
 0xa27   :  { %v1175_v41 = vmul.f32 %v2745_v40, %v1173_v28  ;;  %v1031_v44 = vmul.f32 %v2743_v37, %v1029_v12 }
 0xa29   :  { %1177 = vrot.lane.b32.xlu0 %v1175_v41, %s2982_s10 }
 0xa2a   :  { %v1168_v45 = vpop.permute.xlu0 %1167 }
 0xa2b   :  { %v1170_v49 = vmul.f32 %v2745_v40, %v1168_v45 }
 0xa97   :  { %v1039_v46 = vpop.permute.xlu1 %1038 }
 0xa98   :  { %v1041_v48 = vadd.f32 %v1039_v46, %v1031_v44 }
 0xa9a   :  { %2746 = vtanh.f32 %v1041_v48  ;;  %v1075_v3 = vrot.slane %v1041_v48, %v3128_v8 }
 0xa9b   :  { %v1178_v50 = vpop.permute.xlu0 %1177 }
 0xa9c   :  { %v1180_v51 = vadd.f32 %v1178_v50, %v1170_v49 }
 0xa9e   :  { %2748 = vtanh.f32 %v1180_v51  ;;  %v1214_v5 = vrot.slane %v1180_v51, %v3128_v8 }
 0xaa4   :  { %v2747_v52 = vpop.eup %2746 }
 0xaa5   :  { %1044 = vrot.lane.b32.xlu1 %v2747_v52, %s2986_s1 }
 0xaa8   :  { %v2749_v54 = vpop.eup %2748 }
 0xaa9   :  { %1183 = vrot.lane.b32.xlu0 %v2749_v54, %s2986_s1  ;;  %1052 = vperm.xlu1 %2653, %v3355_v53  }
 0xaad   :  { %1191 = vperm.xlu0 %2652, %v3361_v55  }
 0xb17   :  { %v1045_v62 = vpop.permute.xlu1 %1044 }
 0xb18   :  { %v1047_v56 = vmul.f32 %v2743_v37, %v1045_v62 }
 0xb1a   :  { %v1062_v47 = vrot.slane %v1047_v56, %v3128_v8 }
 0xb1b   :  { %v1184_v63 = vpop.permute.xlu0 %1183 }
 0xb1c   :  { %v1186_v43 = vmul.f32 %v2745_v40, %v1184_v63  ;;  %1063 = vrot.lane.b32.xlu1 %v1062_v47, %s2982_s10 }
 0xb1e   :  { %v1201_v4 = vrot.slane %v1186_v43, %v3128_v8 }
 0xb20   :  { %1202 = vrot.lane.b32.xlu0 %v1201_v4, %s2982_s10  ;;  %1076 = vrot.lane.b32.xlu1 %v1075_v3, %s2995_s4 }
 0xb24   :  { %1215 = vrot.lane.b32.xlu0 %v1214_v5, %s2995_s4 }
 0xb28   :  { %v1053_v6 = vpop.permute.xlu1 %1052 }
 0xb29   :  { %vm1054_vm5 = vcmp.eq.s32.totalorder %v1053_v6, 1 }
 0xb2c   :  { %v1192_v7 = vpop.permute.xlu0 %1191 }
 0xb2d   :  { %vm1193_vm7 = vcmp.eq.s32.totalorder %v1192_v7, 1 }
 0xb8e   :  { %v1064_v9 = vpop.permute.xlu1 %1063 }
 0xb8f   :  { %v1066_v10 = vsel %vm1054_vm5, %v1064_v9, %v3323_v2  ;;  %v1081_v14 = vsel %vm1054_vm5, %v1064_v9, 0.0 }
 0xb90   :  { %1067 = vst.msk [vmem:[#allocation2] sm:$0x3] %vm105_vm0, %v1066_v10  ;;  %v1082_v17 = vpack.c.bf16 %v1081_v14, %v1081_v14 }
 0xb92   :  { %1084 = vst.msk [vmem:[#allocation15 + $0x3] sm:$0x1] %vm249_vm6, %v1082_v17  ;;  %v1203_v19 = vpop.permute.xlu0 %1202  ;;  %v1077_v20 = vpop.permute.xlu1 %1076 }
 0xb93   :  { %v1205_v21 = vsel %vm1193_vm7, %v1203_v19, %v3329_v1  ;;  %v1220_v22 = vsel %vm1193_vm7, %v1203_v19, 0.0  ;;  %v1079_v23 = vsel %vm1054_vm5, %v1077_v20, %v3338_v26  ;;  %v2674_v19 = vld [vmem:[#allocation12] sm:$0xff]   ;;  %v2675_v20 = vld [vmem:[#allocation14] sm:$0xff]  }
 0xb94   :  { %1206 = vst.msk [vmem:[#allocation4] sm:$0x3] %vm105_vm0, %v1205_v21  ;;  %v1221_v24 = vpack.c.bf16 %v1220_v22, %v1220_v22  ;;  %1080 = vst.msk [vmem:[#allocation3] sm:$0x3] %vm105_vm0, %v1079_v23  ;;  %v2676_v21 = vld [vmem:[#allocation12 + $0x8] sm:$0xff]  }
 0xb96   :  { %1223 = vst.msk [vmem:[#allocation16 + $0x4] sm:$0x1] %vm249_vm6, %v1221_v24  ;;  %v1216_v2 = vpop.permute.xlu0 %1215  ;;  %v2677_v24 = vld [vmem:[#allocation14 + $0x8] sm:$0xff]  }
 0xb97   :  { %v1218_v25 = vsel %vm1193_vm7, %v1216_v2, %v3343_v13  ;;  %v3385_v11 = vld [vmem:[#allocation2] sm:$0x3]  ;;  %v1225_v13 = vld [vmem:[#allocation9 + $0x4] sm:$0x1] }
 0xb98   :  { %1219 = vst.msk [vmem:[#allocation5] sm:$0x3] %vm105_vm0, %v1218_v25  ;;  %v1230_v1 = vpack.c.bf16 %v3385_v11, %v3385_v11  ;;  %v1229_v29 = vunpack.c.l.bf16 %v1225_v13 }
 0xb9a   :  { %2576 = vmatmul.mubr.msk.bf16.vlgmr.msra.gmra.mrb[16].mxu0 %vm133_vm2, %v1230_v1 }
 0xb9b   :  { %v3391_v26 = vld [vmem:[#allocation4] sm:$0x3]  ;;  %2591 = vmatprep.mubr.msk.bf16.mxu0 %vm2992_vm1, %v2991_v0  ;;  %v3400_v44 = vld [vmem:[#allocation3] sm:$0x3]  ;;  %2588 = vmatpush3.bf16.msra.mxu0 %v2674_v19 }
 0xb9c   :  { %v1369_v27 = vpack.c.bf16 %v3391_v26, %v3391_v26  ;;  %v1305_v45 = vrot.slane %v3400_v44, %v3128_v8  ;;  %2589 = vmatprep.subr.bf16.mxu0 %v2991_v0 }
 0xb9e   :  { %2584 = vmatmul.mubr.msk.bf16.vlgmr.msra.gmra.mrb[16].mxu1 %vm133_vm2, %v1369_v27 }
 0xb9f   :  { %2599 = vmatprep.mubr.msk.bf16.mxu1 %vm2992_vm1, %v2991_v0  ;;  %v3405_v48 = vld [vmem:[#allocation5] sm:$0x3]  ;;  %2596 = vmatpush3.bf16.msra.mxu1 %v2675_v20 }
 0xba0   :  { %v1444_v49 = vrot.slane %v3405_v48, %v3128_v8  ;;  %2590 = vmatpush3.bf16.msra.mxu0 %v2676_v21  ;;  %2597 = vmatprep.subr.bf16.mxu1 %v2991_v0 }
 0xba1   :  { %2603 = vmatprep.subr.bf16.mxu0 %v2991_v0 }
 0xba3   :  { %2598 = vmatpush3.bf16.msra.mxu1 %v2677_v24 }
 0xba4   :  { %2611 = vmatprep.subr.bf16.mxu1 %v2991_v0 }
 0xc6d   :  { %v1284_v30 = vpop.f32.mrb[16].mxu0 }
 0xc6e   :  { %v1290_v31 = vadd.f32 %v1284_v30, %v1229_v29  ;;  %v2577_v33 = vpop.f32.mrb[17].mxu0 }
 0xc6f   :  { %v1287_v36 = vpop.f32.mrb[18].mxu0 }
 0xc70   :  { %2750 = vtanh.f32 %v1290_v31  ;;  %v2578_v37 = vpop.f32.mrb[19].mxu0  ;;  %v2422_v50 = vmul.f32 -1.442695, %v1290_v31 }
 0xc71   :  { %v1423_v38 = vpop.f32.mrb[16].mxu1 }
 0xc72   :  { %v1429_v39 = vadd.f32 %v1423_v38, %v1368_v35  ;;  %v2585_v40 = vpop.f32.mrb[17].mxu1 }
 0xc73   :  { %v1426_v28 = vpop.f32.mrb[18].mxu1 }
 0xc74   :  { %2752 = vtanh.f32 %v1429_v39  ;;  %v2586_v41 = vpop.f32.mrb[19].mxu1  ;;  %v2427_v51 = vmul.f32 -1.442695, %v1429_v39 }
 0xc75   :  { %2754 = vpow2.f32 %v2422_v50 }
 0xc76   :  { %2756 = vpow2.f32 %v2427_v51 }
 0xc7a   :  { %v2751_v12 = vpop.eup %2750 }
 0xc7b   :  { %1311 = vrot.lane.b32.xlu1 %v2751_v12, %s2986_s1 }
 0xc7e   :  { %v2753_v46 = vpop.eup %2752 }
 0xc7f   :  { %1450 = vrot.lane.b32.xlu0 %v2753_v46, %s2986_s1  ;;  %1306 = vrot.lane.b32.xlu1 %v1305_v45, %s2982_s10  ;;  %v2755_v52 = vpop.eup %2754  ;;  %v1503_v45 = vld [vmem:[#allocation9 + $0x5] sm:$0x1] }
 0xc80   :  { %v1294_v54 = vadd.f32 1.0, %v2755_v52  ;;  %v2757_v57 = vpop.eup %2756  ;;  %v1507_v46 = vunpack.c.l.bf16 %v1503_v45 }
 0xc81   :  { %v1433_v59 = vadd.f32 1.0, %v2757_v57 }
 0xc82   :  { %2758 = vrcp.f32 %v1294_v54 }
 0xc83   :  { %1445 = vrot.lane.b32.xlu0 %v1444_v49, %s2982_s10  ;;  %2760 = vrcp.f32 %v1433_v59 }
 0xc8c   :  { %v2759_v61 = vpop.eup %2758 }
 0xc8d   :  { %v2761_v42 = vpop.eup %2760 }
 0xced   :  { %v1312_v62 = vpop.permute.xlu1 %1311 }
 0xcee   :  { %v1314_v56 = vmul.f32 %v2759_v61, %v1312_v62 }
 0xcf0   :  { %1316 = vrot.lane.b32.xlu1 %v1314_v56, %s2982_s10 }
 0xcf1   :  { %v1451_v47 = vpop.permute.xlu0 %1450  ;;  %v1307_v43 = vpop.permute.xlu1 %1306 }
 0xcf2   :  { %v1453_v63 = vmul.f32 %v2761_v42, %v1451_v47  ;;  %v1309_v3 = vmul.f32 %v2759_v61, %v1307_v43 }
 0xcf4   :  { %1455 = vrot.lane.b32.xlu0 %v1453_v63, %s2982_s10 }
 0xcf5   :  { %v1446_v4 = vpop.permute.xlu0 %1445 }
 0xcf6   :  { %v1448_v7 = vmul.f32 %v2761_v42, %v1446_v4 }
 0xd62   :  { %v1317_v5 = vpop.permute.xlu1 %1316 }
 0xd63   :  { %v1319_v6 = vadd.f32 %v1317_v5, %v1309_v3 }
 0xd65   :  { %2762 = vtanh.f32 %v1319_v6  ;;  %v1353_v25 = vrot.slane %v1319_v6, %v3128_v8 }
 0xd66   :  { %v1456_v9 = vpop.permute.xlu0 %1455 }
 0xd67   :  { %v1458_v10 = vadd.f32 %v1456_v9, %v1448_v7 }
 0xd69   :  { %2764 = vtanh.f32 %v1458_v10  ;;  %v1492_v27 = vrot.slane %v1458_v10, %v3128_v8 }
 0xd6f   :  { %v2763_v14 = vpop.eup %2762 }
 0xd70   :  { %1322 = vrot.lane.b32.xlu1 %v2763_v14, %s2986_s1 }
 0xd73   :  { %v2765_v17 = vpop.eup %2764 }
 0xd74   :  { %1461 = vrot.lane.b32.xlu0 %v2765_v17, %s2986_s1  ;;  %1330 = vperm.xlu1 %2653, %v3361_v55  }
 0xd78   :  { %1469 = vperm.xlu0 %2652, %v3355_v53  }
 0xde2   :  { %v1323_v22 = vpop.permute.xlu1 %1322 }
 0xde3   :  { %v1325_v23 = vmul.f32 %v2759_v61, %v1323_v22 }
 0xde5   :  { %v1340_v2 = vrot.slane %v1325_v23, %v3128_v8 }
 0xde6   :  { %v1462_v55 = vpop.permute.xlu0 %1461 }
 0xde7   :  { %v1464_v53 = vmul.f32 %v2761_v42, %v1462_v55  ;;  %1341 = vrot.lane.b32.xlu1 %v1340_v2, %s2982_s10 }
 0xde9   :  { %v1479_v1 = vrot.slane %v1464_v53, %v3128_v8 }
 0xdeb   :  { %1480 = vrot.lane.b32.xlu0 %v1479_v1, %s2982_s10  ;;  %1354 = vrot.lane.b32.xlu1 %v1353_v25, %s2995_s4 }
 0xdef   :  { %1493 = vrot.lane.b32.xlu0 %v1492_v27, %s2995_s4 }
 0xdf3   :  { %v1331_v13 = vpop.permute.xlu1 %1330 }
 0xdf4   :  { %vm1332_vm8 = vcmp.eq.s32.totalorder %v1331_v13, 1 }
 0xdf7   :  { %v1470_v29 = vpop.permute.xlu0 %1469 }
 0xdf8   :  { %vm1471_vm9 = vcmp.eq.s32.totalorder %v1470_v29, 1 }
 0xe59   :  { %v1342_v16 = vpop.permute.xlu1 %1341 }
 0xe5a   :  { %v1344_v30 = vsel %vm1332_vm8, %v1342_v16, %v3385_v11  ;;  %v1359_v31 = vsel %vm1332_vm8, %v1342_v16, 0.0 }
 0xe5b   :  { %1345 = vst.msk [vmem:[#allocation2] sm:$0x3] %vm105_vm0, %v1344_v30  ;;  %v1360_v33 = vpack.c.bf16 %v1359_v31, %v1359_v31  ;;  %v2678_v31 = vld [vmem:[#allocation12] sm:$0xff]  }
 0xe5d   :  { %1362 = vst.msk [vmem:[#allocation15 + $0x4] sm:$0x1] %vm249_vm6, %v1360_v33  ;;  %v1481_v35 = vpop.permute.xlu0 %1480  ;;  %v1355_v36 = vpop.permute.xlu1 %1354  ;;  %v2679_v33 = vld [vmem:[#allocation14] sm:$0xff]  }
 0xe5e   :  { %v1483_v37 = vsel %vm1471_vm9, %v1481_v35, %v3391_v26  ;;  %v1498_v38 = vsel %vm1471_vm9, %v1481_v35, 0.0  ;;  %v1357_v39 = vsel %vm1332_vm8, %v1355_v36, %v3400_v44  ;;  %v2680_v35 = vld [vmem:[#allocation12 + $0x8] sm:$0xff]  }
 0xe5f   :  { %1484 = vst.msk [vmem:[#allocation4] sm:$0x3] %vm105_vm0, %v1483_v37  ;;  %v1499_v40 = vpack.c.bf16 %v1498_v38, %v1498_v38  ;;  %1358 = vst.msk [vmem:[#allocation3] sm:$0x3] %vm105_vm0, %v1357_v39  ;;  %v2681_v38 = vld [vmem:[#allocation14 + $0x8] sm:$0xff]  }
 0xe61   :  { %1501 = vst.msk [vmem:[#allocation16 + $0x3] sm:$0x1] %vm249_vm6, %v1499_v40  ;;  %v1494_v11 = vpop.permute.xlu0 %1493 }
 0xe62   :  { %v1496_v28 = vsel %vm1471_vm9, %v1494_v11, %v3405_v48  ;;  %v3439_v41 = vld [vmem:[#allocation2] sm:$0x3]  ;;  %v1642_v48 = vld [vmem:[#allocation11 + $0x2] sm:$0x1] }
 0xe63   :  { %1497 = vst.msk [vmem:[#allocation5] sm:$0x3] %vm105_vm0, %v1496_v28  ;;  %v1508_v26 = vpack.c.bf16 %v3439_v41, %v3439_v41  ;;  %v1646_v52 = vunpack.c.l.bf16 %v1642_v48 }
 0xe65   :  { %2592 = vmatmul.mubr.msk.bf16.vlgmr.msra.gmra.mrb[20].mxu0 %vm133_vm2, %v1508_v26 }
 0xe66   :  { %v3445_v12 = vld [vmem:[#allocation4] sm:$0x3]  ;;  %2607 = vmatprep.mubr.msk.bf16.mxu0 %vm2992_vm1, %v2991_v0  ;;  %v3454_v63 = vld [vmem:[#allocation3] sm:$0x3]  ;;  %2604 = vmatpush3.bf16.msra.mxu0 %v2678_v31 }
 0xe67   :  { %v1647_v44 = vpack.c.bf16 %v3445_v12, %v3445_v12  ;;  %v1583_v43 = vrot.slane %v3454_v63, %v3128_v8  ;;  %2605 = vmatprep.subr.bf16.mxu0 %v2991_v0 }
 0xe69   :  { %2600 = vmatmul.mubr.msk.bf16.vlgmr.msra.gmra.mrb[20].mxu1 %vm133_vm2, %v1647_v44 }
 0xe6a   :  { %2615 = vmatprep.mubr.msk.bf16.mxu1 %vm2992_vm1, %v2991_v0  ;;  %v3459_v4 = vld [vmem:[#allocation5] sm:$0x3]  ;;  %2612 = vmatpush3.bf16.msra.mxu1 %v2679_v33 }
 0xe6b   :  { %v1722_v5 = vrot.slane %v3459_v4, %v3128_v8  ;;  %2606 = vmatpush3.bf16.msra.mxu0 %v2680_v35  ;;  %2613 = vmatprep.subr.bf16.mxu1 %v2991_v0 }
 0xe6c   :  { %2619 = vmatprep.subr.bf16.mxu0 %v2991_v0 }
 0xe6e   :  { %2614 = vmatpush3.bf16.msra.mxu1 %v2681_v38 }
 0xe6f   :  { %2627 = vmatprep.subr.bf16.mxu1 %v2991_v0 }
 0xf38   :  { %v1562_v49 = vpop.f32.mrb[20].mxu0 }
 0xf39   :  { %v1568_v50 = vadd.f32 %v1562_v49, %v1507_v46  ;;  %v2593_v51 = vpop.f32.mrb[21].mxu0 }
 0xf3a   :  { %v1565_v54 = vpop.f32.mrb[22].mxu0 }
 0xf3b   :  { %2766 = vtanh.f32 %v1568_v50  ;;  %v2594_v57 = vpop.f32.mrb[23].mxu0  ;;  %v2432_v6 = vmul.f32 -1.442695, %v1568_v50 }
 0xf3c   :  { %v1701_v59 = vpop.f32.mrb[20].mxu1 }
 0xf3d   :  { %v1707_v61 = vadd.f32 %v1701_v59, %v1646_v52  ;;  %v2601_v62 = vpop.f32.mrb[21].mxu1 }
 0xf3e   :  { %v1704_v56 = vpop.f32.mrb[22].mxu1 }
 0xf3f   :  { %2768 = vtanh.f32 %v1707_v61  ;;  %v2602_v42 = vpop.f32.mrb[23].mxu1  ;;  %v2437_v7 = vmul.f32 -1.442695, %v1707_v61 }
 0xf40   :  { %2770 = vpow2.f32 %v2432_v6 }
 0xf41   :  { %2772 = vpow2.f32 %v2437_v7 }
 0xf45   :  { %v2767_v47 = vpop.eup %2766 }
 0xf46   :  { %1589 = vrot.lane.b32.xlu1 %v2767_v47, %s2986_s1  ;;  %v1781_v47 = vld [vmem:[#allocation9 + $0x6] sm:$0x1] }
 0xf49   :  { %v2769_v3 = vpop.eup %2768 }
 0xf4a   :  { %1728 = vrot.lane.b32.xlu0 %v2769_v3, %s2986_s1  ;;  %1584 = vrot.lane.b32.xlu1 %v1583_v43, %s2982_s10  ;;  %v2771_v9 = vpop.eup %2770  ;;  %v1920_v43 = vld [vmem:[#allocation11 + $0x1] sm:$0x1] }
 0xf4b   :  { %v1572_v10 = vadd.f32 1.0, %v2771_v9  ;;  %v2773_v14 = vpop.eup %2772  ;;  %v1924_v6 = vunpack.c.l.bf16 %v1920_v43 }
 0xf4c   :  { %v1711_v17 = vadd.f32 1.0, %v2773_v14 }
 0xf4d   :  { %2774 = vrcp.f32 %v1572_v10 }
 0xf4e   :  { %1723 = vrot.lane.b32.xlu0 %v1722_v5, %s2982_s10  ;;  %2776 = vrcp.f32 %v1711_v17 }
 0xf57   :  { %v2775_v19 = vpop.eup %2774 }
 0xf58   :  { %v2777_v22 = vpop.eup %2776 }
 0xfb8   :  { %v1590_v20 = vpop.permute.xlu1 %1589 }
 0xfb9   :  { %v1592_v21 = vmul.f32 %v2775_v19, %v1590_v20 }
 0xfbb   :  { %1594 = vrot.lane.b32.xlu1 %v1592_v21, %s2982_s10 }
 0xfbc   :  { %v1729_v23 = vpop.permute.xlu0 %1728  ;;  %v1585_v2 = vpop.permute.xlu1 %1584 }
 0xfbd   :  { %v1731_v24 = vmul.f32 %v2777_v22, %v1729_v23  ;;  %v1587_v55 = vmul.f32 %v2775_v19, %v1585_v2 }
 0xfbf   :  { %1733 = vrot.lane.b32.xlu0 %v1731_v24, %s2982_s10 }
 0xfc0   :  { %v1724_v53 = vpop.permute.xlu0 %1723 }
 0xfc1   :  { %v1726_v27 = vmul.f32 %v2777_v22, %v1724_v53 }
0x102d   :  { %v1595_v25 = vpop.permute.xlu1 %1594 }
0x102e   :  { %v1597_v1 = vadd.f32 %v1595_v25, %v1587_v55 }
0x1030   :  { %2778 = vtanh.f32 %v1597_v1  ;;  %v1631_v40 = vrot.slane %v1597_v1, %v3128_v8 }
0x1031   :  { %v1734_v13 = vpop.permute.xlu0 %1733 }
0x1032   :  { %v1736_v29 = vadd.f32 %v1734_v13, %v1726_v27 }
0x1034   :  { %2780 = vtanh.f32 %v1736_v29  ;;  %v1770_v28 = vrot.slane %v1736_v29, %v3128_v8 }
0x103a   :  { %v2779_v16 = vpop.eup %2778 }
0x103b   :  { %1600 = vrot.lane.b32.xlu1 %v2779_v16, %s2986_s1 }
0x103e   :  { %v2781_v30 = vpop.eup %2780 }
0x103f   :  { %1739 = vrot.lane.b32.xlu0 %v2781_v30, %s2986_s1  ;;  %1608 = vperm.xlu1 %2653, %v3299_v34  }
0x1043   :  { %1747 = vperm.xlu0 %2652, %v3293_v32  }
0x10ad   :  { %v1601_v36 = vpop.permute.xlu1 %1600 }
0x10ae   :  { %v1603_v37 = vmul.f32 %v2775_v19, %v1601_v36 }
0x10b0   :  { %v1618_v39 = vrot.slane %v1603_v37, %v3128_v8 }
0x10b1   :  { %v1740_v34 = vpop.permute.xlu0 %1739 }
0x10b2   :  { %v1742_v32 = vmul.f32 %v2777_v22, %v1740_v34  ;;  %1619 = vrot.lane.b32.xlu1 %v1618_v39, %s2982_s10 }
0x10b4   :  { %v1757_v11 = vrot.slane %v1742_v32, %v3128_v8 }
0x10b6   :  { %1758 = vrot.lane.b32.xlu0 %v1757_v11, %s2982_s10  ;;  %1632 = vrot.lane.b32.xlu1 %v1631_v40, %s2995_s4 }
0x10ba   :  { %1771 = vrot.lane.b32.xlu0 %v1770_v28, %s2995_s4 }
0x10be   :  { %v1609_v26 = vpop.permute.xlu1 %1608 }
0x10bf   :  { %vm1610_vm10 = vcmp.eq.s32.totalorder %v1609_v26, 1 }
0x10c2   :  { %v1748_v44 = vpop.permute.xlu0 %1747 }
0x10c3   :  { %vm1749_vm11 = vcmp.eq.s32.totalorder %v1748_v44, 1 }
0x1124   :  { %v1620_v45 = vpop.permute.xlu1 %1619 }
0x1125   :  { %v1622_v46 = vsel %vm1610_vm10, %v1620_v45, %v3439_v41  ;;  %v1637_v48 = vsel %vm1610_vm10, %v1620_v45, 0.0  ;;  %v2682_v45 = vld [vmem:[#allocation12] sm:$0xff]  }
0x1126   :  { %1623 = vst.msk [vmem:[#allocation2] sm:$0x3] %vm105_vm0, %v1622_v46  ;;  %v1638_v49 = vpack.c.bf16 %v1637_v48, %v1637_v48  ;;  %v2683_v46 = vld [vmem:[#allocation14] sm:$0xff]   ;;  %v2684_v48 = vld [vmem:[#allocation12 + $0x8] sm:$0xff]  }
0x1128   :  { %1640 = vst.msk [vmem:[#allocation15 + $0x5] sm:$0x1] %vm249_vm6, %v1638_v49  ;;  %v1759_v50 = vpop.permute.xlu0 %1758  ;;  %v1633_v51 = vpop.permute.xlu1 %1632 }
0x1129   :  { %v1761_v52 = vsel %vm1749_vm11, %v1759_v50, %v3445_v12  ;;  %v1776_v54 = vsel %vm1749_vm11, %v1759_v50, 0.0  ;;  %v1635_v57 = vsel %vm1610_vm10, %v1633_v51, %v3454_v63  ;;  %v1785_v63 = vunpack.c.l.bf16 %v1781_v47  ;;  %v2685_v51 = vld [vmem:[#allocation14 + $0x8] sm:$0xff]  }
0x112a   :  { %1762 = vst.msk [vmem:[#allocation4] sm:$0x3] %vm105_vm0, %v1761_v52  ;;  %v1777_v59 = vpack.c.bf16 %v1776_v54, %v1776_v54  ;;  %1636 = vst.msk [vmem:[#allocation3] sm:$0x3] %vm105_vm0, %v1635_v57 }
0x112c   :  { %1779 = vst.msk [vmem:[#allocation16 + $0x2] sm:$0x1] %vm249_vm6, %v1777_v59  ;;  %v1772_v41 = vpop.permute.xlu0 %1771 }
0x112d   :  { %v1774_v61 = vsel %vm1749_vm11, %v1772_v41, %v3459_v4  ;;  %v3493_v62 = vld [vmem:[#allocation2] sm:$0x3] }
0x112e   :  { %1775 = vst.msk [vmem:[#allocation5] sm:$0x3] %vm105_vm0, %v1774_v61  ;;  %v1786_v12 = vpack.c.bf16 %v3493_v62, %v3493_v62 }
0x1130   :  { %2608 = vmatmul.mubr.msk.bf16.vlgmr.msra.gmra.mrb[24].mxu0 %vm133_vm2, %v1786_v12 }
0x1131   :  { %v3499_v56 = vld [vmem:[#allocation4] sm:$0x3]  ;;  %2623 = vmatprep.mubr.msk.bf16.mxu0 %vm2992_vm1, %v2991_v0  ;;  %v3508_v22 = vld [vmem:[#allocation3] sm:$0x3]  ;;  %2620 = vmatpush3.bf16.msra.mxu0 %v2682_v45 }
0x1132   :  { %v1925_v42 = vpack.c.bf16 %v3499_v56, %v3499_v56  ;;  %v1861_v23 = vrot.slane %v3508_v22, %v3128_v8  ;;  %2621 = vmatprep.subr.bf16.mxu0 %v2991_v0 }
0x1134   :  { %2616 = vmatmul.mubr.msk.bf16.vlgmr.msra.gmra.mrb[24].mxu1 %vm133_vm2, %v1925_v42 }
0x1135   :  { %2631 = vmatprep.mubr.msk.bf16.mxu1 %vm2992_vm1, %v2991_v0  ;;  %v3513_v2 = vld [vmem:[#allocation5] sm:$0x3]  ;;  %2628 = vmatpush3.bf16.msra.mxu1 %v2683_v46 }
0x1136   :  { %v2000_v55 = vrot.slane %v3513_v2, %v3128_v8  ;;  %2622 = vmatpush3.bf16.msra.mxu0 %v2684_v48  ;;  %2629 = vmatprep.subr.bf16.mxu1 %v2991_v0 }
0x1139   :  { %2630 = vmatpush3.bf16.msra.mxu1 %v2685_v51 }
0x1203   :  { %v1840_v3 = vpop.f32.mrb[24].mxu0 }
0x1204   :  { %v1846_v4 = vadd.f32 %v1840_v3, %v1785_v63  ;;  %v2609_v5 = vpop.f32.mrb[25].mxu0 }
0x1205   :  { %v1843_v7 = vpop.f32.mrb[26].mxu0 }
0x1206   :  { %2782 = vtanh.f32 %v1846_v4  ;;  %v2610_v9 = vpop.f32.mrb[27].mxu0  ;;  %v2442_v53 = vmul.f32 -1.442695, %v1846_v4 }
0x1207   :  { %v1979_v10 = vpop.f32.mrb[24].mxu1 }
0x1208   :  { %v1985_v14 = vadd.f32 %v1979_v10, %v1924_v6  ;;  %v2617_v17 = vpop.f32.mrb[25].mxu1 }
0x1209   :  { %v1982_v19 = vpop.f32.mrb[26].mxu1  ;;  %v2059_v17 = vld [vmem:[#allocation9 + $0x7] sm:$0x1] }
0x120a   :  { %2784 = vtanh.f32 %v1985_v14  ;;  %v2618_v20 = vpop.f32.mrb[27].mxu1  ;;  %v2447_v25 = vmul.f32 -1.442695, %v1985_v14  ;;  %v2063_v19 = vunpack.c.l.bf16 %v2059_v17 }
0x120b   :  { %2786 = vpow2.f32 %v2442_v53  ;;  %v2197_v20 = vld [vmem:[#allocation11] sm:$0x1] }
0x120c   :  { %2788 = vpow2.f32 %v2447_v25 }
0x1210   :  { %v2783_v21 = vpop.eup %2782 }
0x1211   :  { %1867 = vrot.lane.b32.xlu1 %v2783_v21, %s2986_s1 }
0x1214   :  { %v2785_v24 = vpop.eup %2784 }
0x1215   :  { %2006 = vrot.lane.b32.xlu0 %v2785_v24, %s2986_s1  ;;  %1862 = vrot.lane.b32.xlu1 %v1861_v23, %s2982_s10  ;;  %v2787_v1 = vpop.eup %2786  ;;  %v2201_v24 = vunpack.c.l.bf16 %v2197_v20 }
0x1216   :  { %v1850_v27 = vadd.f32 1.0, %v2787_v1  ;;  %v2789_v13 = vpop.eup %2788 }
0x1217   :  { %v1989_v29 = vadd.f32 1.0, %v2789_v13 }
0x1218   :  { %2790 = vrcp.f32 %v1850_v27 }
0x1219   :  { %2001 = vrot.lane.b32.xlu0 %v2000_v55, %s2982_s10  ;;  %2792 = vrcp.f32 %v1989_v29 }
0x1222   :  { %v2791_v16 = vpop.eup %2790 }
0x1223   :  { %v2793_v33 = vpop.eup %2792 }
0x1283   :  { %v1868_v30 = vpop.permute.xlu1 %1867 }
0x1284   :  { %v1870_v31 = vmul.f32 %v2791_v16, %v1868_v30 }
0x1286   :  { %1872 = vrot.lane.b32.xlu1 %v1870_v31, %s2982_s10 }
0x1287   :  { %v2007_v35 = vpop.permute.xlu0 %2006  ;;  %v1863_v37 = vpop.permute.xlu1 %1862 }
0x1288   :  { %v2009_v36 = vmul.f32 %v2793_v33, %v2007_v35  ;;  %v1865_v38 = vmul.f32 %v2791_v16, %v1863_v37 }
0x128a   :  { %2011 = vrot.lane.b32.xlu0 %v2009_v36, %s2982_s10 }
0x128b   :  { %v2002_v39 = vpop.permute.xlu0 %2001 }
0x128c   :  { %v2004_v40 = vmul.f32 %v2793_v33, %v2002_v39 }
0x12f8   :  { %v1873_v34 = vpop.permute.xlu1 %1872 }
0x12f9   :  { %v1875_v32 = vadd.f32 %v1873_v34, %v1865_v38 }
0x12fb   :  { %2794 = vtanh.f32 %v1875_v32 }
0x12fc   :  { %v2012_v11 = vpop.permute.xlu0 %2011 }
0x12fd   :  { %v2014_v28 = vadd.f32 %v2012_v11, %v2004_v40 }
0x12ff   :  { %2796 = vtanh.f32 %v2014_v28  ;;  %v2048_v59 = vrot.slane %v2014_v28, %v3128_v8 }
0x1305   :  { %v2795_v26 = vpop.eup %2794 }
0x1306   :  { %1878 = vrot.lane.b32.xlu1 %v2795_v26, %s2986_s1 }
0x1309   :  { %v2797_v44 = vpop.eup %2796 }
0x130a   :  { %2017 = vrot.lane.b32.xlu0 %v2797_v44, %s2986_s1  ;;  %1886 = vperm.xlu1 %2653, %v3237_v18  }
0x130e   :  { %2025 = vperm.xlu0 %2652, %v3231_v15   ;;  %v1909_v15 = vrot.slane %v1875_v32, %v3128_v8 }
0x1378   :  { %v1879_v49 = vpop.permute.xlu1 %1878 }
0x1379   :  { %v1881_v50 = vmul.f32 %v2791_v16, %v1879_v49 }
0x137b   :  { %v1896_v52 = vrot.slane %v1881_v50, %v3128_v8 }
0x137c   :  { %v2018_v54 = vpop.permute.xlu0 %2017 }
0x137d   :  { %v2020_v18 = vmul.f32 %v2793_v33, %v2018_v54  ;;  %1897 = vrot.lane.b32.xlu1 %v1896_v52, %s2982_s10 }
0x137f   :  { %v2035_v57 = vrot.slane %v2020_v18, %v3128_v8 }
0x1381   :  { %2036 = vrot.lane.b32.xlu0 %v2035_v57, %s2982_s10  ;;  %1910 = vrot.lane.b32.xlu1 %v1909_v15, %s2995_s4 }
0x1385   :  { %2049 = vrot.lane.b32.xlu0 %v2048_v59, %s2995_s4 }
0x1389   :  { %v1887_v0 = vpop.permute.xlu1 %1886 }
0x138a   :  { %vm1888_vm1 = vcmp.eq.s32.totalorder %v1887_v0, 1 }
0x138d   :  { %v2026_v41 = vpop.permute.xlu0 %2025 }
0x138e   :  { %vm2027_vm12 = vcmp.eq.s32.totalorder %v2026_v41, 1 }
0x13ef   :  { %v1898_v61 = vpop.permute.xlu1 %1897 }
0x13f0   :  { %v1900_v12 = vsel %vm1888_vm1, %v1898_v61, %v3493_v62  ;;  %v1915_v42 = vsel %vm1888_vm1, %v1898_v61, 0.0 }
0x13f1   :  { %1901 = vst.msk [vmem:[#allocation2] sm:$0x3] %vm105_vm0, %v1900_v12  ;;  %v1916_v47 = vpack.c.bf16 %v1915_v42, %v1915_v42 }
0x13f3   :  { %1918 = vst.msk [vmem:[#allocation15 + $0x6] sm:$0x1] %vm249_vm6, %v1916_v47  ;;  %v2037_v63 = vpop.permute.xlu0 %2036  ;;  %v1911_v43 = vpop.permute.xlu1 %1910 }
0x13f4   :  { %v2039_v3 = vsel %vm2027_vm12, %v2037_v63, %v3499_v56  ;;  %v2054_v4 = vsel %vm2027_vm12, %v2037_v63, 0.0  ;;  %v1913_v5 = vsel %vm1888_vm1, %v1911_v43, %v3508_v22 }
0x13f5   :  { %2040 = vst.msk [vmem:[#allocation4] sm:$0x3] %vm105_vm0, %v2039_v3  ;;  %v2055_v6 = vpack.c.bf16 %v2054_v4, %v2054_v4  ;;  %1914 = vst.msk [vmem:[#allocation3] sm:$0x3] %vm105_vm0, %v1913_v5 }
0x13f7   :  { %2057 = vst.msk [vmem:[#allocation16 + $0x1] sm:$0x1] %vm249_vm6, %v2055_v6  ;;  %v2050_v62 = vpop.permute.xlu0 %2049 }
0x13f8   :  { %v2052_v7 = vsel %vm2027_vm12, %v2050_v62, %v3513_v2  ;;  %v3545_v9 = vld [vmem:[#allocation2] sm:$0x3] }
0x13f9   :  { %2053 = vst.msk [vmem:[#allocation5] sm:$0x3] %vm105_vm0, %v2052_v7  ;;  %v2064_v56 = vpack.c.bf16 %v3545_v9, %v3545_v9 }
0x13fb   :  { %2624 = vmatmul.mubr.msk.bf16.vlgmr.msra.gmra.mrb[28].mxu0 %vm133_vm2, %v2064_v56 }
0x13fc   :  { %v3551_v10 = vld [vmem:[#allocation4] sm:$0x3]  ;;  %v3556_v16 = vld [vmem:[#allocation3] sm:$0x3] }
0x13fd   :  { %v2202_v14 = vpack.c.bf16 %v3551_v10, %v3551_v10  ;;  %v2139_v30 = vrot.slane %v3556_v16, %v3128_v8 }
0x13ff   :  { %2632 = vmatmul.mubr.msk.bf16.vlgmr.msra.gmra.mrb[28].mxu1 %vm133_vm2, %v2202_v14 }
0x1400   :  { %v3561_v33 = vld [vmem:[#allocation5] sm:$0x3] }
0x1401   :  { %v2277_v35 = vrot.slane %v3561_v33, %v3128_v8 }
0x14ce   :  { %v2118_v21 = vpop.f32.mrb[28].mxu0 }
0x14cf   :  { %v2124_v22 = vadd.f32 %v2118_v21, %v2063_v19  ;;  %v2625_v23 = vpop.f32.mrb[29].mxu0 }
0x14d0   :  { %v2121_v2 = vpop.f32.mrb[30].mxu0 }
0x14d1   :  { %2798 = vtanh.f32 %v2124_v22  ;;  %v2626_v55 = vpop.f32.mrb[31].mxu0  ;;  %v2452_v36 = vmul.f32 -1.442695, %v2124_v22 }
0x14d2   :  { %v2256_v53 = vpop.f32.mrb[28].mxu1 }
0x14d3   :  { %v2262_v25 = vadd.f32 %v2256_v53, %v2201_v24  ;;  %v2633_v1 = vpop.f32.mrb[29].mxu1 }
0x14d4   :  { %v2259_v27 = vpop.f32.mrb[30].mxu1 }
0x14d5   :  { %2800 = vtanh.f32 %v2262_v25  ;;  %v2634_v13 = vpop.f32.mrb[31].mxu1  ;;  %v2457_v37 = vmul.f32 -1.442695, %v2262_v25 }
0x14d6   :  { %2802 = vpow2.f32 %v2452_v36 }
0x14d7   :  { %2804 = vpow2.f32 %v2457_v37 }
0x14db   :  { %v2799_v29 = vpop.eup %2798 }
0x14dc   :  { %2145 = vrot.lane.b32.xlu1 %v2799_v29, %s2986_s1 }
0x14df   :  { %v2801_v31 = vpop.eup %2800 }
0x14e0   :  { %2283 = vrot.lane.b32.xlu0 %v2801_v31, %s2986_s1  ;;  %2140 = vrot.lane.b32.xlu1 %v2139_v30, %s2982_s10  ;;  %v2803_v38 = vpop.eup %2802 }
0x14e1   :  { %v2128_v39 = vadd.f32 1.0, %v2803_v38  ;;  %v2805_v34 = vpop.eup %2804 }
0x14e2   :  { %v2266_v32 = vadd.f32 1.0, %v2805_v34 }
0x14e3   :  { %2806 = vrcp.f32 %v2128_v39 }
0x14e4   :  { %2278 = vrot.lane.b32.xlu0 %v2277_v35, %s2982_s10  ;;  %2808 = vrcp.f32 %v2266_v32 }
0x14ed   :  { %v2807_v40 = vpop.eup %2806 }
0x14ee   :  { %v2809_v26 = vpop.eup %2808 }
0x154e   :  { %v2146_v11 = vpop.permute.xlu1 %2145 }
0x154f   :  { %v2148_v28 = vmul.f32 %v2807_v40, %v2146_v11 }
0x1551   :  { %2150 = vrot.lane.b32.xlu1 %v2148_v28, %s2982_s10 }
0x1552   :  { %v2284_v44 = vpop.permute.xlu0 %2283  ;;  %v2141_v46 = vpop.permute.xlu1 %2140 }
0x1553   :  { %v2286_v45 = vmul.f32 %v2809_v26, %v2284_v44  ;;  %v2143_v48 = vmul.f32 %v2807_v40, %v2141_v46 }
0x1555   :  { %2288 = vrot.lane.b32.xlu0 %v2286_v45, %s2982_s10 }
0x1556   :  { %v2279_v49 = vpop.permute.xlu0 %2278 }
0x1557   :  { %v2281_v52 = vmul.f32 %v2809_v26, %v2279_v49 }
0x15c3   :  { %v2151_v50 = vpop.permute.xlu1 %2150 }
0x15c4   :  { %v2153_v51 = vadd.f32 %v2151_v50, %v2143_v48 }
0x15c6   :  { %2810 = vtanh.f32 %v2153_v51  ;;  %v2187_v42 = vrot.slane %v2153_v51, %v3128_v8 }
0x15c7   :  { %v2289_v54 = vpop.permute.xlu0 %2288 }
0x15c8   :  { %v2291_v18 = vadd.f32 %v2289_v54, %v2281_v52 }
0x15ca   :  { %2812 = vtanh.f32 %v2291_v18 }
0x15d0   :  { %v2811_v15 = vpop.eup %2810 }
0x15d1   :  { %2156 = vrot.lane.b32.xlu1 %v2811_v15, %s2986_s1 }
0x15d4   :  { %v2813_v57 = vpop.eup %2812 }
0x15d5   :  { %2294 = vrot.lane.b32.xlu0 %v2813_v57, %s2986_s1  ;;  %2164 = vperm.xlu1 %2653, %v3175_v60   ;;  %v2325_v60 = vrot.slane %v2291_v18, %v3128_v8  ;;  %s2996_s1 = smov [#allocation15]  }
0x15d6   :  { %s2339_s22 = sshll.u32 %s2996_s1, 4  ;;  %s2340_s22 = int_to_ptr.vmem [resolvable:$true] %s2339_s22 }
0x15d7   :  { %s2927_s23 = scalar_lea.vmem %s2340_s22, 128  ;;  %p2932_p5 = scmp.lt.s32.totalorder %s2340_s22, %s2340_s22 }
0x15d8   :  { %p2928_p4 = scmp.ne.s32.totalorder %s2340_s22, %s2927_s23  ;;  %p2933_p6 = scmp.lt.s32.totalorder %s2927_s23, %s2927_s23 }
0x15d9   :  { %2302 = vperm.xlu0 %2652, %v3169_v58  }
0x15da   :  { %p2934_p7 = por %p2933_p6, %p2932_p5 }
0x15dc   :  { %p2935_p8 = pnand %p2934_p7, %p2928_p4 }
0x1643   :  { %v2157_v59 = vpop.permute.xlu1 %2156 }
0x1644   :  { %v2159_v0 = vmul.f32 %v2807_v40, %v2157_v59 }
0x1646   :  { %v2174_v41 = vrot.slane %v2159_v0, %v3128_v8 }
0x1647   :  { %v2295_v61 = vpop.permute.xlu0 %2294 }
0x1648   :  { %v2297_v12 = vmul.f32 %v2809_v26, %v2295_v61  ;;  %2175 = vrot.lane.b32.xlu1 %v2174_v41, %s2982_s10 }
0x164a   :  { %v2312_v47 = vrot.slane %v2297_v12, %v3128_v8 }
0x164c   :  { %2313 = vrot.lane.b32.xlu0 %v2312_v47, %s2982_s10  ;;  %2188 = vrot.lane.b32.xlu1 %v2187_v42, %s2995_s4  ;;  %s2997_s10 = smov [#allocation16]  }
0x164d   :  { %s2355_s21 = sshll.u32 %s2997_s10, 4  ;;  %s2356_s21 = int_to_ptr.vmem [resolvable:$true] %s2355_s21 }
0x1650   :  { %2326 = vrot.lane.b32.xlu0 %v2325_v60, %s2995_s4 }
0x1654   :  { %v2165_v58 = vpop.permute.xlu1 %2164 }
0x1655   :  { %vm2166_vm2 = vcmp.eq.s32.totalorder %v2165_v58, 1 }
0x1658   :  { %v2303_v63 = vpop.permute.xlu0 %2302 }
0x1659   :  { %vm2304_vm13 = vcmp.eq.s32.totalorder %v2303_v63, 1 }
0x16ba   :  { %v2176_v43 = vpop.permute.xlu1 %2175 }
0x16bb   :  { %v2178_v3 = vsel %vm2166_vm2, %v2176_v43, %v3545_v9  ;;  %v2193_v4 = vsel %vm2166_vm2, %v2176_v43, 0.0 }
0x16bc   :  { %2179 = vst.msk [vmem:[#allocation2] sm:$0x3] %vm105_vm0, %v2178_v3  ;;  %v2194_v5 = vpack.c.bf16 %v2193_v4, %v2193_v4 }
0x16be   :  { %2196 = vst.msk [vmem:[#allocation15 + $0x7] sm:$0x1] %vm249_vm6, %v2194_v5  ;;  %v2314_v8 = vpop.permute.xlu0 %2313  ;;  %v2189_v6 = vpop.permute.xlu1 %2188 }
0x16bf   :  { %v2316_v62 = vsel %vm2304_vm13, %v2314_v8, %v3551_v10  ;;  %v2331_v7 = vsel %vm2304_vm13, %v2314_v8, 0.0  ;;  %v2191_v9 = vsel %vm2166_vm2, %v2189_v6, %v3556_v16 }
0x16c0   :  { %2938 = shalt.err (!%p2935_p8)
}
0x16c1   :  { %s2939_s26 = scalar_lea.hbm %s3633_s5, 128 }
0x16c2   :  { %p2940_p9 = scmp.ne.s32.totalorder %s3633_s5, %s2939_s26  ;;  %p2943_p10 = scmp.lt.u32.totalorder %s2939_s26, %s3633_s5 }
0x16c4   :  { %p2945_p11 = pnand %p2943_p10, %p2940_p9 }
0x16c6   :  { %2948 = shalt.err (!%p2945_p11)
}
0x16c7   :  { %2345 = dma.vmem_to_hbm [thread:$0]  %s2340_s22, 128, %s3633_s5, [#allocation8], %s2983_s11, %s2983_s11, %s2984_s12   ;;  %2317 = vst.msk [vmem:[#allocation4] sm:$0x3] %vm105_vm0, %v2316_v62  ;;  %v2332_v56 = vpack.c.bf16 %v2331_v7, %v2331_v7  ;;  %2192 = vst.msk [vmem:[#allocation3] sm:$0x3] %vm105_vm0, %v2191_v9  ;;  %v2327_v10 = vpop.permute.xlu0 %2326 }
0x16c8   :  { %v2329_v14 = vsel %vm2304_vm13, %v2327_v10, %v3561_v33  ;;  %s2949_s14 = scalar_lea.vmem %s2356_s21, 128  ;;  %p2954_p13 = scmp.lt.s32.totalorder %s2356_s21, %s2356_s21 }
0x16c9   :  { %2333 = vst.msk [vmem:[#allocation16] sm:$0x1] %vm249_vm6, %v2332_v56  ;;  %p2950_p12 = scmp.ne.s32.totalorder %s2356_s21, %s2949_s14  ;;  %p2955_p0 = scmp.lt.s32.totalorder %s2949_s14, %s2949_s14 }
0x16cb   :  { %p2956_p1 = por %p2955_p0, %p2954_p13 }
0x16cd   :  { %p2957_p2 = pnand %p2956_p1, %p2950_p12 }
0x16cf   :  { %2960 = shalt.err (!%p2957_p2)
}
0x16d0   :  { %s2961_s2 = scalar_lea.hbm %s3634_s6, 128 }
0x16d1   :  { %p2962_p3 = scmp.ne.s32.totalorder %s3634_s6, %s2961_s2  ;;  %p2965_p4 = scmp.lt.u32.totalorder %s2961_s2, %s3634_s6 }
0x16d3   :  { %p2967_p5 = pnand %p2965_p4, %p2962_p3 }
0x16d5   :  { %2970 = shalt.err (!%p2967_p5)
}
0x16d6   :  { %2361 = dma.vmem_to_hbm [thread:$0]  %s2356_s21, 128, %s3634_s6, [#allocation17], %s2983_s11, %s2983_s11, %s2984_s12   ;;  %2330 = vst.msk [vmem:[#allocation5] sm:$0x3] %vm105_vm0, %v2329_v14 }
0x16d7   :  { %2977 = dma.done.wait [#allocation8], 128  }
0x16d8   :  { %2978 = vsyncadd [#allocation8], 4294967168 }
0x16d9   :  { %2979 = dma.done.wait [#allocation17], 128  }
0x16da   :  { %2980 = vsyncadd [#allocation17], 4294967168 }
0x16db   :  { %2368 = vsyncpa [#allocation7], 1 }
0x16dc   :  { %2369 = vsyncpa [#allocation10], 1 }
0x16dd   :  { %2370 = vsyncpa [#allocation13], 1 }
0x16de   :  { %2371 = vsyncpa [#allocation8], 1 }
0x16df   :  { %2372 = vsyncpa [#allocation17], 1 }

</bundles_post_ra>
